<compile_context>
chip_gen: v5e
topology: v5e:2x2
jax: 0.10.0
libtpu: 0.0.40
codegen_flags: <defaults>
</compile_context>

<pallas_src>
import math
import functools

import jax
import jax.numpy as jnp
from jax.experimental import pallas as pl
from jax.experimental.pallas import tpu as pltpu


# ----------------------------- Pallas kernel ------------------------------- #
def gnn_kernel(x_ref, w_ref, b_ref, mask_ref, gb_ref, out_ref, proj_scr, attn_scr,
               *, num_heads, head_dim):
    HD = num_heads * head_dim

    # Fused Q/K/V/skip projection: ONE bf16 MXU matmul with f32 accumulation, written
    # straight into VMEM scratch so the [N, 4*HD] f32 block is never live across the loop.
    proj_scr[...] = jnp.dot(x_ref[...], w_ref[...],
                            preferred_element_type=jnp.float32) + b_ref[...]

    # Additive attention bias built once in f32 from the bf16 0/1 mask
    # (0 on edges, -1e30 off edges); the mask value is dead after this line.
    bias = (mask_ref[...].astype(jnp.float32) - 1.0) * jnp.float32(1e30)

    contract_last = (((1,), (1,)), ((), ()))  # contract last axes of both operands (no .T)

    # Per-head attention (H small, static loop); results go directly into scratch columns.
    for h in range(num_heads):
        lo = h * head_dim
        qh = proj_scr[:, lo:lo + head_dim]                       # scale already folded into W_q/b_q
        kh = proj_scr[:, HD + lo:HD + lo + head_dim]
        vh = proj_scr[:, 2 * HD + lo:2 * HD + lo + head_dim]
        s = jax.lax.dot_general(qh, kh, contract_last,
                                preferred_element_type=jnp.float32) + bias
        # Clamp the row max at 0: off-edge scores (-1e30) and fully-isolated rows then
        # exp() to exactly 0 with no post-exp mask multiply, and on-edge rows never overflow.
        m = jnp.maximum(jnp.max(s, axis=-1, keepdims=True), 0.0)
        p = jnp.exp(s - m)
        denom = jnp.sum(p, axis=-1, keepdims=True)
        inv = pl.reciprocal(jnp.where(denom > 0, denom, 1.0), approx=True)
        attn_scr[:, lo:lo + head_dim] = (
            jnp.dot(p, vh, preferred_element_type=jnp.float32) * inv)

    # concat(heads) + root/skip linear (skip slice loaded only now, after the loop).
    out = attn_scr[...] + proj_scr[:, 3 * HD:4 * HD]

    # BatchNorm1d (training-mode batch stats) + LeakyReLU(0.01); f32 elementwise throughout.
    mean = jnp.mean(out, axis=0, keepdims=True)
    var = jnp.mean((out - mean) ** 2, axis=0, keepdims=True)    # biased variance (PyTorch BN)
    y = (out - mean) * jax.lax.rsqrt(var + 1e-5) * gb_ref[0:1, :] + gb_ref[1:2, :]
    out_ref[...] = jnp.where(y > 0, y, 0.01 * y).astype(out_ref.dtype)


# --------------------------- parameter preparation -------------------------- #
def prepare_params(params, *, num_heads, h2_dim):
    """Fuse + cast weights ONCE (not per forward): W_q/W_k/W_v/W_skip -> one bf16 matrix,
    biases -> one f32 row, BN gamma/beta -> one [2, HD] f32 block. The 1/sqrt(head_dim)
    attention scale is folded into the Q projection."""
    scale = jnp.float32(1.0 / math.sqrt(h2_dim))
    w_all = jnp.concatenate(
        [params["w_q"] * scale, params["w_k"], params["w_v"], params["w_skip"]],
        axis=1).astype(jnp.bfloat16)                              # [G, 4*HD]
    b_all = jnp.concatenate(
        [params["b_q"] * scale, params["b_k"], params["b_v"], params["b_skip"]],
        axis=1).astype(jnp.float32)                               # [1, 4*HD]
    gb = jnp.concatenate([params["gamma"], params["beta"]], axis=0).astype(jnp.float32)
    return {"w_all": w_all, "b_all": b_all, "gb": gb}


# ------------------------------ wrapper ------------------------------------ #
def gnn_forward(node_features, edge_index, edge_type, prepared, *, num_heads, h2_dim):
    # edge_type is accepted for interface parity; the RGCN branch's result is overwritten
    # before return in the reference forward, so it is dead work and is not computed.
    del edge_type
    N = node_features.shape[0]
    HD = num_heads * h2_dim

    # Glue: densify the sparse graph into a 0/1 adjacency mask (bf16 carrier halves the
    # largest DMA; sentinel bias is built in f32 in-kernel). Sparse scatter message passing
    # has no clean static-shape Pallas form at this size.
    src, dst = edge_index[0], edge_index[1]
    mask = jnp.zeros((N, N), jnp.bfloat16).at[dst, src].set(1.0)   # mask[i, j] = edge j -> i

    x_bf = node_features.astype(jnp.bfloat16)
    kernel = functools.partial(gnn_kernel, num_heads=num_heads, head_dim=h2_dim)

    def full(shape):
        return pl.BlockSpec(tuple(shape), lambda i, _n=len(shape): (0,) * _n)

    inputs = [x_bf, prepared["w_all"], prepared["b_all"], mask, prepared["gb"]]

    # TODO(synk): for large N (or many graphs per step), tile the target-node rows on a
    # "parallel" grid axis with a two-pass BatchNorm (per-tile sum/sumsq then normalize),
    # and batch graphs into one call, so v7x's second TensorCore and DMA pipelining are used;
    # at N=128 everything fits VMEM in a single step and the call is launch-overhead-bound.
    out = pl.pallas_call(
        kernel,
        grid=(1,),
        in_specs=[full(a.shape) for a in inputs],
        out_specs=full((N, HD)),
        out_shape=jax.ShapeDtypeStruct((N, HD), jnp.float32),
        scratch_shapes=[pltpu.VMEM((N, 4 * HD), jnp.float32),   # fused projection
                        pltpu.VMEM((N, HD), jnp.float32)],      # per-head attention output
        compiler_params=pltpu.CompilerParams(dimension_semantics=("arbitrary",)),
    )(*inputs)
    return out


# --------------------------- parameter init --------------------------------- #
def _linear(key, fan_in, fan_out):
    wk, bk = jax.random.split(key)
    lim = 1.0 / math.sqrt(fan_in)
    w = jax.random.uniform(wk, (fan_in, fan_out), jnp.float32, -lim, lim)
    b = jax.random.uniform(bk, (1, fan_out), jnp.float32, -lim, lim)
    return w, b


def init_params(key, g_dim, h2_dim, num_heads):
    HD = num_heads * h2_dim
    ks = jax.random.split(key, 4)
    w_q, b_q = _linear(ks[0], g_dim, HD)
    w_k, b_k = _linear(ks[1], g_dim, HD)
    w_v, b_v = _linear(ks[2], g_dim, HD)
    w_skip, b_skip = _linear(ks[3], g_dim, HD)
    return {
        "w_q": w_q, "b_q": b_q, "w_k": w_k, "b_k": b_k,
        "w_v": w_v, "b_v": b_v, "w_skip": w_skip, "b_skip": b_skip,
        "gamma": jnp.ones((1, HD), jnp.float32),   # BatchNorm1d weight init
        "beta": jnp.zeros((1, HD), jnp.float32),   # BatchNorm1d bias init
    }


# --------------------------------- main ------------------------------------- #
if __name__ == "__main__":
    # Small, hardware-friendly sizes (lane/sublane aligned: N=128, G=128, HD=4*32=128).
    N = 128           # number of graph nodes
    G_DIM = 128       # input node feature dim (== h1_dim; TransformerConv in_dim)
    H2_DIM = 32       # transformer per-head dim
    NUM_HEADS = 4     # args.graph_transformer_nheads
    NUM_RELS = 3      # num_relations (only used to build edge_type; RGCN output is dead)

    key = jax.random.PRNGKey(0)
    k_feat, k_adj, k_type, k_par = jax.random.split(key, 4)

    node_features = jax.random.normal(k_feat, (N, G_DIM), jnp.float32)

    # Deterministic random graph without duplicate edges (exactly matches the dense mask).
    edge_mat = jax.random.bernoulli(k_adj, 0.1, (N, N))
    srcs, dsts = jnp.nonzero(edge_mat)                       # concrete (outside jit)
    edge_index = jnp.stack([srcs, dsts]).astype(jnp.int32)   # [2, E], row0=source, row1=target
    num_edges = edge_index.shape[1]
    edge_type = jax.random.randint(k_type, (num_edges,), 0, NUM_RELS, jnp.int32)

    params = init_params(k_par, G_DIM, H2_DIM, NUM_HEADS)
    prepared = prepare_params(params, num_heads=NUM_HEADS, h2_dim=H2_DIM)  # fuse/cast once

    out = gnn_forward(node_features, edge_index, edge_type, prepared,
                      num_heads=NUM_HEADS, h2_dim=H2_DIM)
    out = jax.block_until_ready(out)

    assert out.shape == (N, NUM_HEADS * H2_DIM)
    assert bool(jnp.all(jnp.isfinite(out)))
    print("KERNEL_OK")
</pallas_src>

<mosaic_0001>
module attributes {stable_mosaic.version = 11 : i64} {
  func.func @gnn_kernel(%arg0: i32, %arg1: memref<128x128xbf16, #tpu.memory_space<vmem>>, %arg2: memref<128x512xbf16, #tpu.memory_space<vmem>>, %arg3: memref<1x512xf32, #tpu.memory_space<vmem>>, %arg4: memref<128x128xbf16, #tpu.memory_space<vmem>>, %arg5: memref<2x128xf32, #tpu.memory_space<vmem>>, %arg6: memref<128x128xf32, #tpu.memory_space<vmem>>, %arg7: memref<128x512xf32, #tpu.memory_space<vmem>>, %arg8: memref<128x128xf32, #tpu.memory_space<vmem>>) attributes {dimension_semantics = [#tpu.dimension_semantics<arbitrary>], iteration_bounds = array<i64: 1>, scalar_prefetch = 0 : i64, scratch_operands = 2 : i64, tpu.core_type = #tpu.core_type<tc>, window_params = [{pipeline_mode = #tpu.pipeline_mode<synchronous>, transform_indices = @transform_0, window_bounds = array<i64: 128, 128>}, {pipeline_mode = #tpu.pipeline_mode<synchronous>, transform_indices = @transform_1, window_bounds = array<i64: 128, 512>}, {pipeline_mode = #tpu.pipeline_mode<synchronous>, transform_indices = @transform_2, window_bounds = array<i64: 1, 512>}, {pipeline_mode = #tpu.pipeline_mode<synchronous>, transform_indices = @transform_3, window_bounds = array<i64: 128, 128>}, {pipeline_mode = #tpu.pipeline_mode<synchronous>, transform_indices = @transform_4, window_bounds = array<i64: 2, 128>}, {pipeline_mode = #tpu.pipeline_mode<synchronous>, transform_indices = @transform_5, window_bounds = array<i64: 128, 128>}]} {
    %c0 = arith.constant 0 : index
    %c0_0 = arith.constant 0 : index
    %0 = vector.load %arg1[%c0, %c0_0] : memref<128x128xbf16, #tpu.memory_space<vmem>>, vector<128x128xbf16>
    %c0_1 = arith.constant 0 : index
    %c0_2 = arith.constant 0 : index
    %1 = vector.load %arg2[%c0_1, %c0_2] : memref<128x512xbf16, #tpu.memory_space<vmem>>, vector<128x512xbf16>
    %cst = arith.constant dense<0.000000e+00> : vector<128x512xf32>
    %2 = tpu.matmul %0, %1, %cst {dimension_numbers = #tpu.dot_dimension_numbers<[1], [0], [0], [1], [0, 0, 1, 1], [], []>} : vector<128x128xbf16>, vector<128x512xbf16>, vector<128x512xf32> -> vector<128x512xf32>
    %c0_3 = arith.constant 0 : index
    %c0_4 = arith.constant 0 : index
    %3 = vector.load %arg3[%c0_3, %c0_4] : memref<1x512xf32, #tpu.memory_space<vmem>>, vector<1x512xf32>
    %4 = vector.broadcast %3 : vector<1x512xf32> to vector<128x512xf32>
    %5 = arith.addf %2, %4 : vector<128x512xf32>
    %c0_5 = arith.constant 0 : index
    %c0_6 = arith.constant 0 : index
    %6 = vector.load %arg7[%c0_5, %c0_6] : memref<128x512xf32, #tpu.memory_space<vmem>>, vector<128x512xf32>
    tpu.vector_store %arg7[%c0_5, %c0_6], %5 {strides = array<i32>} : memref<128x512xf32, #tpu.memory_space<vmem>>, vector<128x512xf32>,
    %c0_7 = arith.constant 0 : index
    %c0_8 = arith.constant 0 : index
    %7 = vector.load %arg4[%c0_7, %c0_8] : memref<128x128xbf16, #tpu.memory_space<vmem>>, vector<128x128xbf16>
    %8 = arith.extf %7 : vector<128x128xbf16> to vector<128x128xf32>
    %cst_9 = arith.constant 1.000000e+00 : f32
    %9 = vector.broadcast %cst_9 : f32 to vector<128x128xf32>
    %10 = arith.subf %8, %9 : vector<128x128xf32>
    %cst_10 = arith.constant 1.000000e+30 : f32
    %11 = vector.broadcast %cst_10 : f32 to vector<128x128xf32>
    %12 = arith.mulf %10, %11 : vector<128x128xf32>
    %c0_11 = arith.constant 0 : index
    %c0_12 = arith.constant 0 : index
    %13 = vector.load %arg7[%c0_11, %c0_12] : memref<128x512xf32, #tpu.memory_space<vmem>>, vector<128x32xf32>
    %c0_13 = arith.constant 0 : index
    %c128 = arith.constant 128 : index
    %14 = vector.load %arg7[%c0_13, %c128] : memref<128x512xf32, #tpu.memory_space<vmem>>, vector<128x32xf32>
    %c0_14 = arith.constant 0 : index
    %c256 = arith.constant 256 : index
    %15 = vector.load %arg7[%c0_14, %c256] : memref<128x512xf32, #tpu.memory_space<vmem>>, vector<128x32xf32>
    %cst_15 = arith.constant dense<0.000000e+00> : vector<128x128xf32>
    %16 = tpu.matmul %13, %14, %cst_15 {dimension_numbers = #tpu.dot_dimension_numbers<[1], [1], [0], [0], [0, 0, 1, 0], [], []>} : vector<128x32xf32>, vector<128x32xf32>, vector<128x128xf32> -> vector<128x128xf32>
    %17 = arith.addf %16, %12 : vector<128x128xf32>
    %cst_16 = arith.constant dense<0xFF800000> : vector<128xf32>
    %18 = vector.multi_reduction <maximumf>, %17, %cst_16 [1] : vector<128x128xf32> to vector<128xf32>
    %19 = vector.shape_cast %18 : vector<128xf32> to vector<128x1xf32>
    %cst_17 = arith.constant 0.000000e+00 : f32
    %20 = vector.broadcast %cst_17 : f32 to vector<128x1xf32>
    %21 = arith.maximumf %19, %20 : vector<128x1xf32>
    %22 = vector.broadcast %21 : vector<128x1xf32> to vector<128x128xf32>
    %23 = arith.subf %17, %22 : vector<128x128xf32>
    %24 = math.exp %23 : vector<128x128xf32>
    %cst_18 = arith.constant dense<0.000000e+00> : vector<128xf32>
    %25 = vector.multi_reduction <add>, %24, %cst_18 [1] : vector<128x128xf32> to vector<128xf32>
    %26 = vector.shape_cast %25 : vector<128xf32> to vector<128x1xf32>
    %cst_19 = arith.constant 0.000000e+00 : f32
    %27 = vector.broadcast %cst_19 : f32 to vector<128x1xf32>
    %28 = arith.cmpf ogt, %26, %27 : vector<128x1xf32>
    %cst_20 = arith.constant 1.000000e+00 : f32
    %29 = vector.broadcast %cst_20 : f32 to vector<128x1xf32>
    %30 = arith.select %28, %26, %29 : vector<128x1xi1>, vector<128x1xf32>
    %31 = tpu.reciprocal %30 {approx = true} : vector<128x1xf32> -> vector<128x1xf32>
    %cst_21 = arith.constant dense<0.000000e+00> : vector<128x32xf32>
    %32 = tpu.matmul %24, %15, %cst_21 {dimension_numbers = #tpu.dot_dimension_numbers<[1], [0], [0], [1], [0, 0, 1, 1], [], []>} : vector<128x128xf32>, vector<128x32xf32>, vector<128x32xf32> -> vector<128x32xf32>
    %33 = vector.broadcast %31 : vector<128x1xf32> to vector<128x32xf32>
    %34 = arith.mulf %32, %33 : vector<128x32xf32>
    %c0_22 = arith.constant 0 : index
    %c0_23 = arith.constant 0 : index
    %35 = vector.load %arg8[%c0_22, %c0_23] : memref<128x128xf32, #tpu.memory_space<vmem>>, vector<128x32xf32>
    tpu.vector_store %arg8[%c0_22, %c0_23], %34 {strides = array<i32>} : memref<128x128xf32, #tpu.memory_space<vmem>>, vector<128x32xf32>,
    %c0_24 = arith.constant 0 : index
    %c32 = arith.constant 32 : index
    %36 = vector.load %arg7[%c0_24, %c32] : memref<128x512xf32, #tpu.memory_space<vmem>>, vector<128x32xf32>
    %c0_25 = arith.constant 0 : index
    %c160 = arith.constant 160 : index
    %37 = vector.load %arg7[%c0_25, %c160] : memref<128x512xf32, #tpu.memory_space<vmem>>, vector<128x32xf32>
    %c0_26 = arith.constant 0 : index
    %c288 = arith.constant 288 : index
    %38 = vector.load %arg7[%c0_26, %c288] : memref<128x512xf32, #tpu.memory_space<vmem>>, vector<128x32xf32>
    %cst_27 = arith.constant dense<0.000000e+00> : vector<128x128xf32>
    %39 = tpu.matmul %36, %37, %cst_27 {dimension_numbers = #tpu.dot_dimension_numbers<[1], [1], [0], [0], [0, 0, 1, 0], [], []>} : vector<128x32xf32>, vector<128x32xf32>, vector<128x128xf32> -> vector<128x128xf32>
    %40 = arith.addf %39, %12 : vector<128x128xf32>
    %cst_28 = arith.constant dense<0xFF800000> : vector<128xf32>
    %41 = vector.multi_reduction <maximumf>, %40, %cst_28 [1] : vector<128x128xf32> to vector<128xf32>
    %42 = vector.shape_cast %41 : vector<128xf32> to vector<128x1xf32>
    %cst_29 = arith.constant 0.000000e+00 : f32
    %43 = vector.broadcast %cst_29 : f32 to vector<128x1xf32>
    %44 = arith.maximumf %42, %43 : vector<128x1xf32>
    %45 = vector.broadcast %44 : vector<128x1xf32> to vector<128x128xf32>
    %46 = arith.subf %40, %45 : vector<128x128xf32>
    %47 = math.exp %46 : vector<128x128xf32>
    %cst_30 = arith.constant dense<0.000000e+00> : vector<128xf32>
    %48 = vector.multi_reduction <add>, %47, %cst_30 [1] : vector<128x128xf32> to vector<128xf32>
    %49 = vector.shape_cast %48 : vector<128xf32> to vector<128x1xf32>
    %cst_31 = arith.constant 0.000000e+00 : f32
    %50 = vector.broadcast %cst_31 : f32 to vector<128x1xf32>
    %51 = arith.cmpf ogt, %49, %50 : vector<128x1xf32>
    %cst_32 = arith.constant 1.000000e+00 : f32
    %52 = vector.broadcast %cst_32 : f32 to vector<128x1xf32>
    %53 = arith.select %51, %49, %52 : vector<128x1xi1>, vector<128x1xf32>
    %54 = tpu.reciprocal %53 {approx = true} : vector<128x1xf32> -> vector<128x1xf32>
    %cst_33 = arith.constant dense<0.000000e+00> : vector<128x32xf32>
    %55 = tpu.matmul %47, %38, %cst_33 {dimension_numbers = #tpu.dot_dimension_numbers<[1], [0], [0], [1], [0, 0, 1, 1], [], []>} : vector<128x128xf32>, vector<128x32xf32>, vector<128x32xf32> -> vector<128x32xf32>
    %56 = vector.broadcast %54 : vector<128x1xf32> to vector<128x32xf32>
    %57 = arith.mulf %55, %56 : vector<128x32xf32>
    %c0_34 = arith.constant 0 : index
    %c32_35 = arith.constant 32 : index
    %58 = vector.load %arg8[%c0_34, %c32_35] : memref<128x128xf32, #tpu.memory_space<vmem>>, vector<128x32xf32>
    tpu.vector_store %arg8[%c0_34, %c32_35], %57 {strides = array<i32>} : memref<128x128xf32, #tpu.memory_space<vmem>>, vector<128x32xf32>,
    %c0_36 = arith.constant 0 : index
    %c64 = arith.constant 64 : index
    %59 = vector.load %arg7[%c0_36, %c64] : memref<128x512xf32, #tpu.memory_space<vmem>>, vector<128x32xf32>
    %c0_37 = arith.constant 0 : index
    %c192 = arith.constant 192 : index
    %60 = vector.load %arg7[%c0_37, %c192] : memref<128x512xf32, #tpu.memory_space<vmem>>, vector<128x32xf32>
    %c0_38 = arith.constant 0 : index
    %c320 = arith.constant 320 : index
    %61 = vector.load %arg7[%c0_38, %c320] : memref<128x512xf32, #tpu.memory_space<vmem>>, vector<128x32xf32>
    %cst_39 = arith.constant dense<0.000000e+00> : vector<128x128xf32>
    %62 = tpu.matmul %59, %60, %cst_39 {dimension_numbers = #tpu.dot_dimension_numbers<[1], [1], [0], [0], [0, 0, 1, 0], [], []>} : vector<128x32xf32>, vector<128x32xf32>, vector<128x128xf32> -> vector<128x128xf32>
    %63 = arith.addf %62, %12 : vector<128x128xf32>
    %cst_40 = arith.constant dense<0xFF800000> : vector<128xf32>
    %64 = vector.multi_reduction <maximumf>, %63, %cst_40 [1] : vector<128x128xf32> to vector<128xf32>
    %65 = vector.shape_cast %64 : vector<128xf32> to vector<128x1xf32>
    %cst_41 = arith.constant 0.000000e+00 : f32
    %66 = vector.broadcast %cst_41 : f32 to vector<128x1xf32>
    %67 = arith.maximumf %65, %66 : vector<128x1xf32>
    %68 = vector.broadcast %67 : vector<128x1xf32> to vector<128x128xf32>
    %69 = arith.subf %63, %68 : vector<128x128xf32>
    %70 = math.exp %69 : vector<128x128xf32>
    %cst_42 = arith.constant dense<0.000000e+00> : vector<128xf32>
    %71 = vector.multi_reduction <add>, %70, %cst_42 [1] : vector<128x128xf32> to vector<128xf32>
    %72 = vector.shape_cast %71 : vector<128xf32> to vector<128x1xf32>
    %cst_43 = arith.constant 0.000000e+00 : f32
    %73 = vector.broadcast %cst_43 : f32 to vector<128x1xf32>
    %74 = arith.cmpf ogt, %72, %73 : vector<128x1xf32>
    %cst_44 = arith.constant 1.000000e+00 : f32
    %75 = vector.broadcast %cst_44 : f32 to vector<128x1xf32>
    %76 = arith.select %74, %72, %75 : vector<128x1xi1>, vector<128x1xf32>
    %77 = tpu.reciprocal %76 {approx = true} : vector<128x1xf32> -> vector<128x1xf32>
    %cst_45 = arith.constant dense<0.000000e+00> : vector<128x32xf32>
    %78 = tpu.matmul %70, %61, %cst_45 {dimension_numbers = #tpu.dot_dimension_numbers<[1], [0], [0], [1], [0, 0, 1, 1], [], []>} : vector<128x128xf32>, vector<128x32xf32>, vector<128x32xf32> -> vector<128x32xf32>
    %79 = vector.broadcast %77 : vector<128x1xf32> to vector<128x32xf32>
    %80 = arith.mulf %78, %79 : vector<128x32xf32>
    %c0_46 = arith.constant 0 : index
    %c64_47 = arith.constant 64 : index
    %81 = vector.load %arg8[%c0_46, %c64_47] : memref<128x128xf32, #tpu.memory_space<vmem>>, vector<128x32xf32>
    tpu.vector_store %arg8[%c0_46, %c64_47], %80 {strides = array<i32>} : memref<128x128xf32, #tpu.memory_space<vmem>>, vector<128x32xf32>,
    %c0_48 = arith.constant 0 : index
    %c96 = arith.constant 96 : index
    %82 = vector.load %arg7[%c0_48, %c96] : memref<128x512xf32, #tpu.memory_space<vmem>>, vector<128x32xf32>
    %c0_49 = arith.constant 0 : index
    %c224 = arith.constant 224 : index
    %83 = vector.load %arg7[%c0_49, %c224] : memref<128x512xf32, #tpu.memory_space<vmem>>, vector<128x32xf32>
    %c0_50 = arith.constant 0 : index
    %c352 = arith.constant 352 : index
    %84 = vector.load %arg7[%c0_50, %c352] : memref<128x512xf32, #tpu.memory_space<vmem>>, vector<128x32xf32>
    %cst_51 = arith.constant dense<0.000000e+00> : vector<128x128xf32>
    %85 = tpu.matmul %82, %83, %cst_51 {dimension_numbers = #tpu.dot_dimension_numbers<[1], [1], [0], [0], [0, 0, 1, 0], [], []>} : vector<128x32xf32>, vector<128x32xf32>, vector<128x128xf32> -> vector<128x128xf32>
    %86 = arith.addf %85, %12 : vector<128x128xf32>
    %cst_52 = arith.constant dense<0xFF800000> : vector<128xf32>
    %87 = vector.multi_reduction <maximumf>, %86, %cst_52 [1] : vector<128x128xf32> to vector<128xf32>
    %88 = vector.shape_cast %87 : vector<128xf32> to vector<128x1xf32>
    %cst_53 = arith.constant 0.000000e+00 : f32
    %89 = vector.broadcast %cst_53 : f32 to vector<128x1xf32>
    %90 = arith.maximumf %88, %89 : vector<128x1xf32>
    %91 = vector.broadcast %90 : vector<128x1xf32> to vector<128x128xf32>
    %92 = arith.subf %86, %91 : vector<128x128xf32>
    %93 = math.exp %92 : vector<128x128xf32>
    %cst_54 = arith.constant dense<0.000000e+00> : vector<128xf32>
    %94 = vector.multi_reduction <add>, %93, %cst_54 [1] : vector<128x128xf32> to vector<128xf32>
    %95 = vector.shape_cast %94 : vector<128xf32> to vector<128x1xf32>
    %cst_55 = arith.constant 0.000000e+00 : f32
    %96 = vector.broadcast %cst_55 : f32 to vector<128x1xf32>
    %97 = arith.cmpf ogt, %95, %96 : vector<128x1xf32>
    %cst_56 = arith.constant 1.000000e+00 : f32
    %98 = vector.broadcast %cst_56 : f32 to vector<128x1xf32>
    %99 = arith.select %97, %95, %98 : vector<128x1xi1>, vector<128x1xf32>
    %100 = tpu.reciprocal %99 {approx = true} : vector<128x1xf32> -> vector<128x1xf32>
    %cst_57 = arith.constant dense<0.000000e+00> : vector<128x32xf32>
    %101 = tpu.matmul %93, %84, %cst_57 {dimension_numbers = #tpu.dot_dimension_numbers<[1], [0], [0], [1], [0, 0, 1, 1], [], []>} : vector<128x128xf32>, vector<128x32xf32>, vector<128x32xf32> -> vector<128x32xf32>
    %102 = vector.broadcast %100 : vector<128x1xf32> to vector<128x32xf32>
    %103 = arith.mulf %101, %102 : vector<128x32xf32>
    %c0_58 = arith.constant 0 : index
    %c96_59 = arith.constant 96 : index
    %104 = vector.load %arg8[%c0_58, %c96_59] : memref<128x128xf32, #tpu.memory_space<vmem>>, vector<128x32xf32>
    tpu.vector_store %arg8[%c0_58, %c96_59], %103 {strides = array<i32>} : memref<128x128xf32, #tpu.memory_space<vmem>>, vector<128x32xf32>,
    %c0_60 = arith.constant 0 : index
    %c0_61 = arith.constant 0 : index
    %105 = vector.load %arg8[%c0_60, %c0_61] : memref<128x128xf32, #tpu.memory_space<vmem>>, vector<128x128xf32>
    %c0_62 = arith.constant 0 : index
    %c384 = arith.constant 384 : index
    %106 = vector.load %arg7[%c0_62, %c384] : memref<128x512xf32, #tpu.memory_space<vmem>>, vector<128x128xf32>
    %107 = arith.addf %105, %106 : vector<128x128xf32>
    %cst_63 = arith.constant dense<0.000000e+00> : vector<128xf32>
    %108 = vector.multi_reduction <add>, %107, %cst_63 [0] : vector<128x128xf32> to vector<128xf32>
    %109 = vector.shape_cast %108 : vector<128xf32> to vector<1x128xf32>
    %cst_64 = arith.constant 1.280000e+02 : f32
    %110 = vector.broadcast %cst_64 : f32 to vector<1x128xf32>
    %111 = arith.divf %109, %110 : vector<1x128xf32>
    %112 = vector.broadcast %111 : vector<1x128xf32> to vector<128x128xf32>
    %113 = arith.subf %107, %112 : vector<128x128xf32>
    %114 = arith.mulf %113, %113 : vector<128x128xf32>
    %cst_65 = arith.constant dense<0.000000e+00> : vector<128xf32>
    %115 = vector.multi_reduction <add>, %114, %cst_65 [0] : vector<128x128xf32> to vector<128xf32>
    %116 = vector.shape_cast %115 : vector<128xf32> to vector<1x128xf32>
    %cst_66 = arith.constant 1.280000e+02 : f32
    %117 = vector.broadcast %cst_66 : f32 to vector<1x128xf32>
    %118 = arith.divf %116, %117 : vector<1x128xf32>
    %119 = vector.broadcast %111 : vector<1x128xf32> to vector<128x128xf32>
    %120 = arith.subf %107, %119 : vector<128x128xf32>
    %cst_67 = arith.constant 9.99999974E-6 : f32
    %121 = vector.broadcast %cst_67 : f32 to vector<1x128xf32>
    %122 = arith.addf %118, %121 : vector<1x128xf32>
    %123 = math.rsqrt %122 : vector<1x128xf32>
    %124 = vector.broadcast %123 : vector<1x128xf32> to vector<128x128xf32>
    %125 = arith.mulf %120, %124 : vector<128x128xf32>
    %c0_68 = arith.constant 0 : index
    %c0_69 = arith.constant 0 : index
    %126 = vector.load %arg5[%c0_68, %c0_69] : memref<2x128xf32, #tpu.memory_space<vmem>>, vector<1x128xf32>
    %127 = vector.broadcast %126 : vector<1x128xf32> to vector<128x128xf32>
    %128 = arith.mulf %125, %127 : vector<128x128xf32>
    %c1 = arith.constant 1 : index
    %c0_70 = arith.constant 0 : index
    %129 = vector.load %arg5[%c1, %c0_70] : memref<2x128xf32, #tpu.memory_space<vmem>>, vector<1x128xf32>
    %130 = vector.broadcast %129 : vector<1x128xf32> to vector<128x128xf32>
    %131 = arith.addf %128, %130 : vector<128x128xf32>
    %cst_71 = arith.constant 0.000000e+00 : f32
    %132 = vector.broadcast %cst_71 : f32 to vector<128x128xf32>
    %133 = arith.cmpf ogt, %131, %132 : vector<128x128xf32>
    %cst_72 = arith.constant 0.00999999977 : f32
    %134 = vector.broadcast %cst_72 : f32 to vector<128x128xf32>
    %135 = arith.mulf %134, %131 : vector<128x128xf32>
    %136 = arith.select %133, %131, %135 : vector<128x128xi1>, vector<128x128xf32>
    %c0_73 = arith.constant 0 : index
    %c0_74 = arith.constant 0 : index
    %137 = vector.load %arg6[%c0_73, %c0_74] : memref<128x128xf32, #tpu.memory_space<vmem>>, vector<128x128xf32>
    tpu.vector_store %arg6[%c0_73, %c0_74], %136 {strides = array<i32>} : memref<128x128xf32, #tpu.memory_space<vmem>>, vector<128x128xf32>,
    return
  }
  func.func @transform_0(%arg0: i32) -> (i32, i32) {
    %c0_i32 = arith.constant 0 : i32
    %c0_i32_0 = arith.constant 0 : i32
    %c0_i32_1 = arith.constant 0 : i32
    return %c0_i32, %c0_i32_0 : i32, i32
  }
  func.func @transform_1(%arg0: i32) -> (i32, i32) {
    %c0_i32 = arith.constant 0 : i32
    %c0_i32_0 = arith.constant 0 : i32
    %c0_i32_1 = arith.constant 0 : i32
    return %c0_i32, %c0_i32_0 : i32, i32
  }
  func.func @transform_2(%arg0: i32) -> (i32, i32) {
    %c0_i32 = arith.constant 0 : i32
    %c0_i32_0 = arith.constant 0 : i32
    %c0_i32_1 = arith.constant 0 : i32
    return %c0_i32, %c0_i32_0 : i32, i32
  }
  func.func @transform_3(%arg0: i32) -> (i32, i32) {
    %c0_i32 = arith.constant 0 : i32
    %c0_i32_0 = arith.constant 0 : i32
    %c0_i32_1 = arith.constant 0 : i32
    return %c0_i32, %c0_i32_0 : i32, i32
  }
  func.func @transform_4(%arg0: i32) -> (i32, i32) {
    %c0_i32 = arith.constant 0 : i32
    %c0_i32_0 = arith.constant 0 : i32
    %c0_i32_1 = arith.constant 0 : i32
    return %c0_i32, %c0_i32_0 : i32, i32
  }
  func.func @transform_5(%arg0: i32) -> (i32, i32) {
    %c0_i32 = arith.constant 0 : i32
    %c0_i32_0 = arith.constant 0 : i32
    %c0_i32_1 = arith.constant 0 : i32
    return %c0_i32, %c0_i32_0 : i32, i32
  }
}

</mosaic_0001>

<bundles_post_ra>
// kernel: tpu_custom_call.1
= control target key start
LH: loop header
LB: loop body
LE: loop exit
PB: predicated region body
PF: predicated region fallthrough
CT: control target
= control target key end

     0   :  { %10 = vsyncpa [#allocation5], 0  ;;  %s6251_s0 = inlined_call_operand.hbm [shape: bf16[128,128], index: 0, kind: input, shape index: {}]   ;;  %s6252_s1 = inlined_call_operand.hbm [shape: bf16[128,512], index: 1, kind: input, shape index: {}]   ;;  %s6253_s2 = inlined_call_operand.hbm [shape: f32[1,512], index: 2, kind: input, shape index: {}]   ;;  %s6254_s3 = inlined_call_operand.hbm [shape: bf16[128,128], index: 3, kind: input, shape index: {}]   ;;  %s6255_s4 = inlined_call_operand.vmem [shape: f32[2,128], index: 4, kind: input, shape index: {}]   ;;  %s6256_s5 = inlined_call_operand.hbm [shape: f32[128,128], index: 5, kind: output, shape index: {}]  }
   0x1   :  { %11 = vsyncpa [#allocation8], 0 }
   0x2   :  { %12 = vsyncpa [#allocation11], 0  ;;  %s31_s20 = sshll.u32 %s6252_s1, 4  ;;  %s32_s20 = int_to_ptr.hbm [resolvable:$true] %s31_s20 }
   0x3   :  { %13 = vsyncpa [#allocation6], 0  ;;  %s4372_s21 = smov [#allocation7]   ;;  %s18_s25 = sshll.u32 %s6251_s0, 4  ;;  %s19_s25 = int_to_ptr.hbm [resolvable:$true] %s18_s25 }
   0x4   :  { %s33_s22 = sshll.u32 %s4372_s21, 4  ;;  %s4373_s26 = smov 256   ;;  %s34_s22 = int_to_ptr.vmem [resolvable:$true] %s33_s22 }
   0x5   :  { %s4374_s27 = smov 16   ;;  %s4375_s28 = smov [#allocation4]  }
   0x6   :  { %39 = dma.hbm_to_vmem [thread:$0]  %s32_s20, 4096, %s34_s22, [#allocation8], %s4373_s26, %s4373_s26, %s4374_s27  }
   0x7   :  { %s20_s29 = sshll.u32 %s4375_s28, 4  ;;  %s4376_s30 = smov 64   ;;  %s21_s29 = int_to_ptr.vmem [resolvable:$true] %s20_s29 }
   0x8   :  { %s4377_s6 = smov 4   ;;  %s45_s8 = sshll.u32 %s6253_s2, 4  ;;  %s46_s8 = int_to_ptr.hbm [resolvable:$true] %s45_s8 }
   0x9   :  { %26 = dma.hbm_to_vmem [thread:$0]  %s19_s25, 1024, %s21_s29, [#allocation5], %s4376_s30, %s4376_s30, %s4377_s6  }
   0xa   :  { %s4378_s9 = smov [#allocation9]   ;;  %s55_s12 = sshll.u32 %s6254_s3, 4  ;;  %s56_s12 = int_to_ptr.hbm [resolvable:$true] %s55_s12 }
   0xb   :  { %s47_s10 = sshll.u32 %s4378_s9, 4  ;;  %s4379_s13 = smov [#allocation10]   ;;  %s48_s10 = int_to_ptr.vmem [resolvable:$true] %s47_s10 }
   0xc   :  { %50 = dma.hbm_to_vmem [thread:$0]  %s46_s8, 64, %s48_s10, [#allocation8]  }
   0xd   :  { %s57_s14 = sshll.u32 %s4379_s13, 4  ;;  %s58_s14 = int_to_ptr.vmem [resolvable:$true] %s57_s14 }
   0xe   :  { %63 = dma.hbm_to_vmem [thread:$0]  %s56_s12, 1024, %s58_s14, [#allocation11], %s4376_s30, %s4376_s30, %s4377_s6  }
   0xf   :  { %4364 = dma.done.wait [#allocation5], 1024  }
  0x10   :  { %4365 = vsyncadd [#allocation5], 4294966272 }
  0x11   :  { %4366 = dma.done.wait [#allocation8], 4160  }
  0x12   :  { %4367 = vsyncadd [#allocation8], 4294963136 }
  0x13   :  { %4368 = dma.done.wait [#allocation11], 1024  }
  0x14   :  { %4369 = vsyncadd [#allocation11], 4294966272  ;;  %v3605_v0 = vld [vmem:[#allocation7 + $0xe0] sm:$0xf]  ;;  %v3801_v1 = vld [vmem:[#allocation7 + $0xec] sm:$0xf0] }
  0x15   :  { %v3799_v2 = vld [vmem:[#allocation7 + $0xe4] sm:$0xf]  ;;  %v3606_v3 = vor.u32 %v3801_v1, %v3605_v0  ;;  %v3607_v4 = vld [vmem:[#allocation7 + $0xf0] sm:$0xf0]  ;;  %v3613_v5 = vld [vmem:[#allocation7 + $0xe8] sm:$0xf] }
  0x16   :  { %v3802_v6 = vld [vmem:[#allocation7 + $0xf4] sm:$0xf0]  ;;  %v3610_v7 = vor.u32 %v3799_v2, %v3607_v4  ;;  %v3589_v9 = vld [vmem:[#allocation7 + $0xc0] sm:$0xf]  ;;  %v3797_v10 = vld [vmem:[#allocation7 + $0xcc] sm:$0xf0] }
  0x17   :  { %v3614_v8 = vor.u32 %v3802_v6, %v3613_v5  ;;  %v3795_v11 = vld [vmem:[#allocation7 + $0xc4] sm:$0xf]  ;;  %348 = vmatpush.bf16.msra.mxu0 %v3606_v3  ;;  %v3590_v12 = vor.u32 %v3797_v10, %v3589_v9  ;;  %v3591_v13 = vld [vmem:[#allocation7 + $0xd0] sm:$0xf0]  ;;  %v3597_v14 = vld [vmem:[#allocation7 + $0xc8] sm:$0xf] }
  0x18   :  { %v3798_v15 = vld [vmem:[#allocation7 + $0xd4] sm:$0xf0]  ;;  %397 = vmatpush.bf16.msra.mxu1 %v3610_v7  ;;  %v3594_v16 = vor.u32 %v3795_v11, %v3591_v13  ;;  %v3573_v18 = vld [vmem:[#allocation7 + $0xa0] sm:$0xf]  ;;  %v3793_v19 = vld [vmem:[#allocation7 + $0xac] sm:$0xf0] }
  0x19   :  { %446 = vmatpush.bf16.msra.mxu2 %v3614_v8  ;;  %v3598_v17 = vor.u32 %v3798_v15, %v3597_v14  ;;  %v3791_v20 = vld [vmem:[#allocation7 + $0xa4] sm:$0xf]  ;;  %v3575_v21 = vld [vmem:[#allocation7 + $0xb0] sm:$0xf0]  ;;  %v3581_v22 = vld [vmem:[#allocation7 + $0xa8] sm:$0xf]  ;;  %v3574_v24 = vor.u32 %v3793_v19, %v3573_v18 }
  0x1a   :  { %v3794_v23 = vld [vmem:[#allocation7 + $0xb4] sm:$0xf0]  ;;  %v3578_v25 = vor.u32 %v3791_v20, %v3575_v21  ;;  %v3557_v27 = vld [vmem:[#allocation7 + $0x80] sm:$0xf]  ;;  %v3789_v28 = vld [vmem:[#allocation7 + $0x8c] sm:$0xf0] }
  0x1b   :  { %349 = vmatpush.bf16.msra.mxu0 %v3590_v12  ;;  %v3582_v26 = vor.u32 %v3794_v23, %v3581_v22  ;;  %v3787_v29 = vld [vmem:[#allocation7 + $0x84] sm:$0xf]  ;;  %v3559_v30 = vld [vmem:[#allocation7 + $0x90] sm:$0xf0]  ;;  %v3565_v31 = vld [vmem:[#allocation7 + $0x88] sm:$0xf]  ;;  %v3558_v33 = vor.u32 %v3789_v28, %v3557_v27 }
  0x1c   :  { %398 = vmatpush.bf16.msra.mxu1 %v3594_v16  ;;  %v3790_v32 = vld [vmem:[#allocation7 + $0x94] sm:$0xf0]  ;;  %v3562_v34 = vor.u32 %v3787_v29, %v3559_v30  ;;  %v3541_v36 = vld [vmem:[#allocation7 + $0x60] sm:$0xf]  ;;  %v3785_v37 = vld [vmem:[#allocation7 + $0x6c] sm:$0xf0] }
  0x1d   :  { %447 = vmatpush.bf16.msra.mxu2 %v3598_v17  ;;  %v3566_v35 = vor.u32 %v3790_v32, %v3565_v31  ;;  %v3783_v38 = vld [vmem:[#allocation7 + $0x64] sm:$0xf]  ;;  %v3543_v39 = vld [vmem:[#allocation7 + $0x70] sm:$0xf0]  ;;  %v3549_v40 = vld [vmem:[#allocation7 + $0x68] sm:$0xf]  ;;  %v3542_v42 = vor.u32 %v3785_v37, %v3541_v36 }
  0x1e   :  { %v3786_v41 = vld [vmem:[#allocation7 + $0x74] sm:$0xf0]  ;;  %v3525_v43 = vld [vmem:[#allocation7 + $0x40] sm:$0xf]  ;;  %v3781_v44 = vld [vmem:[#allocation7 + $0x4c] sm:$0xf0]  ;;  %v3546_v45 = vor.u32 %v3783_v38, %v3543_v39 }
  0x1f   :  { %350 = vmatpush.bf16.msra.mxu0 %v3574_v24  ;;  %v3550_v46 = vor.u32 %v3786_v41, %v3549_v40  ;;  %v3779_v47 = vld [vmem:[#allocation7 + $0x44] sm:$0xf]  ;;  %v3527_v48 = vld [vmem:[#allocation7 + $0x50] sm:$0xf0]  ;;  %v3533_v49 = vld [vmem:[#allocation7 + $0x48] sm:$0xf]  ;;  %v3526_v51 = vor.u32 %v3781_v44, %v3525_v43 }
  0x20   :  { %399 = vmatpush.bf16.msra.mxu1 %v3578_v25  ;;  %v3782_v50 = vld [vmem:[#allocation7 + $0x54] sm:$0xf0]  ;;  %v3530_v52 = vor.u32 %v3779_v47, %v3527_v48  ;;  %v3509_v54 = vld [vmem:[#allocation7 + $0x20] sm:$0xf]  ;;  %v3777_v55 = vld [vmem:[#allocation7 + $0x2c] sm:$0xf0] }
  0x21   :  { %448 = vmatpush.bf16.msra.mxu2 %v3582_v26  ;;  %v3534_v53 = vor.u32 %v3782_v50, %v3533_v49  ;;  %v3775_v56 = vld [vmem:[#allocation7 + $0x24] sm:$0xf]  ;;  %v3511_v57 = vld [vmem:[#allocation7 + $0x30] sm:$0xf0]  ;;  %v3517_v58 = vld [vmem:[#allocation7 + $0x28] sm:$0xf]  ;;  %v3510_v60 = vor.u32 %v3777_v55, %v3509_v54 }
  0x22   :  { %v3778_v59 = vld [vmem:[#allocation7 + $0x34] sm:$0xf0]  ;;  %v3514_v61 = vor.u32 %v3775_v56, %v3511_v57  ;;  %v3493_v63 = vld [vmem:[#allocation7] sm:$0xf]  ;;  %v3773_v0 = vld [vmem:[#allocation7 + $0xc] sm:$0xf0] }
  0x23   :  { %351 = vmatpush.bf16.msra.mxu0 %v3558_v33  ;;  %v3518_v62 = vor.u32 %v3778_v59, %v3517_v58  ;;  %v3771_v1 = vld [vmem:[#allocation7 + $0x4] sm:$0xf]  ;;  %v3495_v2 = vld [vmem:[#allocation7 + $0x10] sm:$0xf0]  ;;  %v3501_v3 = vld [vmem:[#allocation7 + $0x8] sm:$0xf]  ;;  %v3494_v5 = vor.u32 %v3773_v0, %v3493_v63 }
  0x24   :  { %400 = vmatpush.bf16.msra.mxu1 %v3562_v34  ;;  %v3774_v4 = vld [vmem:[#allocation7 + $0x14] sm:$0xf0]  ;;  %v3498_v6 = vor.u32 %v3771_v1, %v3495_v2  ;;  %v4432_v8 = vld [vmem:[#allocation4] sm:$0xff]  ;;  %v4437_v9 = vld [vmem:[#allocation4 + $0x8] sm:$0xff]  ;;  %s4380_s2 = smov 32   ;;  %s4381_s3 = smov 96  }
  0x25   :  { %449 = vmatpush.bf16.msra.mxu2 %v3566_v35  ;;  %v3502_v7 = vor.u32 %v3774_v4, %v3501_v3  ;;  %v4442_v10 = vld [vmem:[#allocation4 + $0x10] sm:$0xff]  ;;  %v3766_v11 = vld [vmem:[#allocation4 + $0x18] sm:$0xff]  ;;  %v3767_v12 = vld [vmem:[#allocation4 + $0x20] sm:$0xff]  ;;  %vm720_vm0 = vcmask 261120   ;;  %s3444_s22 = sshll.u32 %s6256_s5, 4  ;;  %s4384_s23 = smov 128   ;;  %s3445_s22 = int_to_ptr.hbm [resolvable:$true] %s3444_s22 }
  0x26   :  { %v3768_v13 = vld [vmem:[#allocation4 + $0x28] sm:$0xff]  ;;  %v3769_v14 = vld [vmem:[#allocation4 + $0x30] sm:$0xff]  ;;  %v3770_v15 = vld [vmem:[#allocation4 + $0x38] sm:$0xff]  ;;  %s4385_s24 = smov 8  }
  0x27   :  { %352 = vmatpush.bf16.msra.mxu0 %v3542_v42  ;;  %v130_v16 = vld [vmem:[#allocation9] sm:$0xf] }
  0x28   :  { %401 = vmatpush.bf16.msra.mxu1 %v3546_v45  ;;  %v4447_v17 = vperm.slane %v130_v16, 0  ;;  %v4449_v18 = vperm.slane %v130_v16, 1  ;;  %v4484_v34 = vperm.slane %v130_v16, 2 }
  0x29   :  { %450 = vmatpush.bf16.msra.mxu2 %v3550_v46 }
  0x2b   :  { %353 = vmatpush.bf16.msra.mxu0 %v3526_v51 }
  0x2c   :  { %402 = vmatpush.bf16.msra.mxu1 %v3530_v52 }
  0x2d   :  { %451 = vmatpush.bf16.msra.mxu2 %v3534_v53 }
  0x2f   :  { %354 = vmatpush.bf16.msra.mxu0 %v3510_v60 }
  0x30   :  { %403 = vmatpush.bf16.msra.mxu1 %v3514_v61 }
  0x31   :  { %452 = vmatpush.bf16.msra.mxu2 %v3518_v62 }
  0x33   :  { %355 = vmatpush.bf16.msra.mxu0 %v3494_v5 }
  0x34   :  { %404 = vmatpush.bf16.msra.mxu1 %v3498_v6 }
  0x35   :  { %453 = vmatpush.bf16.msra.mxu2 %v3502_v7 }
  0x36   :  { %356 = vmatmul.bf16.vlgmr.msra.gmra.mxu0 %v4432_v8 }
  0x37   :  { %405 = vmatmul.bf16.vlgmr.msra.gmra.mxu1 %v4432_v8 }
  0x38   :  { %454 = vmatmul.bf16.vlgmr.msra.gmra.mxu2 %v4432_v8 }
  0x46   :  { %361 = vmatmul.bf16.gmra.mxu0 %v4437_v9 }
  0x47   :  { %410 = vmatmul.bf16.gmra.mxu1 %v4437_v9 }
  0x48   :  { %459 = vmatmul.bf16.gmra.mxu2 %v4437_v9 }
  0x56   :  { %366 = vmatmul.bf16.gmra.mxu0 %v4442_v10 }
  0x57   :  { %415 = vmatmul.bf16.gmra.mxu1 %v4442_v10 }
  0x58   :  { %464 = vmatmul.bf16.gmra.mxu2 %v4442_v10 }
  0x66   :  { %371 = vmatmul.bf16.gmra.mxu0 %v3766_v11 }
  0x67   :  { %420 = vmatmul.bf16.gmra.mxu1 %v3766_v11 }
  0x68   :  { %469 = vmatmul.bf16.gmra.mxu2 %v3766_v11 }
  0x76   :  { %376 = vmatmul.bf16.gmra.mxu0 %v3767_v12 }
  0x77   :  { %425 = vmatmul.bf16.gmra.mxu1 %v3767_v12 }
  0x78   :  { %474 = vmatmul.bf16.gmra.mxu2 %v3767_v12 }
  0x86   :  { %381 = vmatmul.bf16.gmra.mxu0 %v3768_v13 }
  0x87   :  { %430 = vmatmul.bf16.gmra.mxu1 %v3768_v13 }
  0x88   :  { %479 = vmatmul.bf16.gmra.mxu2 %v3768_v13 }
  0x96   :  { %386 = vmatmul.bf16.gmra.mxu0 %v3769_v14 }
  0x97   :  { %435 = vmatmul.bf16.gmra.mxu1 %v3769_v14 }
  0x98   :  { %484 = vmatmul.bf16.gmra.mxu2 %v3769_v14 }
  0xa6   :  { %391 = vmatmul.bf16.gmra.mxu0 %v3770_v15 }
  0xa7   :  { %440 = vmatmul.bf16.gmra.mxu1 %v3770_v15 }
  0xa8   :  { %489 = vmatmul.bf16.gmra.mxu2 %v3770_v15 }
  0xb3   :  { %v357_v19 = vpop.f32.mrf.mxu0 }
  0xb4   :  { %v4452_v20 = vadd.f32 %v357_v19, %v4447_v17  ;;  %v406_v21 = vpop.f32.mrf.mxu1 }
  0xb5   :  { %v4455_v22 = vadd.f32 %v406_v21, %v4449_v18 }
  0xb6   :  { %2569 = vrot.lane.b32.xlu1 %v4452_v20, %s4380_s2  ;;  %1219 = vrot.lane.b32.xlu2 %v4452_v20, %s4381_s3 }
  0xb7   :  { %1267 = vrot.lane.b32.xlu0 %v4455_v22, %s4381_s3 }
  0xbb   :  { %v455_v23 = vpop.f32.mrf.mxu2  ;;  %v359_v24 = vpop.f32.mrf.mxu0 }
  0xbc   :  { %v4464_v25 = vadd.f32 %v359_v24, %v4447_v17  ;;  %v408_v26 = vpop.f32.mrf.mxu1  ;;  %v4493_v35 = vadd.f32 %v455_v23, %v4484_v34 }
  0xbd   :  { %v4482_v32 = vadd.f32 %v408_v26, %v4449_v18 }
  0xbe   :  { %2571 = vrot.lane.b32.xlu1 %v4464_v25, %s4380_s2  ;;  %2617 = vrot.lane.b32.xlu2 %v4455_v22, %s4380_s2 }
  0xbf   :  { %1942 = vrot.lane.b32.xlu0 %v4455_v22, %s4376_s30 }
  0xc3   :  { %v457_v27 = vpop.f32.mrf.mxu2  ;;  %v362_v29 = vpop.f32.mrf.mxu0 }
  0xc4   :  { %v411_v28 = vpop.f32.mrf.mxu1  ;;  %v4479_v31 = vadd.f32 %v362_v29, %v4447_v17  ;;  %v4496_v36 = vadd.f32 %v457_v27, %v4484_v34 }
  0xc5   :  { %v4499_v37 = vadd.f32 %v411_v28, %v4449_v18 }
  0xc6   :  { %1896 = vrot.lane.b32.xlu1 %v4464_v25, %s4376_s30  ;;  %1894 = vrot.lane.b32.xlu2 %v4452_v20, %s4376_s30  ;;  %v3856_v40 = vpack.i.bf16 %v4496_v36, %v4493_v35 }
  0xc7   :  { %1221 = vrot.lane.b32.xlu0 %v4464_v25, %s4381_s3 }
  0xcb   :  { %v460_v30 = vpop.f32.mrf.mxu2  ;;  %v364_v41 = vpop.f32.mrf.mxu0 }
  0xcc   :  { %v413_v33 = vpop.f32.mrf.mxu1  ;;  %v4509_v43 = vadd.f32 %v364_v41, %v4447_v17  ;;  %v4529_v50 = vadd.f32 %v460_v30, %v4484_v34 }
  0xcd   :  { %v4518_v46 = vadd.f32 %v413_v33, %v4449_v18 }
  0xce   :  { %1223 = vrot.lane.b32.xlu1 %v4479_v31, %s4381_s3  ;;  %1269 = vrot.lane.b32.xlu2 %v4482_v32, %s4381_s3 }
  0xcf   :  { %2619 = vrot.lane.b32.xlu0 %v4482_v32, %s4380_s2 }
  0xd3   :  { %v462_v38 = vpop.f32.mrf.mxu2  ;;  %v367_v56 = vpop.f32.mrf.mxu0 }
  0xd4   :  { %v416_v39 = vpop.f32.mrf.mxu1  ;;  %v4532_v51 = vadd.f32 %v462_v38, %v4484_v34  ;;  %v4555_v58 = vadd.f32 %v367_v56, %v4447_v17 }
  0xd5   :  { %v4558_v59 = vadd.f32 %v416_v39, %v4449_v18 }
  0xd6   :  { %1271 = vrot.lane.b32.xlu1 %v4499_v37, %s4381_s3  ;;  %1944 = vrot.lane.b32.xlu2 %v4482_v32, %s4376_s30  ;;  %v3861_v54 = vpack.i.bf16 %v4532_v51, %v4529_v50 }
  0xd7   :  { %3857 = vrot.lane.b32.xlu0 %v3856_v40, %s4381_s3 }
  0xdb   :  { %v465_v42 = vpop.f32.mrf.mxu2  ;;  %v369_v61 = vpop.f32.mrf.mxu0 }
  0xdc   :  { %v418_v44 = vpop.f32.mrf.mxu1  ;;  %v4571_v63 = vadd.f32 %v369_v61, %v4447_v17  ;;  %v4576_v1 = vadd.f32 %v465_v42, %v4484_v34 }
  0xdd   :  { %v4541_v52 = vadd.f32 %v418_v44, %v4449_v18 }
  0xde   :  { %2621 = vrot.lane.b32.xlu1 %v4499_v37, %s4380_s2  ;;  %1225 = vrot.lane.b32.xlu2 %v4509_v43, %s4381_s3 }
  0xdf   :  { %1946 = vrot.lane.b32.xlu0 %v4499_v37, %s4376_s30 }
  0xe3   :  { %v467_v45 = vpop.f32.mrf.mxu2  ;;  %v372_v6 = vpop.f32.mrf.mxu0 }
  0xe4   :  { %v421_v47 = vpop.f32.mrf.mxu1  ;;  %v4579_v2 = vadd.f32 %v467_v45, %v4484_v34  ;;  %v4601_v12 = vadd.f32 %v372_v6, %v4447_v17 }
  0xe5   :  { %v4612_v15 = vadd.f32 %v421_v47, %v4449_v18 }
  0xe6   :  { %1948 = vrot.lane.b32.xlu1 %v4518_v46, %s4376_s30  ;;  %2623 = vrot.lane.b32.xlu2 %v4518_v46, %s4380_s2  ;;  %v3866_v4 = vpack.i.bf16 %v4579_v2, %v4576_v1 }
  0xe7   :  { %2573 = vrot.lane.b32.xlu0 %v4479_v31, %s4380_s2 }
  0xeb   :  { %v470_v48 = vpop.f32.mrf.mxu2  ;;  %v374_v27 = vpop.f32.mrf.mxu0 }
  0xec   :  { %v4526_v49 = vpop.f32.mrf.mxu1  ;;  %v4615_v16 = vadd.f32 %v470_v48, %v4484_v34  ;;  %v4633_v30 = vadd.f32 %v374_v27, %v4447_v17 }
  0xed   :  { %v4649_v41 = vadd.f32 %v4526_v49, %v4449_v18 }
  0xee   :  { %1900 = vrot.lane.b32.xlu1 %v4509_v43, %s4376_s30  ;;  %2575 = vrot.lane.b32.xlu2 %v4509_v43, %s4380_s2 }
  0xef   :  { %1898 = vrot.lane.b32.xlu0 %v4479_v31, %s4376_s30 }
  0xf3   :  { %v472_v53 = vpop.f32.mrf.mxu2 }
  0xf4   :  { %v4545_v55 = vpop.f32.mrf.mxu1  ;;  %v4618_v19 = vadd.f32 %v472_v53, %v4484_v34 }
  0xf5   :  { %v427_v53 = vadd.f32 %v4545_v55, %v4449_v18 }
  0xf6   :  { %1277 = vrot.lane.b32.xlu1 %v4541_v52, %s4381_s3  ;;  %3862 = vrot.lane.b32.xlu2 %v3861_v54, %s4381_s3  ;;  %v4626_v24 = vpack.i.bf16 %v4615_v16, %v4618_v19 }
  0xf7   :  { %1273 = vrot.lane.b32.xlu0 %v4518_v46, %s4381_s3 }
  0xfb   :  { %v4552_v57 = vpop.f32.mrf.mxu2 }
  0xfc   :  { %v4560_v60 = vpop.f32.mrf.mxu1  ;;  %v476_v6 = vadd.f32 %v4552_v57, %v4484_v34 }
  0xfe   :  { %2627 = vrot.lane.b32.xlu1 %v4541_v52, %s4380_s2  ;;  %1275 = vrot.lane.b32.xlu2 %v4558_v59, %s4381_s3 }
  0xff   :  { %1227 = vrot.lane.b32.xlu0 %v4555_v58, %s4381_s3 }
 0x103   :  { %v4568_v62 = vpop.f32.mrf.mxu2 }
 0x104   :  { %v4573_v0 = vpop.f32.mrf.mxu1  ;;  %v478_v27 = vadd.f32 %v4568_v62, %v4484_v34 }
 0x106   :  { %2579 = vrot.lane.b32.xlu1 %v4571_v63, %s4380_s2  ;;  %1950 = vrot.lane.b32.xlu2 %v4558_v59, %s4376_s30 }
 0x107   :  { %2625 = vrot.lane.b32.xlu0 %v4558_v59, %s4380_s2 }
 0x10b   :  { %v4587_v3 = vpop.f32.mrf.mxu2 }
 0x10c   :  { %v4591_v5 = vpop.f32.mrf.mxu1 }
 0x10e   :  { %3867 = vrot.lane.b32.xlu1 %v3866_v4, %s4381_s3  ;;  %1902 = vrot.lane.b32.xlu2 %v4555_v58, %s4376_s30 }
 0x10f   :  { %2577 = vrot.lane.b32.xlu0 %v4555_v58, %s4380_s2 }
 0x110   :  { %v4598_v7 = vpop.permute.xlu2 %1219 }
 0x113   :  { %v482_v11 = vpop.f32.mrf.mxu2 }
 0x114   :  { %v436_v13 = vpop.f32.mrf.mxu1 }
 0x116   :  { %1231 = vrot.lane.b32.xlu1 %v4601_v12, %s4381_s3  ;;  %1229 = vrot.lane.b32.xlu2 %v4571_v63, %s4381_s3 }
 0x117   :  { %1952 = vrot.lane.b32.xlu0 %v4541_v52, %s4376_s30 }
 0x118   :  { %v4609_v14 = vpop.permute.xlu2 %2617 }
 0x119   :  { %6269 = vst [vmem:[#allocation17_spill] sm:$0xff] %v4609_v14 }
 0x11b   :  { %v485_v21 = vpop.f32.mrf.mxu2 }
 0x11c   :  { %v438_v23 = vpop.f32.mrf.mxu1  ;;  %v4701_v57 = vadd.f32 %v485_v21, %v4484_v34 }
 0x11d   :  { %v4674_v56 = vadd.f32 %v438_v23, %v4449_v18  ;;  %v377_v23 = vpop.f32.mrf.mxu0 }
 0x11e   :  { %1954 = vrot.lane.b32.xlu1 %v4612_v15, %s4376_s30  ;;  %1904 = vrot.lane.b32.xlu2 %v4571_v63, %s4376_s30  ;;  %v4719_v21 = vadd.f32 %v377_v23, %v4447_v17 }
 0x11f   :  { %1279 = vrot.lane.b32.xlu0 %v4612_v15, %s4381_s3 }
 0x120   :  { %v4630_v26 = vpop.permute.xlu2 %1894 }
 0x123   :  { %v487_v28 = vpop.f32.mrf.mxu2 }
 0x124   :  { %v441_v29 = vpop.f32.mrf.mxu1  ;;  %v4689_v55 = vadd.f32 %v487_v28, %v4484_v34 }
 0x125   :  { %v4659_v45 = vadd.f32 %v441_v29, %v4449_v18  ;;  %v4695_v29 = vpack.i.bf16 %v476_v6, %v478_v27 }
 0x126   :  { %2581 = vrot.lane.b32.xlu1 %v4601_v12, %s4380_s2  ;;  %2629 = vrot.lane.b32.xlu2 %v4612_v15, %s4380_s2 }
 0x127   :  { %1233 = vrot.lane.b32.xlu0 %v4633_v30, %s4381_s3 }
 0x128   :  { %v4641_v33 = vpop.permute.xlu1 %2569  ;;  %v4643_v38 = vpop.permute.xlu2 %1269 }
 0x129   :  { %6270 = vst [vmem:[#allocation18_spill] sm:$0xff] %v4641_v33  ;;  %v4645_v39 = vpop.permute.xlu0 %1267 }
 0x12b   :  { %v490_v40 = vpop.f32.mrf.mxu2 }
 0x12c   :  { %v443_v42 = vpop.f32.mrf.mxu1  ;;  %v4677_v61 = vadd.f32 %v490_v40, %v4484_v34  ;;  %v4698_v40 = vadd.f32 %v436_v13, %v4449_v18 }
 0x12d   :  { %v4652_v44 = vadd.f32 %v443_v42, %v4449_v18  ;;  %v4713_v42 = vadd.f32 %v482_v11, %v4484_v34 }
 0x12e   :  { %1906 = vrot.lane.b32.xlu1 %v4601_v12, %s4376_s30  ;;  %1281 = vrot.lane.b32.xlu2 %v4649_v41, %s4381_s3 }
 0x12f   :  { %3635 = vmatpush.xpose.msk.msrb.mxu0 %vm720_vm0, %v4652_v44  ;;  %2631 = vrot.lane.b32.xlu0 %v4649_v41, %s4380_s2 }
 0x130   :  { %v4665_v47 = vpop.permute.xlu1 %2571  ;;  %v4667_v48 = vpop.permute.xlu2 %1944 }
 0x131   :  { %6271 = vst [vmem:[#allocation19_spill] sm:$0xff] %v4665_v47  ;;  %v4669_v49 = vpop.permute.xlu0 %1942  ;;  %v4727_v47 = vadd.f32 %v4591_v5, %v4449_v18 }
 0x133   :  { %v492_v54 = vpop.f32.mrf.mxu2  ;;  %3636 = vmatpush.xpose.msk.msrb.mxu0 %vm720_vm0, %v4659_v45 }
 0x134   :  { %v4680_v4 = vadd.f32 %v492_v54, %v4484_v34  ;;  %v4723_v54 = vadd.f32 %v4587_v3, %v4484_v34  ;;  %v4738_v34 = vadd.f32 %v4573_v0, %v4449_v18  ;;  %v379_v3 = vpop.f32.mrf.mxu0  ;;  %v429_v0 = vadd.f32 %v4560_v60, %v4449_v18 }
 0x135   :  { %v4752_v33 = vadd.f32 %v379_v3, %v4447_v17 }
 0x136   :  { %1058 = vmatpush.msrb.mxu1 %v4680_v4  ;;  %1283 = vrot.lane.b32.xlu1 %v427_v53, %s4381_s3 }
 0x137   :  { %1956 = vrot.lane.b32.xlu2 %v4649_v41, %s4376_s30  ;;  %3637 = vmatpush.xpose.msk.msrb.mxu0 %vm720_vm0, %v4674_v56 }
 0x138   :  { %1059 = vmatpush.msrb.mxu1 %v4677_v61  ;;  %2583 = vrot.lane.b32.xlu0 %v4633_v30, %s4380_s2  ;;  %v4708_v62 = vpop.permute.xlu1 %1896  ;;  %v4710_v28 = vpop.permute.xlu2 %1225 }
 0x139   :  { %6272 = vst [vmem:[#allocation20_spill] sm:$0xff] %v4710_v28  ;;  %v4716_v13 = vpop.permute.xlu0 %1221 }
 0x13a   :  { %1060 = vmatpush.msrb.mxu1 %v4689_v55 }
 0x13b   :  { %3638 = vmatpush.xpose.msk.msrb.mxu0 %vm720_vm0, %v4698_v40 }
 0x13c   :  { %1061 = vmatpush.msrb.mxu1 %v4701_v57 }
 0x13e   :  { %1062 = vmatpush.msrb.mxu1 %v4713_v42  ;;  %2633 = vrot.lane.b32.xlu1 %v427_v53, %s4380_s2 }
 0x13f   :  { %1235 = vrot.lane.b32.xlu2 %v4719_v21, %s4381_s3  ;;  %3639 = vmatpush.xpose.msk.msrb.mxu0 %vm720_vm0, %v4727_v47 }
 0x140   :  { %1063 = vmatpush.msrb.mxu1 %v4723_v54  ;;  %1908 = vrot.lane.b32.xlu0 %v4633_v30, %s4376_s30  ;;  %v4745_v5 = vpop.permute.xlu1 %1223  ;;  %v4747_v11 = vpop.permute.xlu2 %2623 }
 0x141   :  { %6273 = vst [vmem:[#allocation21_spill] sm:$0xff] %v4745_v5  ;;  %v4749_v23 = vpop.permute.xlu0 %2619 }
 0x142   :  { %6274 = vst [vmem:[#allocation22_spill] sm:$0xff] %v4747_v11  ;;  %1064 = vmatpush.msrb.mxu1 %v478_v27 }
 0x143   :  { %6275 = vst [vmem:[#allocation23_spill] sm:$0xff] %v4749_v23  ;;  %3640 = vmatpush.xpose.msk.msrb.mxu0 %vm720_vm0, %v4738_v34 }
 0x144   :  { %1065 = vmatpush.msrb.mxu1 %v476_v6 }
 0x146   :  { %1066 = vmatpush.msrb.mxu1 %v4618_v19  ;;  %1237 = vrot.lane.b32.xlu1 %v4752_v33, %s4381_s3 }
 0x147   :  { %2585 = vrot.lane.b32.xlu2 %v4719_v21, %s4380_s2  ;;  %3641 = vmatpush.xpose.msk.msrb.mxu0 %vm720_vm0, %v429_v0 }
 0x148   :  { %1067 = vmatpush.msrb.mxu1 %v4615_v16  ;;  %3872 = vrot.lane.b32.xlu0 %v4626_v24, %s4381_s3  ;;  %v4767_v27 = vpop.permute.xlu1 %1271  ;;  %v4769_v6 = vpop.permute.xlu2 %2575 }
 0x149   :  { %6276 = vst [vmem:[#allocation24_spill] sm:$0xff] %v4769_v6  ;;  %v4772_v18 = vpop.permute.xlu0 %3857 }
 0x14a   :  { %1068 = vmatpush.msrb.mxu1 %v4579_v2 }
 0x14b   :  { %3642 = vmatpush.xpose.msk.msrb.mxu0 %vm720_vm0, %v427_v53 }
 0x14c   :  { %1069 = vmatpush.msrb.mxu1 %v4576_v1 }
 0x14e   :  { %1070 = vmatpush.msrb.mxu1 %v4532_v51  ;;  %1960 = vrot.lane.b32.xlu1 %v429_v0, %s4376_s30 }
 0x14f   :  { %1910 = vrot.lane.b32.xlu2 %v4719_v21, %s4376_s30  ;;  %3643 = vmatpush.xpose.msk.msrb.mxu0 %vm720_vm0, %v4649_v41 }
 0x150   :  { %1071 = vmatpush.msrb.mxu1 %v4529_v50  ;;  %1958 = vrot.lane.b32.xlu0 %v427_v53, %s4376_s30  ;;  %v4784_v60 = vpop.permute.xlu1 %2621  ;;  %v4786_v16 = vpop.permute.xlu2 %3862 }
 0x151   :  { %6277 = vst [vmem:[#allocation25_spill] sm:$0xff] %v4784_v60  ;;  %v4789_v19 = vpop.permute.xlu0 %1946 }
 0x152   :  { %1072 = vmatpush.msrb.mxu1 %v4496_v36 }
 0x153   :  { %3644 = vmatpush.xpose.msk.msrb.mxu0 %vm720_vm0, %v4612_v15  ;;  %v382_v15 = vpop.f32.mrf.mxu0 }
 0x154   :  { %1073 = vmatpush.msrb.mxu1 %v4493_v35 }
 0x156   :  { %2587 = vrot.lane.b32.xlu1 %v4752_v33, %s4380_s2 }
 0x157   :  { %2635 = vrot.lane.b32.xlu2 %v429_v0, %s4380_s2  ;;  %3645 = vmatpush.xpose.msk.msrb.mxu0 %vm720_vm0, %v4541_v52 }
 0x158   :  { %1285 = vrot.lane.b32.xlu0 %v429_v0, %s4381_s3  ;;  %v4800_v41 = vpop.permute.xlu1 %1948  ;;  %v4802_v53 = vpop.permute.xlu2 %1275 }
 0x159   :  { %v4804_v3 = vpop.permute.xlu0 %2573 }
 0x15a   :  { %6278 = vst [vmem:[#allocation26_spill] sm:$0xff] %v4804_v3 }
 0x15b   :  { %3646 = vmatpush.xpose.msk.msrb.mxu0 %vm720_vm0, %v4558_v59  ;;  %v4825_v59 = vadd.f32 %v382_v15, %v4447_v17 }
 0x15e   :  { %1912 = vrot.lane.b32.xlu1 %v4752_v33, %s4376_s30 }
 0x15f   :  { %1287 = vrot.lane.b32.xlu2 %v4738_v34, %s4381_s3  ;;  %3647 = vmatpush.xpose.msk.msrb.mxu0 %vm720_vm0, %v4518_v46  ;;  %v384_v46 = vpop.f32.mrf.mxu0 }
 0x160   :  { %3877 = vrot.lane.b32.xlu0 %v4695_v29, %s4381_s3  ;;  %v4816_v52 = vpop.permute.xlu1 %1900  ;;  %v4818_v0 = vpop.permute.xlu2 %1950  ;;  %v4844_v15 = vadd.f32 %v384_v46, %v4447_v17 }
 0x161   :  { %6279 = vst [vmem:[#allocation27_spill] sm:$0xff] %v4816_v52  ;;  %v4820_v6 = vpop.permute.xlu0 %1898 }
 0x163   :  { %3648 = vmatpush.xpose.msk.msrb.mxu0 %vm720_vm0, %v4499_v37 }
 0x166   :  { %1289 = vrot.lane.b32.xlu1 %v4727_v47, %s4381_s3 }
 0x167   :  { %1962 = vrot.lane.b32.xlu2 %v4738_v34, %s4376_s30  ;;  %3649 = vmatpush.xpose.msk.msrb.mxu0 %vm720_vm0, %v4482_v32  ;;  %v387_v32 = vpop.f32.mrf.mxu0 }
 0x168   :  { %1239 = vrot.lane.b32.xlu0 %v4825_v59, %s4381_s3  ;;  %v4835_v3 = vpop.permute.xlu1 %1277  ;;  %v4837_v14 = vpop.permute.xlu2 %1902  ;;  %v4861_v46 = vadd.f32 %v387_v32, %v4447_v17 }
 0x169   :  { %6280 = vst [vmem:[#allocation28_spill] sm:$0xff] %v4837_v14  ;;  %v4839_v37 = vpop.permute.xlu0 %1273 }
 0x16b   :  { %3650 = vmatpush.xpose.msk.msrb.mxu0 %vm720_vm0, %v4455_v22 }
 0x16e   :  { %3651 = vmatmul.msk.f32.vlgmr.msrb.gmra.mxu0 %vm720_vm0, %v4452_v20  ;;  %2639 = vrot.lane.b32.xlu1 %v4727_v47, %s4380_s2  ;;  %v4865_v20 = vpack.i.bf16 %v4723_v54, %v4713_v42 }
 0x16f   :  { %1241 = vrot.lane.b32.xlu2 %v4844_v15, %s4381_s3  ;;  %v389_v42 = vpop.f32.mrf.mxu0 }
 0x170   :  { %2637 = vrot.lane.b32.xlu0 %v4738_v34, %s4380_s2  ;;  %v4854_v23 = vpop.permute.xlu1 %2627  ;;  %v4856_v60 = vpop.permute.xlu2 %1229 }
 0x171   :  { %6281 = vst [vmem:[#allocation29_spill] sm:$0xff] %v4854_v23  ;;  %v4858_v22 = vpop.permute.xlu0 %1227 }
 0x172   :  { %6282 = vst [vmem:[#allocation30_spill] sm:$0xff] %v4856_v60 }
 0x173   :  { %6283 = vst [vmem:[#allocation31_spill] sm:$0xff] %v4858_v22 }
 0x176   :  { %3652 = vmatmul.msk.f32.gmra.mxu0 %vm720_vm0, %v4464_v25  ;;  %1243 = vrot.lane.b32.xlu1 %v4861_v46, %s4381_s3 }
 0x177   :  { %3882 = vrot.lane.b32.xlu2 %v4865_v20, %s4381_s3 }
 0x178   :  { %2589 = vrot.lane.b32.xlu0 %v4825_v59, %s4380_s2  ;;  %v4875_v34 = vpop.permute.xlu1 %2579  ;;  %v4877_v32 = vpop.permute.xlu2 %1904 }
 0x179   :  { %6284 = vst [vmem:[#allocation32_spill] sm:$0xff] %v4875_v34  ;;  %v4879_v11 = vpop.permute.xlu0 %2625 }
 0x17a   :  { %6285 = vst [vmem:[#allocation33_spill] sm:$0xff] %v4877_v32 }
 0x17b   :  { %6286 = vst [vmem:[#allocation34_spill] sm:$0xff] %v4879_v11  ;;  %v392_v11 = vpop.f32.mrf.mxu0 }
 0x17c   :  { %v393_v32 = vadd.f32 %v392_v11, %v4447_v17  ;;  %v3891_v11 = vpack.i.bf16 %v4677_v61, %v4680_v4 }
 0x17e   :  { %3653 = vmatmul.msk.f32.gmra.mxu0 %vm720_vm0, %v4479_v31  ;;  %1966 = vrot.lane.b32.xlu1 %v4698_v40, %s4376_s30 }
 0x17f   :  { %2641 = vrot.lane.b32.xlu2 %v4698_v40, %s4380_s2 }
 0x180   :  { %1964 = vrot.lane.b32.xlu0 %v4727_v47, %s4376_s30  ;;  %v4889_v25 = vpop.permute.xlu1 %3867  ;;  %v4891_v54 = vpop.permute.xlu2 %2629 }
 0x181   :  { %6287 = vst [vmem:[#allocation35_spill] sm:$0xff] %v4891_v54  ;;  %v4893_v34 = vpop.permute.xlu0 %2577 }
 0x182   :  { %6288 = vst [vmem:[#allocation36_spill] sm:$0xff] %v4893_v34  ;;  %v4910_v34 = vadd.f32 %v389_v42, %v4447_v17 }
 0x186   :  { %3654 = vmatmul.msk.f32.gmra.mxu0 %vm720_vm0, %v4509_v43  ;;  %1295 = vrot.lane.b32.xlu1 %v4659_v45, %s4381_s3  ;;  %v394_v43 = vpop.f32.mrf.mxu0 }
 0x187   :  { %1293 = vrot.lane.b32.xlu2 %v4674_v56, %s4381_s3  ;;  %v4927_v42 = vadd.f32 %v394_v43, %v4447_v17 }
 0x188   :  { %1291 = vrot.lane.b32.xlu0 %v4698_v40, %s4381_s3  ;;  %v4903_v31 = vpop.permute.xlu1 %1231  ;;  %v4905_v47 = vpop.permute.xlu2 %1281 }
 0x189   :  { %6289 = vst [vmem:[#allocation37_spill] sm:$0xff] %v4903_v31  ;;  %v4907_v60 = vpop.permute.xlu0 %1952 }
 0x18e   :  { %3655 = vmatmul.msk.f32.gmra.mxu0 %vm720_vm0, %v4555_v58  ;;  %2593 = vrot.lane.b32.xlu1 %v4861_v46, %s4380_s2  ;;  %v3886_v58 = vpack.i.bf16 %v4701_v57, %v4689_v55 }
 0x18f   :  { %1968 = vrot.lane.b32.xlu2 %v4674_v56, %s4376_s30 }
 0x190   :  { %1245 = vrot.lane.b32.xlu0 %v4910_v34, %s4381_s3  ;;  %v4920_v40 = vpop.permute.xlu1 %1954 }
 0x191   :  { %v4922_v31 = vpop.permute.xlu2 %1956  ;;  %v4924_v23 = vpop.permute.xlu0 %1279 }
 0x196   :  { %3656 = vmatmul.msk.f32.gmra.mxu0 %vm720_vm0, %v4571_v63  ;;  %1249 = vrot.lane.b32.xlu1 %v4927_v42, %s4381_s3 }
 0x197   :  { %3887 = vrot.lane.b32.xlu2 %v3886_v58, %s4381_s3 }
 0x198   :  { %2643 = vrot.lane.b32.xlu0 %v4674_v56, %s4380_s2  ;;  %v4938_v54 = vpop.permute.xlu1 %2581 }
 0x199   :  { %6290 = vst [vmem:[#allocation38_spill] sm:$0xff] %v4938_v54  ;;  %v4940_v22 = vpop.permute.xlu2 %1235  ;;  %v4942_v43 = vpop.permute.xlu0 %1233 }
 0x19a   :  { %6291 = vst [vmem:[#allocation39_spill] sm:$0xff] %v4940_v22 }
 0x19b   :  { %6292 = vst [vmem:[#allocation40_spill] sm:$0xff] %v4942_v43 }
 0x19e   :  { %3657 = vmatmul.msk.f32.gmra.mxu0 %vm720_vm0, %v4601_v12  ;;  %1918 = vrot.lane.b32.xlu1 %v4861_v46, %s4376_s30 }
 0x19f   :  { %1247 = vrot.lane.b32.xlu2 %v393_v32, %s4381_s3 }
 0x1a0   :  { %1914 = vrot.lane.b32.xlu0 %v4825_v59, %s4376_s30  ;;  %v4952_v63 = vpop.permute.xlu1 %1906 }
 0x1a1   :  { %6293 = vst [vmem:[#allocation41_spill] sm:$0xff] %v4952_v63  ;;  %v4954_v56 = vpop.permute.xlu2 %2585  ;;  %v4956_v55 = vpop.permute.xlu0 %2631 }
 0x1a2   :  { %6294 = vst [vmem:[#allocation42_spill] sm:$0xff] %v4954_v56 }
 0x1a3   :  { %6295 = vst [vmem:[#allocation43_spill] sm:$0xff] %v4956_v55 }
 0x1a6   :  { %3658 = vmatmul.msk.f32.gmra.mxu0 %vm720_vm0, %v4633_v30  ;;  %1972 = vrot.lane.b32.xlu1 %v4652_v44, %s4376_s30 }
 0x1a7   :  { %2645 = vrot.lane.b32.xlu2 %v4659_v45, %s4380_s2 }
 0x1a8   :  { %1970 = vrot.lane.b32.xlu0 %v4659_v45, %s4376_s30  ;;  %v4966_v17 = vpop.permute.xlu1 %1283 }
 0x1a9   :  { %v4968_v12 = vpop.permute.xlu2 %1910 }
 0x1aa   :  { %6296 = vst [vmem:[#allocation44_spill] sm:$0xff] %v4968_v12  ;;  %v4970_v57 = vpop.permute.xlu0 %2583  ;;  %v3796_v12 = vld [vmem:[#allocation7 + $0xcc] sm:$0xf] }
 0x1ab   :  { %6297 = vst [vmem:[#allocation45_spill] sm:$0xff] %v4970_v57 }
 0x1ae   :  { %3659 = vmatmul.msk.f32.gmra.mxu0 %vm720_vm0, %v4719_v21  ;;  %3892 = vrot.lane.b32.xlu1 %v3891_v11, %s4381_s3 }
 0x1af   :  { %2591 = vrot.lane.b32.xlu2 %v4844_v15, %s4380_s2 }
 0x1b0   :  { %1297 = vrot.lane.b32.xlu0 %v4652_v44, %s4381_s3  ;;  %v4981_v30 = vpop.permute.xlu1 %2633 }
 0x1b1   :  { %6298 = vst [vmem:[#allocation46_spill] sm:$0xff] %v4981_v30  ;;  %v4983_v45 = vpop.permute.xlu2 %2635 }
 0x1b2   :  { %6299 = vst [vmem:[#allocation47_spill] sm:$0xff] %v4983_v45  ;;  %v4985_v56 = vpop.permute.xlu0 %1908  ;;  %v3535_v45 = vld [vmem:[#allocation7 + $0x58] sm:$0xf0] }
 0x1b3   :  { %6300 = vst [vmem:[#allocation48_spill] sm:$0xff] %v4985_v56  ;;  %v3599_v56 = vld [vmem:[#allocation7 + $0xd8] sm:$0xf0] }
 0x1b6   :  { %3660 = vmatmul.msk.f32.gmra.mxu0 %vm720_vm0, %v4752_v33  ;;  %2599 = vrot.lane.b32.xlu1 %v4927_v42, %s4380_s2 }
 0x1b7   :  { %1916 = vrot.lane.b32.xlu2 %v4844_v15, %s4376_s30 }
 0x1b8   :  { %2647 = vrot.lane.b32.xlu0 %v4652_v44, %s4380_s2  ;;  %v4995_v61 = vpop.permute.xlu1 %1237 }
 0x1b9   :  { %6301 = vst [vmem:[#allocation49_spill] sm:$0xff] %v4995_v61  ;;  %v4997_v4 = vpop.permute.xlu2 %1287 }
 0x1ba   :  { %v4999_v21 = vpop.permute.xlu0 %3872 }
 0x1be   :  { %3661 = vmatmul.msk.f32.gmra.mxu0 %vm720_vm0, %v4825_v59  ;;  %3897 = vrot.lane.b32.xlu1 %v3891_v11, %s4380_s2 }
 0x1bf   :  { %2597 = vrot.lane.b32.xlu2 %v393_v32, %s4380_s2 }
 0x1c0   :  { %2595 = vrot.lane.b32.xlu0 %v4910_v34, %s4380_s2  ;;  %v5007_v33 = vpop.permute.xlu1 %1960 }
 0x1c1   :  { %v5009_v57 = vpop.permute.xlu2 %1962 }
 0x1c2   :  { %v5011_v44 = vpop.permute.xlu0 %1958 }
 0x1c6   :  { %3662 = vmatmul.msk.f32.gmra.mxu0 %vm720_vm0, %v4844_v15  ;;  %3912 = vrot.lane.b32.xlu1 %v4865_v20, %s4380_s2 }
 0x1c7   :  { %1922 = vrot.lane.b32.xlu2 %v393_v32, %s4376_s30 }
 0x1c8   :  { %1920 = vrot.lane.b32.xlu0 %v4910_v34, %s4376_s30  ;;  %v5020_v59 = vpop.permute.xlu1 %2587 }
 0x1c9   :  { %6302 = vst [vmem:[#allocation50_spill] sm:$0xff] %v5020_v59  ;;  %v5022_v54 = vpop.permute.xlu2 %1241 }
 0x1ca   :  { %6303 = vst [vmem:[#allocation51_spill] sm:$0xff] %v5022_v54  ;;  %v5024_v61 = vpop.permute.xlu0 %1285  ;;  %v5041_v54 = vpack.i.bf16 %v4493_v35, %v4496_v36 }
 0x1ce   :  { %3663 = vmatmul.msk.f32.gmra.mxu0 %vm720_vm0, %v4861_v46  ;;  %3927 = vrot.lane.b32.xlu1 %v4865_v20, %s4376_s30 }
 0x1cf   :  { %3902 = vrot.lane.b32.xlu2 %v3886_v58, %s4380_s2 }
 0x1d0   :  { %1924 = vrot.lane.b32.xlu0 %v4927_v42, %s4376_s30  ;;  %v5033_v15 = vpop.permute.xlu1 %1912 }
 0x1d1   :  { %6304 = vst [vmem:[#allocation52_spill] sm:$0xff] %v5033_v15  ;;  %v5035_v22 = vpop.permute.xlu2 %3882 }
 0x1d2   :  { %v5037_v59 = vpop.permute.xlu0 %3877 }
 0x1d6   :  { %3664 = vmatmul.msk.f32.gmra.mxu0 %vm720_vm0, %v4910_v34  ;;  %3962 = vrot.lane.b32.xlu1 %v5041_v54, %s4380_s2 }
 0x1d7   :  { %3917 = vrot.lane.b32.xlu2 %v3886_v58, %s4376_s30  ;;  %v3800_v58 = vld [vmem:[#allocation7 + $0xec] sm:$0xf] }
 0x1d8   :  { %3907 = vrot.lane.b32.xlu0 %v3891_v11, %s4376_s30  ;;  %v5049_v46 = vpop.permute.xlu1 %1289  ;;  %v3615_v11 = vld [vmem:[#allocation7 + $0xf8] sm:$0xf0] }
 0x1d9   :  { %v5051_v20 = vpop.permute.xlu2 %2641  ;;  %v3618_v43 = vor.u32 %v3800_v58, %v3615_v11  ;;  %v3602_v58 = vor.u32 %v3796_v12, %v3599_v56  ;;  %v3567_v56 = vld [vmem:[#allocation7 + $0x98] sm:$0xf0] }
 0x1da   :  { %6305 = vst [vmem:[#allocation53_spill] sm:$0xff] %v5051_v20  ;;  %v5053_v15 = vpop.permute.xlu0 %1239  ;;  %v3519_v20 = vld [vmem:[#allocation7 + $0x38] sm:$0xf0] }
 0x1db   :  { %6306 = vst [vmem:[#allocation54_spill] sm:$0xff] %v5053_v15  ;;  %v3941_v15 = vpack.i.bf16 %v4576_v1, %v4579_v2  ;;  %495 = vmatpush.bf16.msra.mxu3 %v3618_v43  ;;  %v3792_v1 = vld [vmem:[#allocation7 + $0xac] sm:$0xf]  ;;  %v3583_v2 = vld [vmem:[#allocation7 + $0xb8] sm:$0xf0]  ;;  %v3966_v43 = vpack.i.bf16 %v4529_v50, %v4532_v51 }
 0x1de   :  { %3665 = vmatmul.msk.f32.gmra.mxu0 %vm720_vm0, %v393_v32 }
 0x1df   :  { %3932 = vrot.lane.b32.xlu2 %v4626_v24, %s4380_s2  ;;  %496 = vmatpush.bf16.msra.mxu3 %v3602_v58 }
 0x1e0   :  { %3922 = vrot.lane.b32.xlu0 %v4695_v29, %s4380_s2  ;;  %v5060_v35 = vpop.permute.xlu1 %2639 }
 0x1e1   :  { %6307 = vst [vmem:[#allocation55_spill] sm:$0xff] %v5060_v35  ;;  %v5062_v36 = vpop.permute.xlu2 %1293  ;;  %v3776_v35 = vld [vmem:[#allocation7 + $0x2c] sm:$0xf] }
 0x1e2   :  { %v5064_v34 = vpop.permute.xlu0 %2637 }
 0x1e3   :  { %6308 = vst [vmem:[#allocation56_spill] sm:$0xff] %v5064_v34 }
 0x1e6   :  { %3666 = vmatmul.msk.f32.gmra.mxu0 %vm720_vm0, %v4927_v42  ;;  %v3586_v42 = vor.u32 %v3792_v1, %v3583_v2  ;;  %v3784_v1 = vld [vmem:[#allocation7 + $0x6c] sm:$0xf]  ;;  %v3551_v2 = vld [vmem:[#allocation7 + $0x78] sm:$0xf0] }
 0x1e7   :  { %3942 = vrot.lane.b32.xlu2 %v3941_v15, %s4380_s2  ;;  %v3554_v51 = vor.u32 %v3784_v1, %v3551_v2  ;;  %v3522_v1 = vor.u32 %v3776_v35, %v3519_v20  ;;  %v3836_v20 = vld [vmem:[#allocation10 + $0x10] sm:$0xff]  }
 0x1e8   :  { %3937 = vrot.lane.b32.xlu0 %v4695_v29, %s4376_s30  ;;  %v5073_v32 = vpop.permute.xlu1 %1243  ;;  %v3835_v29 = vld [vmem:[#allocation10 + $0x8] sm:$0xff]   ;;  %497 = vmatpush.bf16.msra.mxu3 %v3586_v42 }
 0x1e9   :  { %6309 = vst [vmem:[#allocation57_spill] sm:$0xff] %v5073_v32  ;;  %v5077_v55 = vpop.permute.xlu2 %1968  ;;  %v3809_v30 = vunpack.c.l.bf16 %v3835_v29  ;;  %v3780_v42 = vld [vmem:[#allocation7 + $0x4c] sm:$0xf] }
 0x1ea   :  { %v5075_v63 = vpop.permute.xlu0 %2589 }
 0x1eb   :  { %6310 = vst [vmem:[#allocation58_spill] sm:$0xff] %v5075_v63  ;;  %v5079_v11 = vpop.f32.mrf.mxu0  ;;  %v3788_v63 = vld [vmem:[#allocation7 + $0x8c] sm:$0xf]  ;;  %v3621_v14 = vadd.f32 -1.0, %v3809_v30 }
 0x1ec   :  { %v3570_v28 = vor.u32 %v3788_v63, %v3567_v56  ;;  %v3810_v63 = vunpack.c.h.bf16 %v3835_v29  ;;  %v3538_v56 = vor.u32 %v3780_v42, %v3535_v45  ;;  %v3503_v45 = vld [vmem:[#allocation7 + $0x18] sm:$0xf0] }
 0x1ed   :  { %v5099_v5 = vmul.f32 1e+30, %v3621_v14  ;;  %v3772_v14 = vld [vmem:[#allocation7 + $0xc] sm:$0xf] }
 0x1ee   :  { %498 = vmatpush.bf16.msra.mxu3 %v3570_v28  ;;  %v3506_v42 = vor.u32 %v3772_v14, %v3503_v45 }
 0x1ef   :  { %3967 = vrot.lane.b32.xlu2 %v3966_v43, %s4376_s30  ;;  %6311 = vst [vmem:[#allocation59_spill] sm:$0xff] %v5099_v5 }
 0x1f0   :  { %3947 = vrot.lane.b32.xlu0 %v4626_v24, %s4376_s30  ;;  %v5086_v32 = vpop.permute.xlu1 %1966 }
 0x1f1   :  { %v5092_v50 = vpop.permute.xlu2 %3887 }
 0x1f2   :  { %v5088_v12 = vpop.permute.xlu0 %1964  ;;  %499 = vmatpush.bf16.msra.mxu3 %v3554_v51 }
 0x1f3   :  { %v5090_v58 = vpop.f32.mrf.mxu0 }
 0x1f6   :  { %500 = vmatpush.bf16.msra.mxu3 %v3538_v56 }
 0x1f8   :  { %3952 = vrot.lane.b32.xlu0 %v3966_v43, %s4380_s2  ;;  %v5095_v24 = vpop.permute.xlu1 %1295  ;;  %v3622_v43 = vadd.f32 -1.0, %v3810_v63 }
 0x1f9   :  { %v5101_v28 = vpop.permute.xlu2 %1247 }
 0x1fa   :  { %v5097_v34 = vpop.permute.xlu0 %1291  ;;  %6312 = vst [vmem:[#allocation60_spill] sm:$0xff] %v5101_v28  ;;  %501 = vmatpush.bf16.msra.mxu3 %v3522_v1  ;;  %v5112_v51 = vmul.f32 1e+30, %v3622_v43  ;;  %v3813_v43 = vunpack.c.l.bf16 %v3836_v20 }
 0x1fb   :  { %v840_v52 = vpop.f32.mrf.mxu0 }
 0x1fc   :  { %v5104_v30 = vadd.f32 %v840_v52, %v5099_v5  ;;  %6315 = vst [vmem:[#allocation63_spill] sm:$0xff] %v5112_v51  ;;  %v3623_v14 = vadd.f32 -1.0, %v3813_v43 }
 0x1fe   :  { %502 = vmatpush.bf16.msra.mxu3 %v3506_v42 }
 0x200   :  { %3957 = vrot.lane.b32.xlu0 %v3941_v15, %s4376_s30  ;;  %v5107_v2 = vpop.permute.xlu1 %2593  ;;  %886 = vmax.xlane.f32.xlu1 %v5104_v30 }
 0x201   :  { %6313 = vst [vmem:[#allocation61_spill] sm:$0xff] %v5107_v2  ;;  %v5117_v35 = vpop.permute.xlu2 %2645  ;;  %503 = vmatmul.bf16.vlgmr.msra.gmra.mxu3 %v4432_v8  ;;  %v5133_v2 = vmul.f32 1e+30, %v3623_v14  ;;  %v5138_v8 = vld [vmem:[#allocation10 + $0x18] sm:$0xff]  }
 0x202   :  { %v5110_v29 = vpop.permute.xlu0 %1245  ;;  %v3818_v43 = vunpack.c.h.bf16 %v5138_v8 }
 0x203   :  { %6314 = vst [vmem:[#allocation62_spill] sm:$0xff] %v5110_v29  ;;  %v843_v56 = vpop.f32.mrf.mxu0 }
 0x204   :  { %v5115_v52 = vadd.f32 %v843_v56, %v5112_v51  ;;  %6320 = vst [vmem:[#allocation68_spill] sm:$0xff] %v5133_v2 }
 0x206   :  { %6316 = vst [vmem:[#allocation64_spill] sm:$0xff] %v5115_v52 }
 0x208   :  { %3972 = vrot.lane.b32.xlu0 %v5041_v54, %s4376_s30  ;;  %v5121_v15 = vpop.permute.xlu1 %1249  ;;  %888 = vmax.xlane.f32.xlu1 %v5115_v52  ;;  %v3814_v54 = vunpack.c.h.bf16 %v3836_v20 }
 0x209   :  { %6317 = vst [vmem:[#allocation65_spill] sm:$0xff] %v5121_v15  ;;  %v5129_v42 = vpop.permute.xlu2 %2591 }
 0x20a   :  { %v5125_v63 = vpop.permute.xlu0 %2643  ;;  %6319 = vst [vmem:[#allocation67_spill] sm:$0xff] %v5129_v42  ;;  %v3624_v15 = vadd.f32 -1.0, %v3814_v54  ;;  %v5151_v54 = vld [vmem:[#allocation10 + $0x20] sm:$0xff]  }
 0x20b   :  { %v846_v1 = vpop.f32.mrf.mxu0 }
 0x20c   :  { %v5136_v5 = vadd.f32 %v846_v1, %v5133_v2  ;;  %v5144_v14 = vmul.f32 1e+30, %v3624_v15  ;;  %v3626_v1 = vadd.f32 -1.0, %v3818_v43  ;;  %v3804_v43 = vld [vmem:[#allocation10] sm:$0xff]  }
 0x20e   :  { %6321 = vst [vmem:[#allocation69_spill] sm:$0xff] %v5136_v5 }
 0x20f   :  { %6322 = vst [vmem:[#allocation70_spill] sm:$0xff] %v5144_v14 }
 0x210   :  { %v5127_v45 = vpop.permute.xlu1 %1918 }
 0x211   :  { %6318 = vst [vmem:[#allocation66_spill] sm:$0xff] %v5127_v45  ;;  %508 = vmatmul.bf16.gmra.mxu3 %v4437_v9  ;;  %v5148_v29 = vpop.permute.xlu2 %1916  ;;  %v3821_v9 = vunpack.c.l.bf16 %v5151_v54 }
 0x212   :  { %v5131_v56 = vpop.permute.xlu0 %1914 }
 0x213   :  { %v849_v51 = vpop.f32.mrf.mxu0 }
 0x214   :  { %v5154_v2 = vadd.f32 %v849_v51, %v5144_v14  ;;  %v3889_v51 = vunpack.i.l.bf16 %v5092_v50 }
 0x216   :  { %6323 = vst [vmem:[#allocation71_spill] sm:$0xff] %v5154_v2 }
 0x218   :  { %890 = vmax.xlane.f32.xlu2 %v5136_v5  ;;  %v1973_v28 = vpop.permute.xlu1 %1972  ;;  %v5157_v5 = vmul.f32 1e+30, %v3626_v1  ;;  %v3627_v1 = vadd.f32 -1.0, %v3821_v9 }
 0x219   :  { %3699 = vmatpush.xpose.msk.msra.mxu0 %vm720_vm0, %v1973_v28 }
 0x21a   :  { %v1971_v42 = vpop.permute.xlu0 %1970 }
 0x21b   :  { %v5146_v20 = vpop.f32.mrf.mxu0 }
 0x21d   :  { %3700 = vmatpush.xpose.msk.msra.mxu0 %vm720_vm0, %v1971_v42 }
 0x220   :  { %892 = vmax.xlane.f32.xlu2 %v5154_v2  ;;  %v3893_v28 = vpop.permute.xlu1 %3892  ;;  %v3805_v2 = vunpack.c.l.bf16 %v3804_v43 }
 0x221   :  { %3701 = vmatpush.xpose.msk.msra.mxu0 %vm720_vm0, %v5077_v55  ;;  %v3894_v15 = vunpack.i.l.bf16 %v3893_v28  ;;  %v3895_v52 = vunpack.i.h.bf16 %v3893_v28  ;;  %v3890_v55 = vunpack.i.h.bf16 %v5092_v50  ;;  %v5170_v28 = vpop.permute.xlu2 %2597  ;;  %513 = vmatmul.bf16.gmra.mxu3 %v4442_v10  ;;  %v3839_v10 = vld [vmem:[#allocation10 + $0x28] sm:$0xff]  }
 0x222   :  { %v1298_v45 = vpop.permute.xlu0 %1297 }
 0x223   :  { %3667 = vmatpush.xpose.msk.msrb.mxu2 %vm720_vm0, %v1298_v45  ;;  %v855_v42 = vpop.f32.mrf.mxu0  ;;  %1668 = vmatpush.msrb.mxu3 %v3894_v15  ;;  %v5175_v45 = vmul.f32 1e+30, %v3627_v1  ;;  %v3619_v15 = vadd.f32 -1.0, %v3805_v2  ;;  %v3825_v1 = vunpack.c.l.bf16 %v3839_v10 }
 0x224   :  { %v5165_v14 = vadd.f32 %v855_v42, %v5157_v5  ;;  %v3806_v42 = vunpack.c.h.bf16 %v3804_v43 }
 0x225   :  { %1669 = vmatpush.msrb.mxu3 %v3895_v52  ;;  %3702 = vmatpush.xpose.msk.msra.mxu0 %vm720_vm0, %v5086_v32  ;;  %v3884_v52 = vunpack.i.l.bf16 %v5035_v22  ;;  %v5189_v2 = vmul.f32 1e+30, %v3619_v15 }
 0x226   :  { %896 = vmax.xlane.f32.xlu1 %v5165_v14 }
 0x227   :  { %3668 = vmatpush.xpose.msk.msrb.mxu2 %vm720_vm0, %v5095_v24  ;;  %1670 = vmatpush.msrb.mxu3 %v3889_v51  ;;  %v3885_v24 = vunpack.i.h.bf16 %v5035_v22  ;;  %v3880_v22 = vunpack.i.h.bf16 %v5037_v59  ;;  %v5202_v43 = vadd.f32 %v5079_v11, %v5189_v2  ;;  %v3620_v51 = vadd.f32 -1.0, %v3806_v42 }
 0x228   :  { %v3875_v11 = vunpack.i.h.bf16 %v4999_v21 }
 0x229   :  { %1671 = vmatpush.msrb.mxu3 %v3890_v55  ;;  %3703 = vmatpush.xpose.msk.msra.mxu0 %vm720_vm0, %v5088_v12  ;;  %v3879_v12 = vunpack.i.l.bf16 %v5037_v59  ;;  %v3874_v55 = vunpack.i.l.bf16 %v4999_v21  ;;  %v5217_v15 = vmul.f32 1e+30, %v3620_v51  ;;  %v3822_v51 = vunpack.c.h.bf16 %v5151_v54 }
 0x22a   :  { %v5180_v32 = vpop.permute.xlu0 %2647 }
 0x22b   :  { %3669 = vmatpush.xpose.msk.msrb.mxu2 %vm720_vm0, %v5062_v36  ;;  %v858_v50 = vpop.f32.mrf.mxu0  ;;  %1672 = vmatpush.msrb.mxu3 %v3884_v52  ;;  %v5198_v36 = vpop.permute.xlu2 %1922  ;;  %v3629_v52 = vadd.f32 -1.0, %v3825_v1  ;;  %v5228_v21 = vadd.f32 %v5090_v58, %v5217_v15  ;;  %v3628_v54 = vadd.f32 -1.0, %v3822_v51 }
 0x22c   :  { %v5187_v9 = vadd.f32 %v858_v50, %v5175_v45  ;;  %v3817_v50 = vunpack.c.l.bf16 %v5138_v8  ;;  %v3826_v8 = vunpack.c.h.bf16 %v3839_v10  ;;  %v3864_v10 = vunpack.i.l.bf16 %v4786_v16 }
 0x22d   :  { %1673 = vmatpush.msrb.mxu3 %v3885_v24  ;;  %3704 = vmatpush.xpose.msk.msra.mxu0 %vm720_vm0, %v5009_v57  ;;  %v5204_v57 = vpop.permute.xlu1 %2599  ;;  %v5230_v24 = vmul.f32 1e+30, %v3629_v52 }
 0x22e   :  { %898 = vmax.xlane.f32.xlu2 %v5187_v9  ;;  %v3625_v42 = vadd.f32 -1.0, %v3817_v50 }
 0x22f   :  { %3670 = vmatpush.xpose.msk.msrb.mxu2 %vm720_vm0, %v5097_v34  ;;  %1674 = vmatpush.msrb.mxu3 %v3879_v12 }
 0x230   :  { %v5245_v1 = vmul.f32 1e+30, %v3625_v42 }
 0x231   :  { %1675 = vmatpush.msrb.mxu3 %v3880_v22  ;;  %3705 = vmatpush.xpose.msk.msra.mxu0 %vm720_vm0, %v5007_v33  ;;  %v3870_v33 = vunpack.i.h.bf16 %v4889_v25 }
 0x232   :  { %v5209_v34 = vpop.permute.xlu0 %2595  ;;  %882 = vmax.xlane.f32.xlu0 %v5202_v43  ;;  %v5256_v50 = vadd.f32 %v5146_v20, %v5245_v1  ;;  %v5267_v20 = vmul.f32 1e+30, %v3628_v54 }
 0x233   :  { %3671 = vmatpush.xpose.msk.msrb.mxu2 %vm720_vm0, %v5049_v46  ;;  %v5214_v59 = vpop.f32.mrf.mxu0  ;;  %1676 = vmatpush.msrb.mxu3 %v3874_v55  ;;  %v3869_v46 = vunpack.i.l.bf16 %v4889_v25  ;;  %v3903_v12 = vpop.permute.xlu2 %3902  ;;  %v4238_v25 = vld [vmem:[#allocation4 + $0x18] sm:$0xff]  ;;  %v3630_v55 = vadd.f32 -1.0, %v3826_v8 }
 0x234   :  { %518 = vmatmul.bf16.gmra.mxu3 %v4238_v25 }
 0x235   :  { %1677 = vmatpush.msrb.mxu3 %v3875_v11  ;;  %3706 = vmatpush.xpose.msk.msra.mxu0 %vm720_vm0, %v5011_v44  ;;  %v3865_v44 = vunpack.i.h.bf16 %v4786_v16  ;;  %v3860_v11 = vunpack.i.h.bf16 %v4772_v18  ;;  %v3859_v16 = vunpack.i.l.bf16 %v4772_v18 }
 0x237   :  { %3672 = vmatpush.xpose.msk.msrb.mxu2 %vm720_vm0, %v4997_v4  ;;  %1678 = vmatpush.msrb.mxu3 %v3870_v33  ;;  %v3898_v4 = vpop.permute.xlu1 %3897  ;;  %v5258_v33 = vmul.f32 1e+30, %v3630_v55 }
 0x238   :  { %v3899_v52 = vunpack.i.l.bf16 %v3898_v4 }
 0x239   :  { %1679 = vmatpush.msrb.mxu3 %v3869_v46  ;;  %3707 = vmatpush.xpose.msk.msra.mxu0 %vm720_vm0, %v4922_v31  ;;  %v3904_v46 = vunpack.i.l.bf16 %v3903_v12 }
 0x23a   :  { %v5235_v22 = vpop.permute.xlu0 %1920  ;;  %884 = vmax.xlane.f32.xlu0 %v5228_v21 }
 0x23b   :  { %3673 = vmatpush.xpose.msk.msrb.mxu2 %vm720_vm0, %v5024_v61  ;;  %v864_v58 = vpop.f32.mrf.mxu0  ;;  %1680 = vmatpush.msrb.mxu3 %v3865_v44  ;;  %v3900_v61 = vunpack.i.h.bf16 %v3898_v4 }
 0x23c   :  { %v5243_v31 = vadd.f32 %v864_v58, %v5230_v24 }
 0x23d   :  { %1681 = vmatpush.msrb.mxu3 %v3864_v10  ;;  %3708 = vmatpush.xpose.msk.msra.mxu0 %vm720_vm0, %v4920_v40  ;;  %v3840_v40 = vld [vmem:[#allocation10 + $0x30] sm:$0xff]  }
 0x23e   :  { %902 = vmax.xlane.f32.xlu1 %v5243_v31  ;;  %v3829_v44 = vunpack.c.l.bf16 %v3840_v40  ;;  %v3830_v58 = vunpack.c.h.bf16 %v3840_v40 }
 0x23f   :  { %3674 = vmatpush.xpose.msk.msrb.mxu2 %vm720_vm0, %v4966_v17  ;;  %1682 = vmatpush.msrb.mxu3 %v3860_v11  ;;  %v3905_v17 = vunpack.i.h.bf16 %v3903_v12  ;;  %v3913_v25 = vpop.permute.xlu1 %3912 }
 0x240   :  { %v3914_v12 = vunpack.i.l.bf16 %v3913_v25  ;;  %v3631_v4 = vadd.f32 -1.0, %v3829_v44  ;;  %v3915_v10 = vunpack.i.h.bf16 %v3913_v25 }
 0x241   :  { %1683 = vmatpush.msrb.mxu3 %v3859_v16  ;;  %3709 = vmatpush.xpose.msk.msra.mxu0 %vm720_vm0, %v4907_v60  ;;  %v3918_v60 = vpop.permute.xlu2 %3917 }
 0x242   :  { %v5262_v42 = vpop.permute.xlu0 %1924  ;;  %894 = vmax.xlane.f32.xlu0 %v5256_v50  ;;  %v5286_v11 = vmul.f32 1e+30, %v3631_v4  ;;  %v3919_v16 = vunpack.i.l.bf16 %v3918_v60 }
 0x243   :  { %3018 = vmatpush.msra.mxu3 %v3899_v52  ;;  %3675 = vmatpush.xpose.msk.msrb.mxu2 %vm720_vm0, %v4905_v47  ;;  %v867_v18 = vpop.f32.mrf.mxu0  ;;  %v5279_v47 = vadd.f32 %v5214_v59, %v5267_v20  ;;  %v4239_v59 = vld [vmem:[#allocation4 + $0x20] sm:$0xff]  ;;  %v3632_v52 = vadd.f32 -1.0, %v3830_v58 }
 0x244   :  { %v5270_v8 = vadd.f32 %v867_v18, %v5258_v33  ;;  %523 = vmatmul.bf16.gmra.mxu3 %v4239_v59 }
 0x245   :  { %3019 = vmatpush.msra.mxu3 %v3900_v61  ;;  %3710 = vmatpush.xpose.msk.msra.mxu0 %vm720_vm0, %v4818_v0  ;;  %v3920_v61 = vunpack.i.h.bf16 %v3918_v60 }
 0x246   :  { %904 = vmax.xlane.f32.xlu2 %v5270_v8 }
 0x247   :  { %3020 = vmatpush.msra.mxu3 %v3904_v46  ;;  %3676 = vmatpush.xpose.msk.msrb.mxu2 %vm720_vm0, %v4924_v23  ;;  %v5295_v46 = vmul.f32 1e+30, %v3632_v52 }
 0x249   :  { %3021 = vmatpush.msra.mxu3 %v3905_v17  ;;  %3711 = vmatpush.xpose.msk.msra.mxu0 %vm720_vm0, %v4800_v41  ;;  %v3841_v41 = vld [vmem:[#allocation10 + $0x38] sm:$0xff]   ;;  %v3933_v54 = vpop.permute.xlu2 %3932 }
 0x24a   :  { %v3908_v51 = vpop.permute.xlu0 %3907  ;;  %900 = vmax.xlane.f32.xlu0 %v5279_v47  ;;  %v3833_v18 = vunpack.c.l.bf16 %v3841_v41  ;;  %v3834_v58 = vunpack.c.h.bf16 %v3841_v41 }
 0x24b   :  { %3022 = vmatpush.msra.mxu3 %v3914_v12  ;;  %v3910_v0 = vunpack.i.h.bf16 %v3908_v51  ;;  %v3909_v55 = vunpack.i.l.bf16 %v3908_v51  ;;  %3677 = vmatpush.xpose.msk.msrb.mxu2 %vm720_vm0, %v4835_v3  ;;  %v870_v23 = vpop.f32.mrf.mxu0  ;;  %v3928_v3 = vpop.permute.xlu1 %3927  ;;  %v3935_v51 = vunpack.i.h.bf16 %v3933_v54 }
 0x24c   :  { %v5293_v40 = vadd.f32 %v870_v23, %v5286_v11  ;;  %v3633_v25 = vadd.f32 -1.0, %v3833_v18  ;;  %v3930_v12 = vunpack.i.h.bf16 %v3928_v3  ;;  %v4240_v23 = vld [vmem:[#allocation4 + $0x28] sm:$0xff]  ;;  %v3634_v52 = vadd.f32 -1.0, %v3834_v58 }
 0x24d   :  { %3023 = vmatpush.msra.mxu3 %v3915_v10  ;;  %2343 = vmatpush.msra.mxu1 %v3909_v55 }
 0x24e   :  { %3712 = vmatpush.xpose.msk.msra.mxu0 %vm720_vm0, %v4789_v19  ;;  %v3929_v19 = vunpack.i.l.bf16 %v3928_v3 }
 0x24f   :  { %3678 = vmatpush.xpose.msk.msrb.mxu2 %vm720_vm0, %v4802_v53  ;;  %2344 = vmatpush.msra.mxu1 %v3910_v0 }
 0x251   :  { %2345 = vmatpush.msra.mxu1 %v3919_v16  ;;  %v3943_v10 = vpop.permute.xlu2 %3942 }
 0x252   :  { %3713 = vmatpush.xpose.msk.msra.mxu0 %vm720_vm0, %v4667_v48  ;;  %v3923_v17 = vpop.permute.xlu0 %3922  ;;  %906 = vmax.xlane.f32.xlu0 %v5293_v40  ;;  %v3934_v48 = vunpack.i.l.bf16 %v3933_v54  ;;  %v3945_v41 = vunpack.i.h.bf16 %v3943_v10 }
 0x253   :  { %v3924_v44 = vunpack.i.l.bf16 %v3923_v17  ;;  %3679 = vmatpush.xpose.msk.msrb.mxu2 %vm720_vm0, %v4839_v37  ;;  %2346 = vmatpush.msra.mxu1 %v3920_v61  ;;  %v873_v53 = vpop.f32.mrf.mxu0  ;;  %v3925_v4 = vunpack.i.h.bf16 %v3923_v17  ;;  %v5310_v37 = vmul.f32 1e+30, %v3633_v25  ;;  %v3963_v18 = vpop.permute.xlu1 %3962 }
 0x254   :  { %v5303_v60 = vadd.f32 %v873_v53, %v5295_v46  ;;  %528 = vmatmul.bf16.gmra.mxu3 %v4240_v23  ;;  %v6327_v53 = vld [vmem:[#allocation21_spill] sm:$0xff] }
 0x255   :  { %2347 = vmatpush.msra.mxu1 %v3929_v19  ;;  %3024 = vmatpush.msra.mxu3 %v3924_v44  ;;  %v3964_v19 = vunpack.i.l.bf16 %v3963_v18  ;;  %v6325_v44 = vld [vmem:[#allocation55_spill] sm:$0xff] }
 0x256   :  { %3714 = vmatpush.xpose.msk.msra.mxu0 %vm720_vm0, %v4669_v49  ;;  %908 = vmax.xlane.f32.xlu1 %v5303_v60 }
 0x257   :  { %3680 = vmatpush.xpose.msk.msrb.mxu2 %vm720_vm0, %v4767_v27  ;;  %2348 = vmatpush.msra.mxu1 %v3930_v12  ;;  %v3944_v27 = vunpack.i.l.bf16 %v3943_v10  ;;  %v6329_v10 = vld [vmem:[#allocation47_spill] sm:$0xff] }
 0x258   :  { %3025 = vmatpush.msra.mxu3 %v3925_v4  ;;  %v6328_v4 = vld [vmem:[#allocation56_spill] sm:$0xff] }
 0x259   :  { %3715 = vmatmul.msk.f32.vlgmr.msra.gmra.mxu0 %vm720_vm0, %v4630_v26  ;;  %v5324_v26 = vmul.f32 1e+30, %v3634_v52  ;;  %v3968_v12 = vpop.permute.xlu2 %3967  ;;  %v6332_v52 = vld [vmem:[#allocation46_spill] sm:$0xff] }
 0x25a   :  { %3026 = vmatpush.msra.mxu3 %v3934_v48  ;;  %v3938_v0 = vpop.permute.xlu0 %3937  ;;  %v3969_v58 = vunpack.i.l.bf16 %v3968_v12 }
 0x25b   :  { %v3939_v55 = vunpack.i.l.bf16 %v3938_v0  ;;  %3681 = vmatpush.xpose.msk.msrb.mxu2 %vm720_vm0, %v4643_v38  ;;  %v876_v49 = vpop.f32.mrf.mxu0  ;;  %v3940_v16 = vunpack.i.h.bf16 %v3938_v0  ;;  %v6330_v0 = vld [vmem:[#allocation28_spill] sm:$0xff] }
 0x25c   :  { %3027 = vmatpush.msra.mxu3 %v3935_v51  ;;  %v5317_v59 = vadd.f32 %v876_v49, %v5310_v37  ;;  %v3970_v51 = vunpack.i.h.bf16 %v3968_v12  ;;  %v6331_v49 = vld [vmem:[#allocation20_spill] sm:$0xff] }
 0x25d   :  { %2349 = vmatpush.msra.mxu1 %v3939_v55 }
 0x25e   :  { %3028 = vmatpush.msra.mxu3 %v3944_v27  ;;  %910 = vmax.xlane.f32.xlu2 %v5317_v59  ;;  %v4242_v27 = vld [vmem:[#allocation4 + $0x38] sm:$0xff] }
 0x25f   :  { %3682 = vmatpush.xpose.msk.msrb.mxu2 %vm720_vm0, %v4645_v39  ;;  %2350 = vmatpush.msra.mxu1 %v3940_v16 }
 0x260   :  { %3029 = vmatpush.msra.mxu3 %v3945_v41  ;;  %v6333_v41 = vld [vmem:[#allocation43_spill] sm:$0xff] }
 0x261   :  { %3716 = vmatmul.msk.f32.gmra.mxu0 %vm720_vm0, %v4708_v62 }
 0x262   :  { %v3948_v38 = vpop.permute.xlu0 %3947  ;;  %3683 = vmatmul.msk.f32.vlgmr.msrb.gmra.mxu2 %vm720_vm0, %v4598_v7 }
 0x263   :  { %3731 = vmatpush.xpose.msk.msra.mxu2 %vm720_vm0, %v5180_v32  ;;  %v3949_v61 = vunpack.i.l.bf16 %v3948_v38  ;;  %v879_v54 = vpop.f32.mrf.mxu0  ;;  %v3950_v39 = vunpack.i.h.bf16 %v3948_v38  ;;  %v4241_v32 = vld [vmem:[#allocation4 + $0x30] sm:$0xff]  ;;  %v6334_v38 = vld [vmem:[#allocation33_spill] sm:$0xff] }
 0x264   :  { %v5331_v3 = vadd.f32 %v879_v54, %v5324_v26  ;;  %533 = vmatmul.bf16.gmra.mxu3 %v4241_v32  ;;  %v6336_v54 = vld [vmem:[#allocation35_spill] sm:$0xff]  ;;  %v6340_v32 = vld [vmem:[#allocation34_spill] sm:$0xff] }
 0x265   :  { %2351 = vmatpush.msra.mxu1 %v3949_v61  ;;  %v6335_v61 = vld [vmem:[#allocation31_spill] sm:$0xff] }
 0x266   :  { %912 = vmax.xlane.f32.xlu0 %v5331_v3 }
 0x267   :  { %3732 = vmatpush.xpose.msk.msra.mxu2 %vm720_vm0, %v5117_v35  ;;  %2352 = vmatpush.msra.mxu1 %v3950_v39  ;;  %v6324_v35 = vld [vmem:[#allocation53_spill] sm:$0xff] }
 0x268   :  { %v6337_v39 = vld [vmem:[#allocation29_spill] sm:$0xff] }
 0x269   :  { %3717 = vmatmul.msk.f32.gmra.mxu0 %vm720_vm0, %v4820_v6  ;;  %v6326_v6 = vld [vmem:[#allocation27_spill] sm:$0xff] }
 0x26a   :  { %v3953_v7 = vpop.permute.xlu0 %3952  ;;  %3684 = vmatmul.msk.f32.gmra.mxu2 %vm720_vm0, %v4716_v13 }
 0x26b   :  { %3733 = vmatpush.xpose.msk.msra.mxu2 %vm720_vm0, %v5125_v63  ;;  %v3954_v62 = vunpack.i.l.bf16 %v3953_v7  ;;  %v3955_v17 = vunpack.i.h.bf16 %v3953_v7  ;;  %v3965_v63 = vunpack.i.h.bf16 %v3963_v18  ;;  %v6338_v7 = vld [vmem:[#allocation41_spill] sm:$0xff]  ;;  %v6341_v18 = vld [vmem:[#allocation22_spill] sm:$0xff] }
 0x26d   :  { %3030 = vmatpush.msra.mxu3 %v3954_v62  ;;  %v6339_v62 = vld [vmem:[#allocation30_spill] sm:$0xff] }
 0x26f   :  { %3734 = vmatpush.xpose.msk.msra.mxu2 %vm720_vm0, %v6324_v35  ;;  %3031 = vmatpush.msra.mxu3 %v3955_v17  ;;  %v6342_v35 = vld [vmem:[#allocation48_spill] sm:$0xff]  ;;  %v6343_v17 = vld [vmem:[#allocation37_spill] sm:$0xff] }
 0x271   :  { %3032 = vmatpush.msra.mxu3 %v3964_v19  ;;  %3718 = vmatmul.msk.f32.gmra.mxu0 %vm720_vm0, %v6326_v6  ;;  %v6344_v19 = vld [vmem:[#allocation25_spill] sm:$0xff]  ;;  %v6347_v6 = vld [vmem:[#allocation40_spill] sm:$0xff] }
 0x272   :  { %v3958_v13 = vpop.permute.xlu0 %3957  ;;  %3685 = vmatmul.msk.f32.gmra.mxu2 %vm720_vm0, %v6327_v53  ;;  %v6349_v53 = vld [vmem:[#allocation52_spill] sm:$0xff] }
 0x273   :  { %3735 = vmatpush.xpose.msk.msra.mxu2 %vm720_vm0, %v6325_v44  ;;  %v3959_v25 = vunpack.i.l.bf16 %v3958_v13  ;;  %3033 = vmatpush.msra.mxu3 %v3965_v63  ;;  %v3960_v48 = vunpack.i.h.bf16 %v3958_v13  ;;  %v6345_v44 = vld [vmem:[#allocation23_spill] sm:$0xff]  ;;  %v6346_v63 = vld [vmem:[#allocation44_spill] sm:$0xff]  ;;  %v6348_v13 = vld [vmem:[#allocation17_spill] sm:$0xff] }
 0x274   :  { %538 = vmatmul.bf16.gmra.mxu3 %v4242_v27 }
 0x275   :  { %2353 = vmatpush.msra.mxu1 %v3959_v25  ;;  %v6350_v25 = vld [vmem:[#allocation39_spill] sm:$0xff] }
 0x277   :  { %3736 = vmatpush.xpose.msk.msra.mxu2 %vm720_vm0, %v6328_v4  ;;  %2354 = vmatpush.msra.mxu1 %v3960_v48 }
 0x279   :  { %2355 = vmatpush.msra.mxu1 %v3969_v58  ;;  %3719 = vmatmul.msk.f32.gmra.mxu0 %vm720_vm0, %v6330_v0 }
 0x27a   :  { %v3973_v55 = vpop.permute.xlu0 %3972  ;;  %3686 = vmatmul.msk.f32.gmra.mxu2 %vm720_vm0, %v6331_v49 }
 0x27b   :  { %3737 = vmatpush.xpose.msk.msra.mxu2 %vm720_vm0, %v6329_v10  ;;  %v3974_v23 = vunpack.i.l.bf16 %v3973_v55  ;;  %2356 = vmatpush.msra.mxu1 %v3970_v51  ;;  %v3975_v16 = vunpack.i.h.bf16 %v3973_v55  ;;  %v6351_v10 = vld [vmem:[#allocation49_spill] sm:$0xff]  ;;  %v887_v51 = vpop.xlane.xlu1 %886 }
 0x27c   :  { %v916_v49 = vmax.f32 %v887_v51, 0.0 }
 0x27d   :  { %2357 = vmatpush.msra.mxu1 %v3974_v23 }
 0x27f   :  { %3738 = vmatpush.xpose.msk.msra.mxu2 %vm720_vm0, %v6332_v52  ;;  %2358 = vmatpush.msra.mxu1 %v3975_v16 }
 0x281   :  { %3720 = vmatmul.msk.f32.gmra.mxu0 %vm720_vm0, %v6334_v38 }
 0x282   :  { %3687 = vmatmul.msk.f32.gmra.mxu2 %vm720_vm0, %v6335_v61  ;;  %v6353_v61 = vld [vmem:[#allocation66_spill] sm:$0xff] }
 0x283   :  { %3739 = vmatpush.xpose.msk.msra.mxu2 %vm720_vm0, %v6333_v41  ;;  %v889_v16 = vpop.xlane.xlu1 %888 }
 0x284   :  { %v917_v38 = vmax.f32 %v889_v16, 0.0 }
 0x287   :  { %3740 = vmatpush.xpose.msk.msra.mxu2 %vm720_vm0, %v6336_v54  ;;  %v6354_v54 = vld [vmem:[#allocation51_spill] sm:$0xff] }
 0x289   :  { %3721 = vmatmul.msk.f32.gmra.mxu0 %vm720_vm0, %v6338_v7 }
 0x28a   :  { %3688 = vmatmul.msk.f32.gmra.mxu2 %vm720_vm0, %v6339_v62 }
 0x28b   :  { %3741 = vmatpush.xpose.msk.msra.mxu2 %vm720_vm0, %v6337_v39  ;;  %v6355_v39 = vld [vmem:[#allocation64_spill] sm:$0xff] }
 0x28c   :  { %v933_v7 = vsub.f32 %v6355_v39, %v917_v38 }
 0x28e   :  { %v952_v62 = vmul.f32 1.442695, %v933_v7 }
 0x28f   :  { %3742 = vmatpush.xpose.msk.msra.mxu2 %vm720_vm0, %v6340_v32 }
 0x291   :  { %3722 = vmatmul.msk.f32.gmra.mxu0 %vm720_vm0, %v6342_v35  ;;  %v6357_v35 = vld [vmem:[#allocation69_spill] sm:$0xff] }
 0x292   :  { %3689 = vmatmul.msk.f32.gmra.mxu2 %vm720_vm0, %v6343_v17 }
 0x293   :  { %3743 = vmatpush.xpose.msk.msra.mxu2 %vm720_vm0, %v6341_v18  ;;  %v6356_v18 = vld [vmem:[#allocation57_spill] sm:$0xff] }
 0x297   :  { %3744 = vmatpush.xpose.msk.msra.mxu2 %vm720_vm0, %v6344_v19 }
 0x299   :  { %3723 = vmatmul.msk.f32.gmra.mxu0 %vm720_vm0, %v6346_v63 }
 0x29a   :  { %3690 = vmatmul.msk.f32.gmra.mxu2 %vm720_vm0, %v6347_v6 }
 0x29b   :  { %3745 = vmatpush.xpose.msk.msra.mxu2 %vm720_vm0, %v6345_v44 }
 0x29f   :  { %3746 = vmatpush.xpose.msk.msra.mxu2 %vm720_vm0, %v6348_v13  ;;  %v6358_v13 = vld [vmem:[#allocation62_spill] sm:$0xff] }
 0x2a1   :  { %3724 = vmatmul.msk.f32.gmra.mxu0 %vm720_vm0, %v6349_v53 }
 0x2a2   :  { %3691 = vmatmul.msk.f32.gmra.mxu2 %vm720_vm0, %v6350_v25 }
 0x2a5   :  { %v883_v12 = vpop.xlane.xlu0 %882 }
 0x2a6   :  { %v914_v4 = vmax.f32 %v883_v12, 0.0 }
 0x2a8   :  { %v930_v48 = vsub.f32 %v5202_v43, %v914_v4  ;;  %v6352_v43 = vld [vmem:[#allocation54_spill] sm:$0xff] }
 0x2a9   :  { %3725 = vmatmul.msk.f32.gmra.mxu0 %vm720_vm0, %v5131_v56  ;;  %v932_v56 = vsub.f32 %v5104_v30, %v916_v49 }
 0x2aa   :  { %v946_v58 = vmul.f32 1.442695, %v930_v48  ;;  %3692 = vmatmul.msk.f32.gmra.mxu2 %vm720_vm0, %v6351_v10  ;;  %v897_v10 = vpop.xlane.xlu1 %896 }
 0x2ab   :  { %v950_v41 = vmul.f32 1.442695, %v932_v56 }
 0x2ac   :  { %3978 = vpow2.f32 %v946_v58  ;;  %v6360_v58 = vld [vmem:[#allocation60_spill] sm:$0xff] }
 0x2ad   :  { %v885_v0 = vpop.xlane.xlu0 %884 }
 0x2ae   :  { %v915_v55 = vmax.f32 %v885_v0, 0.0  ;;  %v921_v0 = vmax.f32 %v897_v10, 0.0 }
 0x2b0   :  { %v931_v23 = vsub.f32 %v5228_v21, %v915_v55 }
 0x2b1   :  { %3726 = vmatmul.msk.f32.gmra.mxu0 %vm720_vm0, %v5148_v29  ;;  %v891_v29 = vpop.xlane.xlu2 %890 }
 0x2b2   :  { %v3979_v27 = vpop.eup %3978  ;;  %v948_v52 = vmul.f32 1.442695, %v931_v23  ;;  %3693 = vmatmul.msk.f32.gmra.mxu2 %vm720_vm0, %v6352_v43  ;;  %v918_v30 = vmax.f32 %v891_v29, 0.0  ;;  %v6361_v23 = vld [vmem:[#allocation65_spill] sm:$0xff] }
 0x2b3   :  { %978 = vadd.xlane.f32.xlu1 %v3979_v27  ;;  %1074 = vmatmul.f32.vlgmr.msrb.gmra.mxu1 %v3979_v27 }
 0x2b4   :  { %3980 = vpow2.f32 %v948_v52  ;;  %v934_v17 = vsub.f32 %v6357_v35, %v918_v30  ;;  %v903_v30 = vpop.xlane.xlu1 %902 }
 0x2b5   :  { %3982 = vpow2.f32 %v950_v41  ;;  %v895_v25 = vpop.xlane.xlu0 %894 }
 0x2b6   :  { %3984 = vpow2.f32 %v952_v62  ;;  %v954_v44 = vmul.f32 1.442695, %v934_v17  ;;  %v920_v4 = vmax.f32 %v895_v25, 0.0  ;;  %v6363_v62 = vld [vmem:[#allocation19_spill] sm:$0xff] }
 0x2b8   :  { %3986 = vpow2.f32 %v954_v44  ;;  %v924_v44 = vmax.f32 %v903_v30, 0.0 }
 0x2b9   :  { %3727 = vmatmul.msk.f32.gmra.mxu0 %vm720_vm0, %v6353_v61  ;;  %v893_v19 = vpop.xlane.xlu2 %892 }
 0x2ba   :  { %v5409_v21 = vpop.eup %3980  ;;  %3694 = vmatmul.msk.f32.gmra.mxu2 %vm720_vm0, %v6354_v54  ;;  %v919_v63 = vmax.f32 %v893_v19, 0.0 }
 0x2bb   :  { %1077 = vmatmul.f32.gmra.mxu1 %v5409_v21  ;;  %v5417_v32 = vpop.eup %3982 }
 0x2bc   :  { %v5425_v6 = vpop.eup %3984 }
 0x2bd   :  { %v901_v38 = vpop.xlane.xlu0 %900 }
 0x2be   :  { %v5433_v48 = vpop.eup %3986  ;;  %v923_v39 = vmax.f32 %v901_v38, 0.0  ;;  %v6368_v38 = vld [vmem:[#allocation36_spill] sm:$0xff] }
 0x2c1   :  { %3728 = vmatmul.msk.f32.gmra.mxu0 %vm720_vm0, %v5235_v22  ;;  %v6359_v22 = vld [vmem:[#allocation71_spill] sm:$0xff]  ;;  %v899_v27 = vpop.xlane.xlu2 %898 }
 0x2c2   :  { %3695 = vmatmul.msk.f32.gmra.mxu2 %vm720_vm0, %v6356_v18  ;;  %v935_v53 = vsub.f32 %v6359_v22, %v919_v63  ;;  %v922_v56 = vmax.f32 %v899_v27, 0.0  ;;  %v6364_v22 = vld [vmem:[#allocation26_spill] sm:$0xff] }
 0x2c3   :  { %1080 = vmatmul.f32.gmra.mxu1 %v5417_v32 }
 0x2c4   :  { %v956_v12 = vmul.f32 1.442695, %v935_v53  ;;  %v938_v41 = vsub.f32 %v5187_v9, %v922_v56  ;;  %v939_v9 = vsub.f32 %v5279_v47, %v923_v39  ;;  %v940_v47 = vsub.f32 %v5243_v31, %v924_v44  ;;  %v6366_v31 = vld [vmem:[#allocation24_spill] sm:$0xff] }
 0x2c6   :  { %3988 = vpow2.f32 %v956_v12  ;;  %v962_v29 = vmul.f32 1.442695, %v938_v41  ;;  %v964_v63 = vmul.f32 1.442695, %v939_v9  ;;  %v966_v10 = vmul.f32 1.442695, %v940_v47 }
 0x2c9   :  { %3729 = vmatmul.msk.f32.gmra.mxu0 %vm720_vm0, %v5198_v36  ;;  %v936_v36 = vsub.f32 %v5256_v50, %v920_v4  ;;  %v6362_v50 = vld [vmem:[#allocation18_spill] sm:$0xff]  ;;  %v905_v53 = vpop.xlane.xlu2 %904  ;;  %v6365_v4 = vld [vmem:[#allocation59_spill] sm:$0xff] }
 0x2ca   :  { %3696 = vmatmul.msk.f32.gmra.mxu2 %vm720_vm0, %v6358_v13 }
 0x2cb   :  { %1083 = vmatmul.f32.gmra.mxu1 %v5425_v6  ;;  %v958_v55 = vmul.f32 1.442695, %v936_v36 }
 0x2cc   :  { %v5439_v49 = vpop.eup %3988 }
 0x2cd   :  { %3990 = vpow2.f32 %v958_v55 }
 0x2d1   :  { %3730 = vmatmul.msk.f32.gmra.mxu0 %vm720_vm0, %v5262_v42  ;;  %v937_v42 = vsub.f32 %v5165_v14, %v921_v0 }
 0x2d2   :  { %3697 = vmatmul.msk.f32.gmra.mxu2 %vm720_vm0, %v6360_v58 }
 0x2d3   :  { %1086 = vmatmul.f32.gmra.mxu1 %v5433_v48  ;;  %v960_v43 = vmul.f32 1.442695, %v937_v42  ;;  %v5445_v16 = vpop.eup %3990 }
 0x2d5   :  { %3992 = vpow2.f32 %v960_v43 }
 0x2d6   :  { %v2055_v51 = vpop.f32.mrf.mxu0  ;;  %3994 = vpow2.f32 %v962_v29 }
 0x2d7   :  { %v5462_v35 = vadd.f32 %v2055_v51, %v5189_v2  ;;  %3996 = vpow2.f32 %v964_v63  ;;  %v925_v51 = vmax.f32 %v905_v53, 0.0  ;;  %v6370_v63 = vld [vmem:[#allocation70_spill] sm:$0xff] }
 0x2d8   :  { %3998 = vpow2.f32 %v966_v10  ;;  %v6372_v10 = vld [vmem:[#allocation38_spill] sm:$0xff] }
 0x2d9   :  { %v941_v55 = vsub.f32 %v5270_v8, %v925_v51 }
 0x2da   :  { %3698 = vmatmul.msk.f32.gmra.mxu2 %vm720_vm0, %v6361_v23  ;;  %v907_v23 = vpop.xlane.xlu0 %906 }
 0x2db   :  { %1089 = vmatmul.f32.gmra.mxu1 %v5439_v49  ;;  %v5455_v7 = vpop.eup %3992  ;;  %v926_v41 = vmax.f32 %v907_v23, 0.0 }
 0x2dc   :  { %v5469_v13 = vpop.eup %3994 }
 0x2dd   :  { %v5484_v0 = vpop.eup %3996 }
 0x2de   :  { %v2058_v52 = vpop.f32.mrf.mxu0  ;;  %v5502_v8 = vpop.eup %3998 }
 0x2df   :  { %v5476_v12 = vadd.f32 %v2058_v52, %v5217_v15  ;;  %v6367_v52 = vld [vmem:[#allocation63_spill] sm:$0xff] }
 0x2e2   :  { %3747 = vmatmul.msk.f32.vlgmr.msra.gmra.mxu2 %vm720_vm0, %v6362_v50  ;;  %v968_v50 = vmul.f32 1.442695, %v941_v55  ;;  %v913_v51 = vpop.xlane.xlu0 %912 }
 0x2e3   :  { %1092 = vmatmul.f32.gmra.mxu1 %v5445_v16 }
 0x2e4   :  { %4000 = vpow2.f32 %v968_v50  ;;  %v929_v50 = vmax.f32 %v913_v51, 0.0 }
 0x2e5   :  { %v1380_v61 = vpop.f32.mrf.mxu2 }
 0x2e6   :  { %v2061_v54 = vpop.f32.mrf.mxu0  ;;  %v5452_v14 = vadd.f32 %v1380_v61, %v5189_v2  ;;  %v942_v61 = vsub.f32 %v5293_v40, %v926_v41 }
 0x2e7   :  { %v5491_v27 = vadd.f32 %v2061_v54, %v6365_v4  ;;  %v909_v54 = vpop.xlane.xlu1 %908 }
 0x2e8   :  { %1428 = vmax.xlane.f32.xlu2 %v5452_v14  ;;  %v927_v9 = vmax.f32 %v909_v54, 0.0 }
 0x2ea   :  { %3748 = vmatmul.msk.f32.gmra.mxu2 %vm720_vm0, %v6363_v62  ;;  %v970_v62 = vmul.f32 1.442695, %v942_v61  ;;  %v5511_v30 = vpop.eup %4000  ;;  %v943_v40 = vsub.f32 %v5303_v60, %v927_v9 }
 0x2eb   :  { %1095 = vmatmul.f32.gmra.mxu1 %v5455_v7 }
 0x2ec   :  { %4002 = vpow2.f32 %v970_v62 }
 0x2ed   :  { %v1383_v18 = vpop.f32.mrf.mxu2 }
 0x2ee   :  { %v2064_v17 = vpop.f32.mrf.mxu0  ;;  %v5465_v19 = vadd.f32 %v1383_v18, %v5217_v15  ;;  %v6369_v18 = vld [vmem:[#allocation32_spill] sm:$0xff] }
 0x2ef   :  { %v5494_v43 = vadd.f32 %v2064_v17, %v6367_v52  ;;  %v911_v17 = vpop.xlane.xlu2 %910 }
 0x2f0   :  { %2103 = vmax.xlane.f32.xlu2 %v5462_v35  ;;  %1430 = vmax.xlane.f32.xlu1 %v5465_v19  ;;  %v928_v53 = vmax.f32 %v911_v17, 0.0 }
 0x2f2   :  { %3749 = vmatmul.msk.f32.gmra.mxu2 %vm720_vm0, %v6364_v22  ;;  %v944_v60 = vsub.f32 %v5317_v59, %v928_v53  ;;  %v6373_v59 = vld [vmem:[#allocation45_spill] sm:$0xff] }
 0x2f3   :  { %1098 = vmatmul.f32.gmra.mxu1 %v5469_v13 }
 0x2f5   :  { %v1386_v25 = vpop.f32.mrf.mxu2 }
 0x2f6   :  { %v5479_v58 = vadd.f32 %v1386_v25, %v6365_v4  ;;  %v2067_v36 = vpop.f32.mrf.mxu0  ;;  %v5525_v25 = vpop.eup %4002 }
 0x2f8   :  { %1432 = vmax.xlane.f32.xlu0 %v5479_v58  ;;  %2105 = vmax.xlane.f32.xlu1 %v5476_v12 }
 0x2f9   :  { %980 = vadd.xlane.f32.xlu2 %v5409_v21 }
 0x2fa   :  { %3750 = vmatmul.msk.f32.gmra.mxu2 %vm720_vm0, %v6366_v31 }
 0x2fb   :  { %1101 = vmatmul.f32.gmra.mxu1 %v5484_v0 }
 0x2fd   :  { %v1389_v42 = vpop.f32.mrf.mxu2 }
 0x2fe   :  { %v2070_v56 = vpop.f32.mrf.mxu0  ;;  %v5497_v21 = vadd.f32 %v1389_v42, %v6367_v52  ;;  %v974_v42 = vmul.f32 1.442695, %v944_v60 }
 0x2ff   :  { %v5547_v54 = vadd.f32 %v2070_v56, %v6370_v63 }
 0x300   :  { %2107 = vmax.xlane.f32.xlu0 %v5491_v27  ;;  %2109 = vmax.xlane.f32.xlu1 %v5494_v43 }
 0x301   :  { %1434 = vmax.xlane.f32.xlu2 %v5497_v21 }
 0x302   :  { %3751 = vmatmul.msk.f32.gmra.mxu2 %vm720_vm0, %v6368_v38 }
 0x303   :  { %1104 = vmatmul.f32.gmra.mxu1 %v5502_v8 }
 0x305   :  { %v1392_v29 = vpop.f32.mrf.mxu2 }
 0x306   :  { %v2073_v39 = vpop.f32.mrf.mxu0 }
 0x308   :  { %982 = vadd.xlane.f32.xlu0 %v5417_v32  ;;  %984 = vadd.xlane.f32.xlu1 %v5425_v6  ;;  %v6371_v32 = vld [vmem:[#allocation68_spill] sm:$0xff] }
 0x309   :  { %986 = vadd.xlane.f32.xlu2 %v5433_v48  ;;  %v5521_v47 = vadd.f32 %v1392_v29, %v6371_v32  ;;  %v972_v48 = vmul.f32 1.442695, %v943_v40  ;;  %v5532_v55 = vadd.f32 %v2067_v36, %v6371_v32  ;;  %v945_v36 = vsub.f32 %v5331_v3, %v929_v50  ;;  %v6374_v3 = vld [vmem:[#allocation42_spill] sm:$0xff] }
 0x30a   :  { %3752 = vmatmul.msk.f32.gmra.mxu2 %vm720_vm0, %v6369_v18  ;;  %v5553_v29 = vadd.f32 %v2073_v39, %v5245_v1 }
 0x30b   :  { %1107 = vmatmul.f32.gmra.mxu1 %v5511_v30  ;;  %4004 = vpow2.f32 %v972_v48  ;;  %v976_v62 = vmul.f32 1.442695, %v945_v36 }
 0x30c   :  { %4006 = vpow2.f32 %v974_v42 }
 0x30d   :  { %v1395_v44 = vpop.f32.mrf.mxu2  ;;  %4008 = vpow2.f32 %v976_v62 }
 0x30e   :  { %v5518_v22 = vadd.f32 %v1395_v44, %v6370_v63  ;;  %v2076_v6 = vpop.f32.mrf.mxu0 }
 0x310   :  { %1438 = vmax.xlane.f32.xlu0 %v5518_v22  ;;  %1436 = vmax.xlane.f32.xlu1 %v5521_v47 }
 0x311   :  { %v5540_v38 = vpop.eup %4004 }
 0x312   :  { %3753 = vmatmul.msk.f32.gmra.mxu2 %vm720_vm0, %v6372_v10  ;;  %v5558_v9 = vpop.eup %4006 }
 0x313   :  { %1110 = vmatmul.f32.gmra.mxu1 %v5525_v25  ;;  %v5569_v44 = vpop.eup %4008 }
 0x315   :  { %v1398_v31 = vpop.f32.mrf.mxu2 }
 0x316   :  { %v5535_v23 = vadd.f32 %v1398_v31, %v5245_v1  ;;  %v2079_v41 = vpop.f32.mrf.mxu0  ;;  %v6376_v31 = vld [vmem:[#allocation58_spill] sm:$0xff] }
 0x317   :  { %v5587_v50 = vadd.f32 %v2079_v41, %v5175_v45 }
 0x318   :  { %988 = vadd.xlane.f32.xlu0 %v5439_v49  ;;  %2111 = vmax.xlane.f32.xlu1 %v5532_v55  ;;  %v5550_v49 = vadd.f32 %v2076_v6, %v5157_v5  ;;  %v6375_v6 = vld [vmem:[#allocation50_spill] sm:$0xff] }
 0x319   :  { %1440 = vmax.xlane.f32.xlu2 %v5535_v23 }
 0x31a   :  { %3754 = vmatmul.msk.f32.gmra.mxu2 %vm720_vm0, %v6373_v59 }
 0x31b   :  { %1113 = vmatmul.f32.gmra.mxu1 %v5540_v38 }
 0x31d   :  { %v1401_v61 = vpop.f32.mrf.mxu2 }
 0x31e   :  { %v2082_v56 = vpop.f32.mrf.mxu0  ;;  %v5575_v10 = vadd.f32 %v1401_v61, %v5157_v5  ;;  %v6377_v61 = vld [vmem:[#allocation67_spill] sm:$0xff] }
 0x320   :  { %2117 = vmax.xlane.f32.xlu0 %v5550_v49  ;;  %2113 = vmax.xlane.f32.xlu1 %v5547_v54 }
 0x321   :  { %2115 = vmax.xlane.f32.xlu2 %v5553_v29 }
 0x322   :  { %3755 = vmatmul.msk.f32.gmra.mxu2 %vm720_vm0, %v6374_v3 }
 0x323   :  { %1116 = vmatmul.f32.gmra.mxu1 %v5558_v9 }
 0x325   :  { %v1404_v18 = vpop.f32.mrf.mxu2 }
 0x326   :  { %v5564_v39 = vadd.f32 %v1404_v18, %v5175_v45  ;;  %v979_v40 = vpop.xlane.xlu1 %978  ;;  %v2085_v48 = vpop.f32.mrf.mxu0 }
 0x327   :  { %vm1010_vm1 = vcmp.gt.f32.partialorder %v979_v40, 0.0  ;;  %v5590_v59 = vadd.f32 %v2085_v48, %v5230_v24 }
 0x328   :  { %v1026_v17 = vsel %vm1010_vm1, %v979_v40, 1.0  ;;  %1444 = vmax.xlane.f32.xlu0 %v5564_v39  ;;  %990 = vadd.xlane.f32.xlu1 %v5445_v16 }
 0x329   :  { %4010 = vrcp.f32 %v1026_v17  ;;  %992 = vadd.xlane.f32.xlu2 %v5455_v7 }
 0x32a   :  { %3756 = vmatmul.msk.f32.gmra.mxu2 %vm720_vm0, %v6375_v6  ;;  %v5619_v6 = vpop.f32.mrf.mxu3 }
 0x32b   :  { %1119 = vmatmul.f32.gmra.mxu1 %v5569_v44  ;;  %6379 = vst [vmem:[#allocation53_spill] sm:$0xff] %v5619_v6 }
 0x32d   :  { %v1407_v53 = vpop.f32.mrf.mxu2 }
 0x32e   :  { %v5578_v60 = vadd.f32 %v1407_v53, %v5267_v20  ;;  %v2088_v36 = vpop.f32.mrf.mxu0 }
 0x32f   :  { %v4011_v51 = vpop.eup %4010  ;;  %v5622_v48 = vadd.f32 %v2088_v36, %v5258_v33 }
 0x330   :  { %994 = vadd.xlane.f32.xlu0 %v5469_v13  ;;  %v1075_v16 = vpop.f32.mrf.mxu1  ;;  %1442 = vmax.xlane.f32.xlu1 %v5575_v10  ;;  %v5593_v13 = vadd.f32 %v2082_v56, %v5267_v20  ;;  %v6378_v56 = vld [vmem:[#allocation61_spill] sm:$0xff] }
 0x331   :  { %v1123_v7 = vmul.f32 %v4011_v51, %v1075_v16  ;;  %1446 = vmax.xlane.f32.xlu2 %v5578_v60 }
 0x332   :  { %3757 = vmatmul.msk.f32.gmra.mxu2 %vm720_vm0, %v6376_v31  ;;  %v5638_v16 = vpop.f32.mrf.mxu3 }
 0x333   :  { %1139 = vst.msk [vmem:[#allocation3] sm:$0xff] %vm720_vm0, %v1123_v7 }
 0x334   :  { %6380 = vst [vmem:[#allocation55_spill] sm:$0xff] %v5638_v16 }
 0x335   :  { %v1410_v42 = vpop.f32.mrf.mxu2 }
 0x336   :  { %v2091_v3 = vpop.f32.mrf.mxu0  ;;  %v5609_v40 = vadd.f32 %v1410_v42, %v5230_v24 }
 0x337   :  { %v5628_v51 = vadd.f32 %v2091_v3, %v5286_v11 }
 0x338   :  { %2123 = vmax.xlane.f32.xlu0 %v5590_v59  ;;  %2119 = vmax.xlane.f32.xlu1 %v5587_v50  ;;  %v5643_v7 = vpop.f32.mrf.mxu1 }
 0x339   :  { %2121 = vmax.xlane.f32.xlu2 %v5593_v13 }
 0x33a   :  { %3758 = vmatmul.msk.f32.gmra.mxu2 %vm720_vm0, %v6377_v61 }
 0x33d   :  { %v1413_v62 = vpop.f32.mrf.mxu2 }
 0x33e   :  { %v5601_v41 = vadd.f32 %v1413_v62, %v5258_v33 }
 0x340   :  { %1450 = vmax.xlane.f32.xlu0 %v5601_v41  ;;  %996 = vadd.xlane.f32.xlu1 %v5484_v0  ;;  %v2094_v0 = vpop.f32.mrf.mxu0 }
 0x341   :  { %998 = vadd.xlane.f32.xlu2 %v5502_v8  ;;  %v5625_v53 = vadd.f32 %v2094_v0, %v5295_v46 }
 0x342   :  { %3759 = vmatmul.msk.f32.gmra.mxu2 %vm720_vm0, %v6378_v56 }
 0x345   :  { %v1416_v18 = vpop.f32.mrf.mxu2 }
 0x346   :  { %v5612_v17 = vadd.f32 %v1416_v18, %v5286_v11  ;;  %v5659_v18 = vpop.f32.mrf.mxu1 }
 0x348   :  { %1000 = vadd.xlane.f32.xlu0 %v5511_v30  ;;  %1448 = vmax.xlane.f32.xlu1 %v5609_v40  ;;  %v2097_v31 = vpop.f32.mrf.mxu0 }
 0x349   :  { %1452 = vmax.xlane.f32.xlu2 %v5612_v17 }
 0x34a   :  { %3760 = vmatmul.msk.f32.gmra.mxu2 %vm720_vm0, %v5209_v34 }
 0x34d   :  { %v1419_v8 = vpop.f32.mrf.mxu2 }
 0x34e   :  { %v5648_v61 = vadd.f32 %v1419_v8, %v5295_v46 }
 0x350   :  { %2129 = vmax.xlane.f32.xlu0 %v5625_v53  ;;  %2125 = vmax.xlane.f32.xlu1 %v5622_v48  ;;  %v2100_v0 = vpop.f32.mrf.mxu0 }
 0x351   :  { %2127 = vmax.xlane.f32.xlu2 %v5628_v51 }
 0x352   :  { %3761 = vmatmul.msk.f32.gmra.mxu2 %vm720_vm0, %v5170_v28 }
 0x355   :  { %v1422_v34 = vpop.f32.mrf.mxu2 }
 0x356   :  { %v5636_v30 = vadd.f32 %v1422_v34, %v5310_v37 }
 0x358   :  { %1456 = vmax.xlane.f32.xlu0 %v5636_v30  ;;  %1002 = vadd.xlane.f32.xlu1 %v5525_v25 }
 0x359   :  { %1004 = vadd.xlane.f32.xlu2 %v5540_v38  ;;  %v5656_v38 = vpop.f32.mrf.mxu3 }
 0x35a   :  { %3762 = vmatmul.msk.f32.gmra.mxu2 %vm720_vm0, %v5204_v57  ;;  %6381 = vst [vmem:[#allocation27_spill] sm:$0xff] %v5656_v38 }
 0x35b   :  { %v1429_v42 = vpop.xlane.xlu2 %1428 }
 0x35c   :  { %v1460_v28 = vmax.f32 %v1429_v42, 0.0  ;;  %v5662_v42 = vadd.f32 %v2097_v31, %v5310_v37 }
 0x35d   :  { %v1425_v36 = vpop.f32.mrf.mxu2 }
 0x35e   :  { %v1476_v62 = vsub.f32 %v5452_v14, %v1460_v28  ;;  %v5652_v3 = vadd.f32 %v1425_v36, %v5324_v26  ;;  %v5667_v36 = vadd.f32 %v2100_v0, %v5324_v26 }
 0x360   :  { %v1492_v25 = vmul.f32 1.442695, %v1476_v62  ;;  %1006 = vadd.xlane.f32.xlu0 %v5558_v9  ;;  %1454 = vmax.xlane.f32.xlu1 %v5648_v61 }
 0x361   :  { %1458 = vmax.xlane.f32.xlu2 %v5652_v3  ;;  %v5674_v31 = vpop.f32.mrf.mxu3 }
 0x362   :  { %4012 = vpow2.f32 %v1492_v25  ;;  %6382 = vst [vmem:[#allocation21_spill] sm:$0xff] %v5674_v31 }
 0x363   :  { %v2104_v57 = vpop.xlane.xlu2 %2103  ;;  %v1431_v56 = vpop.xlane.xlu1 %1430 }
 0x364   :  { %v2135_v8 = vmax.f32 %v2104_v57, 0.0  ;;  %v1461_v14 = vmax.f32 %v1431_v56, 0.0 }
 0x365   :  { %v2730_v34 = vpop.f32.mrf.mxu2 }
 0x366   :  { %v2151_v9 = vsub.f32 %v5462_v35, %v2135_v8  ;;  %v1477_v28 = vsub.f32 %v5465_v19, %v1461_v14  ;;  %v5676_v14 = vpop.f32.mrf.mxu1 }
 0x368   :  { %v5669_v62 = vpop.eup %4012  ;;  %v2167_v25 = vmul.f32 1.442695, %v2151_v9  ;;  %v1494_v38 = vmul.f32 1.442695, %v1477_v28  ;;  %2131 = vmax.xlane.f32.xlu1 %v5662_v42 }
 0x369   :  { %2133 = vmax.xlane.f32.xlu2 %v5667_v36  ;;  %1684 = vmatmul.f32.vlgmr.msrb.gmra.mxu3 %v5669_v62 }
 0x36a   :  { %4014 = vpow2.f32 %v2167_v25 }
 0x36b   :  { %4016 = vpow2.f32 %v1494_v38  ;;  %v2106_v35 = vpop.xlane.xlu1 %2105  ;;  %v1433_v57 = vpop.xlane.xlu0 %1432 }
 0x36c   :  { %v2136_v19 = vmax.f32 %v2106_v35, 0.0  ;;  %v981_v56 = vpop.xlane.xlu2 %980  ;;  %v1462_v0 = vmax.f32 %v1433_v57, 0.0 }
 0x36d   :  { %vm1011_vm2 = vcmp.gt.f32.partialorder %v981_v56, 0.0  ;;  %v2733_v8 = vpop.f32.mrf.mxu2 }
 0x36e   :  { %v2152_v9 = vsub.f32 %v5476_v12, %v2136_v19  ;;  %v1027_v28 = vsel %vm1011_vm2, %v981_v56, 1.0  ;;  %v1478_v16 = vsub.f32 %v5479_v58, %v1462_v0  ;;  %v5681_v6 = vadd.f32 %v2733_v8, %v5217_v15  ;;  %v5688_v19 = vpop.f32.mrf.mxu3 }
 0x36f   :  { %4018 = vrcp.f32 %v1027_v28  ;;  %6384 = vst [vmem:[#allocation47_spill] sm:$0xff] %v5688_v19  ;;  %v5696_v28 = vadd.f32 %v2730_v34, %v5189_v2 }
 0x370   :  { %6383 = vst [vmem:[#allocation56_spill] sm:$0xff] %v5681_v6  ;;  %v5683_v25 = vpop.eup %4014  ;;  %v2169_v38 = vmul.f32 1.442695, %v2152_v9  ;;  %v1496_v31 = vmul.f32 1.442695, %v1478_v16  ;;  %2780 = vmax.xlane.f32.xlu0 %v5681_v6  ;;  %1008 = vadd.xlane.f32.xlu1 %v5569_v44  ;;  %v1087_v6 = vpop.f32.mrf.mxu1 }
 0x371   :  { %v4017_v35 = vpop.eup %4016  ;;  %2359 = vmatmul.f32.vlgmr.msra.gmra.mxu1 %v5683_v25 }
 0x372   :  { %4020 = vpow2.f32 %v2169_v38  ;;  %1687 = vmatmul.f32.gmra.mxu3 %v4017_v35 }
 0x373   :  { %4022 = vpow2.f32 %v1496_v31  ;;  %v2110_v12 = vpop.xlane.xlu1 %2109  ;;  %v2108_v58 = vpop.xlane.xlu0 %2107 }
 0x374   :  { %v1435_v57 = vpop.xlane.xlu2 %1434  ;;  %v2137_v15 = vmax.f32 %v2108_v58, 0.0  ;;  %v2138_v58 = vmax.f32 %v2110_v12, 0.0 }
 0x375   :  { %v4019_v56 = vpop.eup %4018  ;;  %v1463_v0 = vmax.f32 %v1435_v57, 0.0  ;;  %v2736_v8 = vpop.f32.mrf.mxu2 }
 0x376   :  { %v1124_v16 = vmul.f32 %v4019_v56, %v5643_v7  ;;  %v2153_v9 = vsub.f32 %v5491_v27, %v2137_v15  ;;  %v5693_v44 = vadd.f32 %v2736_v8, %v6365_v4  ;;  %v2154_v27 = vsub.f32 %v5494_v43, %v2138_v58  ;;  %v5703_v56 = vpop.f32.mrf.mxu3 }
 0x377   :  { %v1479_v31 = vsub.f32 %v5497_v21, %v1463_v0 }
 0x378   :  { %v4021_v38 = vpop.eup %4020  ;;  %1140 = vst.msk [vmem:[#allocation3 + $0x8] sm:$0xff] %vm720_vm0, %v1124_v16  ;;  %v2171_v19 = vmul.f32 1.442695, %v2153_v9  ;;  %1526 = vadd.xlane.f32.xlu0 %v4017_v35  ;;  %2782 = vmax.xlane.f32.xlu2 %v5693_v44  ;;  %v2173_v0 = vmul.f32 1.442695, %v2154_v27 }
 0x379   :  { %v4023_v7 = vpop.eup %4022  ;;  %v1498_v57 = vmul.f32 1.442695, %v1479_v31  ;;  %2778 = vmax.xlane.f32.xlu1 %v5696_v28  ;;  %2362 = vmatmul.f32.gmra.mxu1 %v4021_v38 }
 0x37a   :  { %1690 = vmatmul.f32.gmra.mxu3 %v4023_v7 }
 0x37b   :  { %4024 = vpow2.f32 %v1498_v57  ;;  %v985_v2 = vpop.xlane.xlu1 %984  ;;  %v983_v4 = vpop.xlane.xlu0 %982 }
 0x37c   :  { %4026 = vpow2.f32 %v2171_v19  ;;  %vm1013_vm3 = vcmp.gt.f32.partialorder %v985_v2, 0.0  ;;  %v987_v21 = vpop.xlane.xlu2 %986  ;;  %vm1012_vm4 = vcmp.gt.f32.partialorder %v983_v4, 0.0  ;;  %v1090_v19 = vpop.f32.mrf.mxu1 }
 0x37d   :  { %v1029_v34 = vsel %vm1013_vm3, %v985_v2, 1.0  ;;  %vm1014_vm5 = vcmp.gt.f32.partialorder %v987_v21, 0.0  ;;  %v1028_v35 = vsel %vm1012_vm4, %v983_v4, 1.0  ;;  %v2739_v12 = vpop.f32.mrf.mxu2 }
 0x37e   :  { %4028 = vrcp.f32 %v1029_v34  ;;  %v1030_v15 = vsel %vm1014_vm5, %v987_v21, 1.0 }
 0x37f   :  { %4030 = vrcp.f32 %v1030_v15 }
 0x380   :  { %4032 = vrcp.f32 %v1028_v35  ;;  %2201 = vadd.xlane.f32.xlu0 %v4021_v38  ;;  %1528 = vadd.xlane.f32.xlu2 %v4023_v7 }
 0x381   :  { %v5705_v8 = vpop.eup %4024  ;;  %1524 = vadd.xlane.f32.xlu1 %v5669_v62  ;;  %4034 = vpow2.f32 %v2173_v0 }
 0x382   :  { %v4027_v43 = vpop.eup %4026  ;;  %1693 = vmatmul.f32.gmra.mxu3 %v5705_v8 }
 0x383   :  { %2365 = vmatmul.f32.gmra.mxu1 %v4027_v43  ;;  %v1437_v16 = vpop.xlane.xlu1 %1436  ;;  %v1439_v9 = vpop.xlane.xlu0 %1438 }
 0x384   :  { %v4029_v31 = vpop.eup %4028  ;;  %v1464_v58 = vmax.f32 %v1437_v16, 0.0  ;;  %v1465_v34 = vmax.f32 %v1439_v9, 0.0  ;;  %v5726_v15 = vpop.f32.mrf.mxu1 }
 0x385   :  { %v4031_v57 = vpop.eup %4030  ;;  %v1126_v2 = vmul.f32 %v4029_v31, %v5676_v14  ;;  %v2742_v4 = vpop.f32.mrf.mxu2 }
 0x386   :  { %v4033_v38 = vpop.eup %4032  ;;  %v1127_v7 = vmul.f32 %v4031_v57, %v1087_v6  ;;  %v1480_v27 = vsub.f32 %v5521_v47, %v1464_v58  ;;  %v5712_v62 = vadd.f32 %v2742_v4, %v6371_v32  ;;  %v5718_v14 = vpop.f32.mrf.mxu3  ;;  %v1481_v32 = vsub.f32 %v5518_v22, %v1465_v34 }
 0x387   :  { %1142 = vst.msk [vmem:[#allocation3 + $0x18] sm:$0xff] %vm720_vm0, %v1126_v2  ;;  %v1125_v21 = vmul.f32 %v4033_v38, %v5659_v18  ;;  %v5722_v47 = vpop.eup %4034  ;;  %v5733_v58 = vadd.f32 %v2739_v12, %v6367_v52 }
 0x388   :  { %1143 = vst.msk [vmem:[#allocation3 + $0x20] sm:$0xff] %vm720_vm0, %v1127_v7  ;;  %v1500_v35 = vmul.f32 1.442695, %v1480_v27  ;;  %2786 = vmax.xlane.f32.xlu2 %v5712_v62  ;;  %2203 = vadd.xlane.f32.xlu0 %v4027_v43  ;;  %v1502_v22 = vmul.f32 1.442695, %v1481_v32 }
 0x389   :  { %1141 = vst.msk [vmem:[#allocation3 + $0x10] sm:$0xff] %vm720_vm0, %v1125_v21  ;;  %2199 = vadd.xlane.f32.xlu1 %v5683_v25 }
 0x38a   :  { %4036 = vpow2.f32 %v1500_v35 }
 0x38b   :  { %2368 = vmatmul.f32.gmra.mxu1 %v5722_v47  ;;  %v2112_v6 = vpop.xlane.xlu1 %2111  ;;  %v989_v18 = vpop.xlane.xlu0 %988 }
 0x38c   :  { %v2139_v0 = vmax.f32 %v2112_v6, 0.0  ;;  %v1441_v16 = vpop.xlane.xlu2 %1440  ;;  %vm1015_vm6 = vcmp.gt.f32.partialorder %v989_v18, 0.0  ;;  %v1096_v35 = vpop.f32.mrf.mxu1 }
 0x38d   :  { %v1031_v43 = vsel %vm1015_vm6, %v989_v18, 1.0  ;;  %v2745_v9 = vpop.f32.mrf.mxu2  ;;  %v1466_v57 = vmax.f32 %v1441_v16, 0.0 }
 0x38e   :  { %v2155_v31 = vsub.f32 %v5532_v55, %v2139_v0  ;;  %4038 = vrcp.f32 %v1031_v43  ;;  %v5730_v25 = vadd.f32 %v2745_v9, %v6370_v63  ;;  %v5737_v38 = vpop.f32.mrf.mxu3 }
 0x38f   :  { %v1482_v63 = vsub.f32 %v5535_v23, %v1466_v57 }
 0x390   :  { %v4037_v2 = vpop.eup %4036  ;;  %v2175_v4 = vmul.f32 1.442695, %v2155_v31  ;;  %2788 = vmax.xlane.f32.xlu2 %v5730_v25 }
 0x391   :  { %2784 = vmax.xlane.f32.xlu1 %v5733_v58  ;;  %1696 = vmatmul.f32.gmra.mxu3 %v4037_v2  ;;  %v1504_v18 = vmul.f32 1.442695, %v1482_v63 }
 0x392   :  { %4040 = vpow2.f32 %v2175_v4  ;;  %1532 = vadd.xlane.f32.xlu0 %v4037_v2 }
 0x393   :  { %4042 = vpow2.f32 %v1502_v22  ;;  %v2114_v55 = vpop.xlane.xlu1 %2113  ;;  %v2118_v7 = vpop.xlane.xlu0 %2117 }
 0x394   :  { %v4039_v52 = vpop.eup %4038  ;;  %v2140_v12 = vmax.f32 %v2114_v55, 0.0  ;;  %v2116_v27 = vpop.xlane.xlu2 %2115 }
 0x395   :  { %v1128_v21 = vmul.f32 %v4039_v52, %v1090_v19  ;;  %v2748_v34 = vpop.f32.mrf.mxu2  ;;  %v2141_v43 = vmax.f32 %v2116_v27, 0.0  ;;  %v1099_v63 = vpop.f32.mrf.mxu1 }
 0x396   :  { %v2156_v32 = vsub.f32 %v5547_v54, %v2140_v12  ;;  %v5742_v6 = vadd.f32 %v2748_v34, %v5245_v1  ;;  %v5748_v31 = vpop.f32.mrf.mxu3 }
 0x397   :  { %1144 = vst.msk [vmem:[#allocation3 + $0x28] sm:$0xff] %vm720_vm0, %v1128_v21  ;;  %v2157_v1 = vsub.f32 %v5553_v29, %v2141_v43 }
 0x398   :  { %v4041_v0 = vpop.eup %4040  ;;  %v2177_v16 = vmul.f32 1.442695, %v2156_v32 }
 0x399   :  { %v4043_v23 = vpop.eup %4042  ;;  %1530 = vadd.xlane.f32.xlu1 %v5705_v8  ;;  %2207 = vadd.xlane.f32.xlu2 %v4041_v0  ;;  %v2142_v8 = vmax.f32 %v2118_v7, 0.0  ;;  %v2179_v55 = vmul.f32 1.442695, %v2157_v1 }
 0x39a   :  { %4044 = vpow2.f32 %v2177_v16  ;;  %2790 = vmax.xlane.f32.xlu0 %v5742_v6  ;;  %1699 = vmatmul.f32.gmra.mxu3 %v4043_v23 }
 0x39b   :  { %4046 = vpow2.f32 %v1504_v18  ;;  %2371 = vmatmul.f32.gmra.mxu1 %v4041_v0  ;;  %v991_v54 = vpop.xlane.xlu1 %990  ;;  %v1445_v19 = vpop.xlane.xlu0 %1444  ;;  %v2158_v29 = vsub.f32 %v5550_v49, %v2142_v8 }
 0x39c   :  { %v993_v9 = vpop.xlane.xlu2 %992  ;;  %vm1016_vm7 = vcmp.gt.f32.partialorder %v991_v54, 0.0  ;;  %v1468_v1 = vmax.f32 %v1445_v19, 0.0 }
 0x39d   :  { %vm1017_vm8 = vcmp.gt.f32.partialorder %v993_v9, 0.0  ;;  %v1032_v22 = vsel %vm1016_vm7, %v991_v54, 1.0  ;;  %v2751_v57 = vpop.f32.mrf.mxu2  ;;  %v2181_v54 = vmul.f32 1.442695, %v2158_v29 }
 0x39e   :  { %v1033_v2 = vsel %vm1017_vm8, %v993_v9, 1.0  ;;  %4048 = vrcp.f32 %v1032_v22  ;;  %v5757_v49 = vpop.f32.mrf.mxu3 }
 0x39f   :  { %4050 = vrcp.f32 %v1033_v2 }
 0x3a0   :  { %v4045_v4 = vpop.eup %4044  ;;  %4052 = vpow2.f32 %v2179_v55 }
 0x3a1   :  { %v4047_v52 = vpop.eup %4046  ;;  %2205 = vadd.xlane.f32.xlu1 %v5722_v47  ;;  %1534 = vadd.xlane.f32.xlu2 %v4043_v23 }
 0x3a2   :  { %2209 = vadd.xlane.f32.xlu0 %v4045_v4  ;;  %1702 = vmatmul.f32.gmra.mxu3 %v4047_v52 }
 0x3a3   :  { %2374 = vmatmul.f32.gmra.mxu1 %v4045_v4  ;;  %v1443_v12 = vpop.xlane.xlu1 %1442  ;;  %v995_v27 = vpop.xlane.xlu0 %994 }
 0x3a4   :  { %v4049_v21 = vpop.eup %4048  ;;  %v1447_v34 = vpop.xlane.xlu2 %1446  ;;  %v1467_v32 = vmax.f32 %v1443_v12, 0.0  ;;  %vm1018_vm9 = vcmp.gt.f32.partialorder %v995_v27, 0.0 }
 0x3a5   :  { %v4051_v7 = vpop.eup %4050  ;;  %v1129_v18 = vmul.f32 %v4049_v21, %v5726_v15  ;;  %v1034_v0 = vsel %vm1018_vm9, %v995_v27, 1.0  ;;  %v2754_v16 = vpop.f32.mrf.mxu2  ;;  %v1469_v29 = vmax.f32 %v1447_v34, 0.0  ;;  %v5767_v27 = vadd.f32 %v2751_v57, %v5157_v5 }
 0x3a6   :  { %v1130_v43 = vmul.f32 %v4051_v7, %v1096_v35  ;;  %v1483_v47 = vsub.f32 %v5575_v10, %v1467_v32  ;;  %4054 = vrcp.f32 %v1034_v0  ;;  %v5755_v23 = vadd.f32 %v2754_v16, %v5175_v45  ;;  %v4053_v15 = vpop.eup %4052  ;;  %v5762_v35 = vpop.f32.mrf.mxu1 }
 0x3a7   :  { %1145 = vst.msk [vmem:[#allocation3 + $0x30] sm:$0xff] %vm720_vm0, %v1129_v18  ;;  %v1484_v45 = vsub.f32 %v5564_v39, %v1468_v1  ;;  %v5770_v7 = vpop.f32.mrf.mxu3 }
 0x3a8   :  { %1146 = vst.msk [vmem:[#allocation3 + $0x38] sm:$0xff] %vm720_vm0, %v1130_v43  ;;  %v1506_v9 = vmul.f32 1.442695, %v1483_v47 }
 0x3a9   :  { %1536 = vadd.xlane.f32.xlu1 %v4047_v52  ;;  %2794 = vmax.xlane.f32.xlu2 %v5755_v23  ;;  %v1508_v12 = vmul.f32 1.442695, %v1484_v45 }
 0x3aa   :  { %4056 = vpow2.f32 %v1506_v9 }
 0x3ab   :  { %4058 = vpow2.f32 %v2181_v54  ;;  %2377 = vmatmul.f32.gmra.mxu1 %v4053_v15  ;;  %v2120_v10 = vpop.xlane.xlu1 %2119  ;;  %v2124_v22 = vpop.xlane.xlu0 %2123 }
 0x3ac   :  { %v4055_v2 = vpop.eup %4054  ;;  %v2122_v8 = vpop.xlane.xlu2 %2121  ;;  %v2143_v4 = vmax.f32 %v2120_v10, 0.0  ;;  %v2145_v1 = vmax.f32 %v2124_v22, 0.0 }
 0x3ad   :  { %v1131_v19 = vmul.f32 %v4055_v2, %v1099_v63  ;;  %v2757_v55 = vpop.f32.mrf.mxu2  ;;  %v2144_v32 = vmax.f32 %v2122_v8, 0.0  ;;  %v1485_v63 = vsub.f32 %v5578_v60, %v1469_v29 }
 0x3ae   :  { %v2159_v52 = vsub.f32 %v5587_v50, %v2143_v4  ;;  %v1105_v57 = vpop.f32.mrf.mxu1  ;;  %v5776_v60 = vadd.f32 %v2757_v55, %v5267_v20  ;;  %v2161_v2 = vsub.f32 %v5590_v59, %v2145_v1 }
 0x3af   :  { %1147 = vst.msk [vmem:[#allocation3 + $0x40] sm:$0xff] %vm720_vm0, %v1131_v19  ;;  %v2160_v34 = vsub.f32 %v5593_v13, %v2144_v32  ;;  %v1510_v47 = vmul.f32 1.442695, %v1485_v63  ;;  %v5779_v13 = vpop.f32.mrf.mxu3 }
 0x3b0   :  { %v4057_v21 = vpop.eup %4056  ;;  %v2183_v39 = vmul.f32 1.442695, %v2159_v52 }
 0x3b1   :  { %v4059_v18 = vpop.eup %4058  ;;  %2792 = vmax.xlane.f32.xlu1 %v5767_v27  ;;  %1538 = vadd.xlane.f32.xlu0 %v4057_v21  ;;  %v2185_v45 = vmul.f32 1.442695, %v2160_v34 }
 0x3b2   :  { %4060 = vpow2.f32 %v2183_v39  ;;  %1705 = vmatmul.f32.gmra.mxu3 %v4057_v21  ;;  %2213 = vadd.xlane.f32.xlu2 %v4059_v18  ;;  %v2187_v39 = vmul.f32 1.442695, %v2161_v2 }
 0x3b3   :  { %4062 = vpow2.f32 %v1508_v12  ;;  %2380 = vmatmul.f32.gmra.mxu1 %v4059_v18  ;;  %v997_v5 = vpop.xlane.xlu1 %996  ;;  %v1451_v50 = vpop.xlane.xlu0 %1450 }
 0x3b4   :  { %v999_v0 = vpop.xlane.xlu2 %998  ;;  %vm1019_vm10 = vcmp.gt.f32.partialorder %v997_v5, 0.0  ;;  %v1471_v18 = vmax.f32 %v1451_v50, 0.0 }
 0x3b5   :  { %vm1020_vm11 = vcmp.gt.f32.partialorder %v999_v0, 0.0  ;;  %v1035_v16 = vsel %vm1019_vm10, %v997_v5, 1.0  ;;  %v2760_v43 = vpop.f32.mrf.mxu2 }
 0x3b6   :  { %v1036_v54 = vsel %vm1020_vm11, %v999_v0, 1.0  ;;  %4064 = vrcp.f32 %v1035_v16  ;;  %v1108_v12 = vpop.f32.mrf.mxu1 }
 0x3b7   :  { %4066 = vrcp.f32 %v1036_v54  ;;  %v5791_v16 = vpop.f32.mrf.mxu3 }
 0x3b8   :  { %v4061_v9 = vpop.eup %4060  ;;  %4068 = vpow2.f32 %v1510_v47 }
 0x3b9   :  { %v4063_v10 = vpop.eup %4062  ;;  %2211 = vadd.xlane.f32.xlu1 %v4053_v15  ;;  %2796 = vmax.xlane.f32.xlu0 %v5776_v60  ;;  %4070 = vpow2.f32 %v2185_v45 }
 0x3ba   :  { %1540 = vadd.xlane.f32.xlu2 %v4063_v10  ;;  %1708 = vmatmul.f32.gmra.mxu3 %v4063_v10  ;;  %v5795_v10 = vadd.f32 %v2760_v43, %v5230_v24 }
 0x3bb   :  { %2383 = vmatmul.f32.gmra.mxu1 %v4061_v9  ;;  %v1449_v8 = vpop.xlane.xlu1 %1448  ;;  %v1001_v22 = vpop.xlane.xlu0 %1000 }
 0x3bc   :  { %v4065_v4 = vpop.eup %4064  ;;  %v1453_v20 = vpop.xlane.xlu2 %1452  ;;  %v1470_v19 = vmax.f32 %v1449_v8, 0.0  ;;  %vm1021_vm12 = vcmp.gt.f32.partialorder %v1001_v22, 0.0 }
 0x3bd   :  { %v4067_v55 = vpop.eup %4066  ;;  %v1132_v15 = vmul.f32 %v4065_v4, %v5762_v35  ;;  %v1037_v29 = vsel %vm1021_vm12, %v1001_v22, 1.0  ;;  %v2763_v52 = vpop.f32.mrf.mxu2  ;;  %v1472_v1 = vmax.f32 %v1453_v20, 0.0 }
 0x3be   :  { %v1133_v21 = vmul.f32 %v4067_v55, %v1105_v57  ;;  %v1486_v32 = vsub.f32 %v5609_v40, %v1470_v19  ;;  %4072 = vrcp.f32 %v1037_v29  ;;  %v5785_v59 = vadd.f32 %v2763_v52, %v5258_v33  ;;  %v4069_v63 = vpop.eup %4068  ;;  %v1111_v2 = vpop.f32.mrf.mxu1 }
 0x3bf   :  { %1148 = vst.msk [vmem:[#allocation3 + $0x48] sm:$0xff] %vm720_vm0, %v1132_v15  ;;  %v4071_v35 = vpop.eup %4070  ;;  %v1487_v40 = vsub.f32 %v5601_v41, %v1471_v18  ;;  %v1488_v19 = vsub.f32 %v5612_v17, %v1472_v1 }
 0x3c0   :  { %1149 = vst.msk [vmem:[#allocation3 + $0x50] sm:$0xff] %vm720_vm0, %v1133_v21  ;;  %v1512_v5 = vmul.f32 1.442695, %v1486_v32 }
 0x3c1   :  { %1542 = vadd.xlane.f32.xlu1 %v4069_v63  ;;  %2215 = vadd.xlane.f32.xlu0 %v4061_v9  ;;  %v1514_v45 = vmul.f32 1.442695, %v1487_v40  ;;  %v1516_v29 = vmul.f32 1.442695, %v1488_v19 }
 0x3c2   :  { %4074 = vpow2.f32 %v1512_v5  ;;  %2800 = vmax.xlane.f32.xlu2 %v5785_v59  ;;  %1711 = vmatmul.f32.gmra.mxu3 %v4069_v63 }
 0x3c3   :  { %4076 = vpow2.f32 %v2187_v39  ;;  %2386 = vmatmul.f32.gmra.mxu1 %v4071_v35  ;;  %v2126_v33 = vpop.xlane.xlu1 %2125  ;;  %v2130_v57 = vpop.xlane.xlu0 %2129 }
 0x3c4   :  { %v4073_v34 = vpop.eup %4072  ;;  %v2128_v0 = vpop.xlane.xlu2 %2127  ;;  %v2146_v50 = vmax.f32 %v2126_v33, 0.0  ;;  %v2148_v17 = vmax.f32 %v2130_v57, 0.0 }
 0x3c5   :  { %v1134_v47 = vmul.f32 %v4073_v34, %v1108_v12  ;;  %v2766_v54 = vpop.f32.mrf.mxu2  ;;  %v2147_v8 = vmax.f32 %v2128_v0, 0.0  ;;  %v5801_v12 = vpop.f32.mrf.mxu3 }
 0x3c6   :  { %v2162_v9 = vsub.f32 %v5622_v48, %v2146_v50  ;;  %v5804_v21 = vadd.f32 %v2766_v54, %v5286_v11  ;;  %v2164_v63 = vsub.f32 %v5625_v53, %v2148_v17 }
 0x3c7   :  { %1150 = vst.msk [vmem:[#allocation3 + $0x58] sm:$0xff] %vm720_vm0, %v1134_v47  ;;  %v2163_v43 = vsub.f32 %v5628_v51, %v2147_v8  ;;  %v1114_v51 = vpop.f32.mrf.mxu1 }
 0x3c8   :  { %v4075_v41 = vpop.eup %4074  ;;  %v2189_v22 = vmul.f32 1.442695, %v2162_v9  ;;  %v2193_v53 = vmul.f32 1.442695, %v2164_v63 }
 0x3c9   :  { %v4077_v4 = vpop.eup %4076  ;;  %2798 = vmax.xlane.f32.xlu1 %v5795_v10  ;;  %1544 = vadd.xlane.f32.xlu0 %v4075_v41  ;;  %v2191_v39 = vmul.f32 1.442695, %v2163_v43 }
 0x3ca   :  { %4078 = vpow2.f32 %v2189_v22  ;;  %1714 = vmatmul.f32.gmra.mxu3 %v4075_v41  ;;  %2219 = vadd.xlane.f32.xlu2 %v4077_v4 }
 0x3cb   :  { %4080 = vpow2.f32 %v1514_v45  ;;  %2389 = vmatmul.f32.gmra.mxu1 %v4077_v4  ;;  %v1003_v48 = vpop.xlane.xlu1 %1002  ;;  %v1457_v24 = vpop.xlane.xlu0 %1456 }
 0x3cc   :  { %v1005_v20 = vpop.xlane.xlu2 %1004  ;;  %vm1022_vm13 = vcmp.gt.f32.partialorder %v1003_v48, 0.0  ;;  %v1474_v9 = vmax.f32 %v1457_v24, 0.0 }
 0x3cd   :  { %vm1023_vm14 = vcmp.gt.f32.partialorder %v1005_v20, 0.0  ;;  %v1038_v55 = vsel %vm1022_vm13, %v1003_v48, 1.0  ;;  %v2769_v15 = vpop.f32.mrf.mxu2  ;;  %v5814_v8 = vpop.f32.mrf.mxu3 }
 0x3ce   :  { %v1039_v52 = vsel %vm1023_vm14, %v1005_v20, 1.0  ;;  %4082 = vrcp.f32 %v1038_v55 }
 0x3cf   :  { %4084 = vrcp.f32 %v1039_v52  ;;  %v1117_v4 = vpop.f32.mrf.mxu1 }
 0x3d0   :  { %v4079_v32 = vpop.eup %4078  ;;  %4086 = vpow2.f32 %v1516_v29  ;;  %v5820_v29 = vadd.f32 %v2769_v15, %v5295_v46 }
 0x3d1   :  { %v4081_v18 = vpop.eup %4080  ;;  %2217 = vadd.xlane.f32.xlu1 %v4071_v35  ;;  %2802 = vmax.xlane.f32.xlu0 %v5804_v21  ;;  %4088 = vpow2.f32 %v2191_v39 }
 0x3d2   :  { %1546 = vadd.xlane.f32.xlu2 %v4081_v18  ;;  %1717 = vmatmul.f32.gmra.mxu3 %v4081_v18 }
 0x3d3   :  { %2392 = vmatmul.f32.gmra.mxu1 %v4079_v32  ;;  %v1455_v5 = vpop.xlane.xlu1 %1454  ;;  %v1007_v40 = vpop.xlane.xlu0 %1006 }
 0x3d4   :  { %v4083_v33 = vpop.eup %4082  ;;  %v1459_v11 = vpop.xlane.xlu2 %1458  ;;  %v1473_v57 = vmax.f32 %v1455_v5, 0.0  ;;  %vm1024_vm15 = vcmp.gt.f32.partialorder %v1007_v40, 0.0 }
 0x3d5   :  { %v4085_v34 = vpop.eup %4084  ;;  %v1135_v0 = vmul.f32 %v4083_v33, %v1111_v2  ;;  %v1040_v50 = vsel %vm1024_vm15, %v1007_v40, 1.0  ;;  %v2772_v35 = vpop.f32.mrf.mxu2  ;;  %v1475_v43 = vmax.f32 %v1459_v11, 0.0 }
 0x3d6   :  { %v1136_v47 = vmul.f32 %v4085_v34, %v1114_v51  ;;  %v1489_v54 = vsub.f32 %v5648_v61, %v1473_v57  ;;  %4090 = vrcp.f32 %v1040_v50  ;;  %v5810_v1 = vadd.f32 %v2772_v35, %v5310_v37  ;;  %v4087_v45 = vpop.eup %4086  ;;  %v5825_v18 = vpop.f32.mrf.mxu3 }
 0x3d7   :  { %1151 = vst.msk [vmem:[#allocation3 + $0x60] sm:$0xff] %vm720_vm0, %v1135_v0  ;;  %v4089_v2 = vpop.eup %4088  ;;  %v1490_v37 = vsub.f32 %v5636_v30, %v1474_v9  ;;  %v1491_v39 = vsub.f32 %v5652_v3, %v1475_v43  ;;  %v1120_v0 = vpop.f32.mrf.mxu1 }
 0x3d8   :  { %1152 = vst.msk [vmem:[#allocation3 + $0x68] sm:$0xff] %vm720_vm0, %v1136_v47  ;;  %v1518_v41 = vmul.f32 1.442695, %v1489_v54 }
 0x3d9   :  { %1548 = vadd.xlane.f32.xlu1 %v4087_v45  ;;  %2221 = vadd.xlane.f32.xlu0 %v4079_v32  ;;  %v1520_v55 = vmul.f32 1.442695, %v1490_v37  ;;  %v1522_v5 = vmul.f32 1.442695, %v1491_v39 }
 0x3da   :  { %4092 = vpow2.f32 %v1518_v41  ;;  %2806 = vmax.xlane.f32.xlu2 %v5810_v1  ;;  %1720 = vmatmul.f32.gmra.mxu3 %v4087_v45 }
 0x3db   :  { %4094 = vpow2.f32 %v2193_v53  ;;  %2395 = vmatmul.f32.gmra.mxu1 %v4089_v2  ;;  %v2132_v61 = vpop.xlane.xlu1 %2131 }
 0x3dc   :  { %v4091_v22 = vpop.eup %4090  ;;  %v2149_v19 = vmax.f32 %v2132_v61, 0.0  ;;  %v2134_v24 = vpop.xlane.xlu2 %2133 }
 0x3dd   :  { %v1137_v48 = vmul.f32 %v4091_v22, %v1117_v4  ;;  %v2150_v17 = vmax.f32 %v2134_v24, 0.0  ;;  %v2775_v51 = vpop.f32.mrf.mxu2 }
 0x3de   :  { %v2165_v20 = vsub.f32 %v5662_v42, %v2149_v19  ;;  %v5829_v40 = vadd.f32 %v2775_v51, %v5324_v26 }
 0x3df   :  { %1153 = vst.msk [vmem:[#allocation3 + $0x70] sm:$0xff] %vm720_vm0, %v1137_v48  ;;  %v2166_v15 = vsub.f32 %v5667_v36, %v2150_v17 }
 0x3e0   :  { %v4093_v52 = vpop.eup %4092  ;;  %v2195_v32 = vmul.f32 1.442695, %v2165_v20 }
 0x3e1   :  { %v4095_v30 = vpop.eup %4094  ;;  %2804 = vmax.xlane.f32.xlu1 %v5820_v29  ;;  %1550 = vadd.xlane.f32.xlu0 %v4093_v52  ;;  %v2197_v33 = vmul.f32 1.442695, %v2166_v15 }
 0x3e2   :  { %4096 = vpow2.f32 %v2195_v32  ;;  %1723 = vmatmul.f32.gmra.mxu3 %v4093_v52  ;;  %2225 = vadd.xlane.f32.xlu2 %v4095_v30 }
 0x3e3   :  { %4098 = vpow2.f32 %v1520_v55  ;;  %2398 = vmatmul.f32.gmra.mxu1 %v4095_v30  ;;  %v1009_v46 = vpop.xlane.xlu1 %1008  ;;  %v2781_v42 = vpop.xlane.xlu0 %2780 }
 0x3e4   :  { %vm1025_vm1 = vcmp.gt.f32.partialorder %v1009_v46, 0.0  ;;  %v2811_v54 = vmax.f32 %v2781_v42, 0.0 }
 0x3e5   :  { %v1041_v63 = vsel %vm1025_vm1, %v1009_v46, 1.0 }
 0x3e6   :  { %4100 = vrcp.f32 %v1041_v63 }
 0x3e7   :  { %4102 = vpow2.f32 %v1522_v5 }
 0x3e8   :  { %v4097_v3 = vpop.eup %4096  ;;  %4104 = vpow2.f32 %v2197_v33 }
 0x3e9   :  { %v4099_v11 = vpop.eup %4098  ;;  %2223 = vadd.xlane.f32.xlu1 %v4089_v2  ;;  %2808 = vmax.xlane.f32.xlu0 %v5829_v40  ;;  %v6385_v2 = vld [vmem:[#allocation56_spill] sm:$0xff] }
 0x3ea   :  { %1552 = vadd.xlane.f32.xlu2 %v4099_v11  ;;  %1726 = vmatmul.f32.gmra.mxu3 %v4099_v11  ;;  %v2827_v37 = vsub.f32 %v6385_v2, %v2811_v54 }
 0x3eb   :  { %2401 = vmatmul.f32.gmra.mxu1 %v4097_v3  ;;  %v2783_v57 = vpop.xlane.xlu2 %2782  ;;  %v5832_v36 = vpop.xlane.xlu0 %1526 }
 0x3ec   :  { %v4101_v34 = vpop.eup %4100  ;;  %v2779_v50 = vpop.xlane.xlu1 %2778  ;;  %v2844_v19 = vmul.f32 1.442695, %v2827_v37  ;;  %v2812_v48 = vmax.f32 %v2783_v57, 0.0  ;;  %vm1557_vm6 = vcmp.gt.f32.partialorder %v5832_v36, 0.0 }
 0x3ed   :  { %v1138_v35 = vmul.f32 %v4101_v34, %v1120_v0  ;;  %v2810_v26 = vmax.f32 %v2779_v50, 0.0  ;;  %v5834_v47 = vpop.f32.mrf.mxu3  ;;  %v4103_v9 = vpop.eup %4102 }
 0x3ee   :  { %v4105_v41 = vpop.eup %4104  ;;  %v2360_v39 = vpop.f32.mrf.mxu1 }
 0x3ef   :  { %1154 = vst.msk [vmem:[#allocation3 + $0x78] sm:$0xff] %vm720_vm0, %v1138_v35  ;;  %v2826_v53 = vsub.f32 %v5696_v28, %v2810_v26  ;;  %v2828_v28 = vsub.f32 %v5693_v44, %v2812_v48 }
 0x3f1   :  { %v2842_v45 = vmul.f32 1.442695, %v2826_v53  ;;  %1554 = vadd.xlane.f32.xlu1 %v4103_v9  ;;  %2227 = vadd.xlane.f32.xlu0 %v4097_v3  ;;  %v2846_v32 = vmul.f32 1.442695, %v2828_v28 }
 0x3f2   :  { %1729 = vmatmul.f32.gmra.mxu3 %v4103_v9 }
 0x3f3   :  { %4106 = vpow2.f32 %v2842_v45  ;;  %2404 = vmatmul.f32.gmra.mxu1 %v4105_v41  ;;  %v1529_v61 = vpop.xlane.xlu2 %1528  ;;  %v2202_v22 = vpop.xlane.xlu0 %2201 }
 0x3f4   :  { %v1525_v4 = vpop.xlane.xlu1 %1524  ;;  %4108 = vpow2.f32 %v2844_v19  ;;  %vm1558_vm2 = vcmp.gt.f32.partialorder %v1529_v61, 0.0  ;;  %vm2232_vm7 = vcmp.gt.f32.partialorder %v2202_v22, 0.0 }
 0x3f5   :  { %v5839_v24 = vpop.f32.mrf.mxu3  ;;  %vm1556_vm3 = vcmp.gt.f32.partialorder %v1525_v4, 0.0  ;;  %v1574_v42 = vsel %vm1558_vm2, %v1529_v61, 1.0  ;;  %v2248_v37 = vsel %vm2232_vm7, %v2202_v22, 1.0 }
 0x3f6   :  { %v1572_v51 = vsel %vm1556_vm3, %v1525_v4, 1.0  ;;  %v2363_v26 = vpop.f32.mrf.mxu1 }
 0x3f9   :  { %v4107_v43 = vpop.eup %4106  ;;  %2229 = vadd.xlane.f32.xlu1 %v4105_v41 }
 0x3fa   :  { %2874 = vadd.xlane.f32.xlu2 %v4107_v43  ;;  %3034 = vmatmul.f32.vlgmr.msra.gmra.mxu3 %v4107_v43  ;;  %v4109_v30 = vpop.eup %4108 }
 0x3fb   :  { %v2787_v20 = vpop.xlane.xlu2 %2786  ;;  %v2204_v55 = vpop.xlane.xlu0 %2203 }
 0x3fc   :  { %v2200_v52 = vpop.xlane.xlu1 %2199  ;;  %v2814_v11 = vmax.f32 %v2787_v20, 0.0  ;;  %vm2233_vm4 = vcmp.gt.f32.partialorder %v2204_v55, 0.0 }
 0x3fd   :  { %vm2231_vm0 = vcmp.gt.f32.partialorder %v2200_v52, 0.0  ;;  %v1691_v46 = vpop.f32.mrf.mxu3  ;;  %v2249_v50 = vsel %vm2233_vm4, %v2204_v55, 1.0 }
 0x3fe   :  { %v2247_v17 = vsel %vm2231_vm0, %v2200_v52, 1.0  ;;  %v2830_v54 = vsub.f32 %v5712_v62, %v2814_v11 }
 0x3ff   :  { %4110 = vrcp.f32 %v2247_v17 }
 0x400   :  { %4112 = vpow2.f32 %v2846_v32  ;;  %v2850_v4 = vmul.f32 1.442695, %v2830_v54  ;;  %v2366_v32 = vpop.f32.mrf.mxu1 }
 0x401   :  { %2876 = vadd.xlane.f32.xlu1 %v4109_v30  ;;  %4114 = vrcp.f32 %v1574_v42 }
 0x402   :  { %3037 = vmatmul.f32.gmra.mxu3 %v4109_v30  ;;  %4116 = vrcp.f32 %v1572_v51 }
 0x403   :  { %v2789_v15 = vpop.xlane.xlu2 %2788 }
 0x404   :  { %v2785_v63 = vpop.xlane.xlu1 %2784  ;;  %v2815_v19 = vmax.f32 %v2789_v15, 0.0 }
 0x405   :  { %v4111_v44 = vpop.eup %4110  ;;  %v2813_v5 = vmax.f32 %v2785_v63, 0.0  ;;  %v1533_v3 = vpop.xlane.xlu0 %1532 }
 0x406   :  { %v2408_v33 = vmul.f32 %v4111_v44, %v2360_v39  ;;  %vm1560_vm5 = vcmp.gt.f32.partialorder %v1533_v3, 0.0  ;;  %v5844_v34 = vpop.eup %4112  ;;  %v1694_v53 = vpop.f32.mrf.mxu3  ;;  %v2831_v43 = vsub.f32 %v5730_v25, %v2815_v19 }
 0x407   :  { %v2829_v57 = vsub.f32 %v5733_v58, %v2813_v5  ;;  %v4115_v35 = vpop.eup %4114  ;;  %v1576_v9 = vsel %vm1560_vm5, %v1533_v3, 1.0  ;;  %v1573_v58 = vsel %vm1557_vm6, %v5832_v36, 1.0 }
 0x408   :  { %2440 = vrot.lane.b32.xlu0 %v2408_v33, %s4376_s30  ;;  %v4117_v2 = vpop.eup %4116  ;;  %v1735_v61 = vmul.f32 %v4115_v35, %v1691_v46  ;;  %v2852_v42 = vmul.f32 1.442695, %v2831_v43 }
 0x409   :  { %v2848_v0 = vmul.f32 1.442695, %v2829_v57  ;;  %v1733_v62 = vmul.f32 %v4117_v2, %v5834_v47 }
 0x40a   :  { %3040 = vmatmul.f32.gmra.mxu3 %v5844_v34 }
 0x40b   :  { %4118 = vpow2.f32 %v2848_v0 }
 0x40c   :  { %v1531_v45 = vpop.xlane.xlu1 %1530  ;;  %v5850_v41 = vpop.xlane.xlu2 %2207  ;;  %4120 = vrcp.f32 %v2249_v50 }
 0x40d   :  { %4122 = vrcp.f32 %v1576_v9  ;;  %vm1559_vm8 = vcmp.gt.f32.partialorder %v1531_v45, 0.0  ;;  %v2791_v36 = vpop.xlane.xlu0 %2790  ;;  %vm2235_vm0 = vcmp.gt.f32.partialorder %v5850_v41, 0.0 }
 0x40e   :  { %4124 = vrcp.f32 %v1573_v58  ;;  %v1575_v20 = vsel %vm1559_vm8, %v1531_v45, 1.0  ;;  %v2816_v15 = vmax.f32 %v2791_v36, 0.0  ;;  %vm1813_vm8 = vcmask 523520  }
 0x40f   :  { %4126 = vrcp.f32 %v2248_v37 }
 0x410   :  { %1769 = vrot.lane.b32.xlu0 %v1735_v61, %s4380_s2  ;;  %4128 = vpow2.f32 %v2850_v4  ;;  %v2832_v5 = vsub.f32 %v5742_v6, %v2816_v15 }
 0x411   :  { %v5854_v48 = vpop.eup %4118  ;;  %4130 = vrcp.f32 %v1575_v20 }
 0x412   :  { %1765 = vrot.lane.b32.xlu2 %v1733_v62, %s4380_s2  ;;  %3043 = vmatmul.f32.gmra.mxu3 %v5854_v48  ;;  %v4121_v22 = vpop.eup %4120  ;;  %v2854_v35 = vmul.f32 1.442695, %v2832_v5 }
 0x413   :  { %v4123_v28 = vpop.eup %4122  ;;  %v2410_v46 = vmul.f32 %v4121_v22, %v2366_v32 }
 0x414   :  { %v5859_v55 = vpop.xlane.xlu1 %2205  ;;  %v1697_v52 = vpop.f32.mrf.mxu3 }
 0x415   :  { %v4125_v17 = vpop.eup %4124  ;;  %v5861_v47 = vmul.f32 %v4123_v28, %v1697_v52  ;;  %v1535_v30 = vpop.xlane.xlu2 %1534  ;;  %vm2234_vm15 = vcmp.gt.f32.partialorder %v5859_v55, 0.0 }
 0x416   :  { %v4127_v39 = vpop.eup %4126  ;;  %vm1561_vm9 = vcmp.gt.f32.partialorder %v1535_v30, 0.0  ;;  %v1734_v63 = vmul.f32 %v4125_v17, %v5839_v24  ;;  %v5871_v3 = vpop.xlane.xlu0 %2209 }
 0x417   :  { %v1577_v51 = vsel %vm1561_vm9, %v1535_v30, 1.0  ;;  %v5865_v25 = vpop.eup %4128  ;;  %v2409_v44 = vmul.f32 %v4127_v39, %v2363_v26  ;;  %vm2236_vm3 = vcmp.gt.f32.partialorder %v5871_v3, 0.0  ;;  %vm2488_vm9 = vcmask 785920  }
 0x418   :  { %4132 = vrcp.f32 %v1577_v51  ;;  %2444 = vrot.lane.b32.xlu0 %v2410_v46, %s4376_s30  ;;  %v4131_v11 = vpop.eup %4130 }
 0x419   :  { %4134 = vpow2.f32 %v2852_v42  ;;  %v1736_v54 = vmul.f32 %v4131_v11, %v1694_v53 }
 0x41a   :  { %3046 = vmatmul.f32.gmra.mxu3 %v5865_v25  ;;  %1767 = vrot.lane.b32.xlu1 %v1734_v63, %s4380_s2 }
 0x41b   :  { %2442 = vrot.lane.b32.xlu2 %v2409_v44, %s4376_s30 }
 0x41c   :  { %v1537_v33 = vpop.xlane.xlu1 %1536 }
 0x41d   :  { %vm1562_vm10 = vcmp.gt.f32.partialorder %v1537_v33, 0.0  ;;  %v2795_v24 = vpop.xlane.xlu2 %2794  ;;  %v1700_v57 = vpop.f32.mrf.mxu3 }
 0x41e   :  { %v4133_v0 = vpop.eup %4132  ;;  %v1578_v50 = vsel %vm1562_vm10, %v1537_v33, 1.0  ;;  %v2818_v19 = vmax.f32 %v2795_v24, 0.0 }
 0x41f   :  { %4136 = vrcp.f32 %v1578_v50  ;;  %v5873_v26 = vmul.f32 %v4133_v0, %v1700_v57  ;;  %v5875_v9 = vpop.eup %4134 }
 0x420   :  { %4138 = vpow2.f32 %v2854_v35  ;;  %v2834_v22 = vsub.f32 %v5755_v23, %v2818_v19 }
 0x422   :  { %3049 = vmatmul.f32.gmra.mxu3 %v5875_v9  ;;  %1771 = vrot.lane.b32.xlu1 %v1736_v54, %s4380_s2  ;;  %v2858_v17 = vmul.f32 1.442695, %v2834_v22 }
 0x424   :  { %v2793_v6 = vpop.xlane.xlu1 %2792  ;;  %v1539_v58 = vpop.xlane.xlu0 %1538 }
 0x425   :  { %v4137_v45 = vpop.eup %4136  ;;  %v2817_v2 = vmax.f32 %v2793_v6, 0.0  ;;  %v1703_v37 = vpop.f32.mrf.mxu3  ;;  %vm1563_vm11 = vcmp.gt.f32.partialorder %v1539_v58, 0.0 }
 0x426   :  { %v5879_v61 = vpop.xlane.xlu2 %2213  ;;  %v5881_v4 = vmul.f32 %v4137_v45, %v1703_v37  ;;  %v5884_v53 = vpop.eup %4138  ;;  %v1579_v43 = vsel %vm1563_vm11, %v1539_v58, 1.0 }
 0x427   :  { %v2833_v62 = vsub.f32 %v5767_v27, %v2817_v2 }
 0x429   :  { %v2856_v36 = vmul.f32 1.442695, %v2833_v62 }
 0x42a   :  { %3052 = vmatmul.f32.gmra.mxu3 %v5884_v53 }
 0x42b   :  { %4140 = vpow2.f32 %v2856_v36 }
 0x42c   :  { %v5888_v28 = vpop.xlane.xlu1 %2211  ;;  %v2797_v20 = vpop.xlane.xlu0 %2796  ;;  %4142 = vrcp.f32 %v1579_v43 }
 0x42d   :  { %v2819_v32 = vmax.f32 %v2797_v20, 0.0  ;;  %4144 = vpow2.f32 %v2858_v17  ;;  %vm2237_vm11 = vcmp.gt.f32.partialorder %v5888_v28, 0.0 }
 0x42e   :  { %v1541_v52 = vpop.xlane.xlu2 %1540 }
 0x42f   :  { %vm1564_vm12 = vcmp.gt.f32.partialorder %v1541_v52, 0.0  ;;  %v2835_v27 = vsub.f32 %v5776_v60, %v2819_v32 }
 0x430   :  { %v1580_v39 = vsel %vm1564_vm12, %v1541_v52, 1.0  ;;  %vm2238_vm12 = vcmp.gt.f32.partialorder %v5879_v61, 0.0 }
 0x431   :  { %v5890_v30 = vpop.eup %4140  ;;  %4146 = vrcp.f32 %v1580_v39  ;;  %v2860_v44 = vmul.f32 1.442695, %v2835_v27 }
 0x432   :  { %3055 = vmatmul.f32.gmra.mxu3 %v5890_v30  ;;  %v4143_v42 = vpop.eup %4142 }
 0x433   :  { %v5898_v5 = vpop.eup %4144  ;;  %4148 = vpow2.f32 %v2860_v44 }
 0x434   :  { %v1543_v46 = vpop.xlane.xlu1 %1542  ;;  %v5894_v23 = vpop.xlane.xlu0 %2215 }
 0x435   :  { %v1706_v15 = vpop.f32.mrf.mxu3  ;;  %vm1565_vm13 = vcmp.gt.f32.partialorder %v1543_v46, 0.0 }
 0x436   :  { %v2801_v51 = vpop.xlane.xlu2 %2800  ;;  %v5896_v63 = vmul.f32 %v4143_v42, %v1706_v15  ;;  %v1581_v33 = vsel %vm1565_vm13, %v1543_v46, 1.0  ;;  %v2369_v15 = vpop.f32.mrf.mxu1  ;;  %vm2239_vm13 = vcmp.gt.f32.partialorder %v5894_v23, 0.0 }
 0x437   :  { %v4147_v24 = vpop.eup %4146  ;;  %4150 = vrcp.f32 %v1581_v33  ;;  %v2821_v54 = vmax.f32 %v2801_v51, 0.0  ;;  %v2251_v51 = vsel %vm2235_vm0, %v5850_v41, 1.0 }
 0x439   :  { %v5906_v58 = vpop.eup %4148  ;;  %v2837_v2 = vsub.f32 %v5785_v59, %v2821_v54 }
 0x43a   :  { %3058 = vmatmul.f32.gmra.mxu3 %v5898_v5 }
 0x43b   :  { %v2864_v20 = vmul.f32 1.442695, %v2837_v2  ;;  %v2252_v2 = vsel %vm2236_vm3, %v5871_v3, 1.0 }
 0x43c   :  { %v2799_v11 = vpop.xlane.xlu1 %2798  ;;  %v1545_v60 = vpop.xlane.xlu0 %1544 }
 0x43d   :  { %v2820_v57 = vmax.f32 %v2799_v11, 0.0  ;;  %v1709_v0 = vpop.f32.mrf.mxu3  ;;  %vm1566_vm14 = vcmp.gt.f32.partialorder %v1545_v60, 0.0 }
 0x43e   :  { %v5901_v50 = vpop.xlane.xlu2 %2219  ;;  %v5903_v35 = vmul.f32 %v4147_v24, %v1709_v0  ;;  %v1582_v37 = vsel %vm1566_vm14, %v1545_v60, 1.0 }
 0x43f   :  { %v2836_v6 = vsub.f32 %v5795_v10, %v2820_v57  ;;  %v4151_v10 = vpop.eup %4150 }
 0x441   :  { %v2862_v45 = vmul.f32 1.442695, %v2836_v6 }
 0x442   :  { %2880 = vadd.xlane.f32.xlu0 %v5854_v48  ;;  %3061 = vmatmul.f32.gmra.mxu3 %v5906_v58  ;;  %v2250_v48 = vsel %vm2234_vm15, %v5859_v55, 1.0 }
 0x443   :  { %4152 = vpow2.f32 %v2862_v45 }
 0x444   :  { %2878 = vadd.xlane.f32.xlu2 %v5844_v34  ;;  %v5913_v19 = vpop.xlane.xlu1 %2217  ;;  %v2803_v62 = vpop.xlane.xlu0 %2802  ;;  %4154 = vrcp.f32 %v1582_v37 }
 0x445   :  { %v1712_v36 = vpop.f32.mrf.mxu3  ;;  %v2822_v52 = vmax.f32 %v2803_v62, 0.0  ;;  %4156 = vrcp.f32 %v2250_v48  ;;  %v2372_v37 = vpop.f32.mrf.mxu1  ;;  %vm2240_vm3 = vcmp.gt.f32.partialorder %v5913_v19, 0.0 }
 0x446   :  { %v1547_v22 = vpop.xlane.xlu2 %1546  ;;  %v5915_v43 = vmul.f32 %v4151_v10, %v1712_v36  ;;  %4158 = vpow2.f32 %v2864_v20 }
 0x447   :  { %vm1567_vm1 = vcmp.gt.f32.partialorder %v1547_v22, 0.0  ;;  %v2838_v34 = vsub.f32 %v5804_v21, %v2822_v52 }
 0x448   :  { %v1583_v17 = vsel %vm1567_vm1, %v1547_v22, 1.0 }
 0x449   :  { %v5918_v59 = vpop.eup %4152  ;;  %4160 = vrcp.f32 %v1583_v17  ;;  %v2866_v21 = vmul.f32 1.442695, %v2838_v34 }
 0x44a   :  { %3064 = vmatmul.f32.gmra.mxu3 %v5918_v59  ;;  %v4155_v27 = vpop.eup %4154  ;;  %4162 = vrcp.f32 %v2251_v51 }
 0x44b   :  { %v4157_v44 = vpop.eup %4156  ;;  %4164 = vpow2.f32 %v2866_v21 }
 0x44c   :  { %2884 = vadd.xlane.f32.xlu2 %v5875_v9  ;;  %v1549_v32 = vpop.xlane.xlu1 %1548  ;;  %2882 = vadd.xlane.f32.xlu1 %v5865_v25  ;;  %v5925_v55 = vpop.xlane.xlu0 %2221  ;;  %v2411_v24 = vmul.f32 %v4157_v44, %v2369_v15 }
 0x44d   :  { %v1715_v39 = vpop.f32.mrf.mxu3  ;;  %v4159_v33 = vpop.eup %4158  ;;  %vm1568_vm2 = vcmp.gt.f32.partialorder %v1549_v32, 0.0 }
 0x44e   :  { %v2807_v46 = vpop.xlane.xlu2 %2806  ;;  %v5927_v42 = vmul.f32 %v4155_v27, %v1715_v39  ;;  %v1584_v25 = vsel %vm1568_vm2, %v1549_v32, 1.0  ;;  %vm3163_vm2 = vcmask 1048320  }
 0x44f   :  { %v2824_v11 = vmax.f32 %v2807_v46, 0.0  ;;  %v4161_v57 = vpop.eup %4160  ;;  %4166 = vrcp.f32 %v1584_v25  ;;  %v2375_v46 = vpop.f32.mrf.mxu1 }
 0x450   :  { %v4163_v62 = vpop.eup %4162  ;;  %4168 = vrcp.f32 %v2252_v2 }
 0x451   :  { %v2840_v41 = vsub.f32 %v5810_v1, %v2824_v11  ;;  %v5940_v10 = vpop.eup %4164  ;;  %v2412_v1 = vmul.f32 %v4163_v62, %v2372_v37 }
 0x452   :  { %3067 = vmatmul.f32.gmra.mxu3 %v4159_v33 }
 0x453   :  { %v2870_v36 = vmul.f32 1.442695, %v2840_v41 }
 0x454   :  { %2890 = vadd.xlane.f32.xlu2 %v5898_v5  ;;  %v2805_v9 = vpop.xlane.xlu1 %2804  ;;  %v1551_v60 = vpop.xlane.xlu0 %1550 }
 0x455   :  { %v2823_v0 = vmax.f32 %v2805_v9, 0.0  ;;  %v1718_v54 = vpop.f32.mrf.mxu3  ;;  %vm1569_vm4 = vcmp.gt.f32.partialorder %v1551_v60, 0.0  ;;  %v4167_v52 = vpop.eup %4166 }
 0x456   :  { %v5933_v6 = vpop.xlane.xlu2 %2225  ;;  %v5935_v45 = vmul.f32 %v4161_v57, %v1718_v54  ;;  %2446 = vrot.lane.b32.xlu0 %v2411_v24, %s4376_s30  ;;  %v1585_v48 = vsel %vm1569_vm4, %v1551_v60, 1.0  ;;  %v4169_v27 = vpop.eup %4168  ;;  %vm2241_vm4 = vcmp.gt.f32.partialorder %v5901_v50, 0.0 }
 0x457   :  { %v2839_v5 = vsub.f32 %v5820_v29, %v2823_v0  ;;  %v2413_v21 = vmul.f32 %v4169_v27, %v2375_v46 }
 0x459   :  { %v2868_v22 = vmul.f32 1.442695, %v2839_v5 }
 0x45a   :  { %3070 = vmatmul.f32.gmra.mxu3 %v5940_v10 }
 0x45b   :  { %4170 = vpow2.f32 %v2868_v22 }
 0x45c   :  { %2896 = vadd.xlane.f32.xlu2 %v4159_v33  ;;  %v5943_v20 = vpop.xlane.xlu1 %2223  ;;  %v2809_v3 = vpop.xlane.xlu0 %2808  ;;  %4172 = vpow2.f32 %v2870_v36 }
 0x45d   :  { %v1721_v34 = vpop.f32.mrf.mxu3  ;;  %4174 = vrcp.f32 %v1585_v48  ;;  %v2825_v32 = vmax.f32 %v2809_v3, 0.0 }
 0x45e   :  { %v5945_v29 = vmul.f32 %v4167_v52, %v1721_v34  ;;  %v1553_v17 = vpop.xlane.xlu2 %1552  ;;  %2448 = vrot.lane.b32.xlu0 %v2412_v1, %s4376_s30 }
 0x45f   :  { %vm1570_vm5 = vcmp.gt.f32.partialorder %v1553_v17, 0.0  ;;  %v2841_v51 = vsub.f32 %v5829_v40, %v2825_v32 }
 0x460   :  { %v1586_v44 = vsel %vm1570_vm5, %v1553_v17, 1.0  ;;  %vm2242_vm5 = vcmp.gt.f32.partialorder %v5925_v55, 0.0 }
 0x461   :  { %v5948_v39 = vpop.eup %4170  ;;  %4176 = vrcp.f32 %v1586_v44  ;;  %v2872_v60 = vmul.f32 1.442695, %v2841_v51  ;;  %v2253_v44 = vsel %vm2237_vm11, %v5888_v28, 1.0  ;;  %vm2243_vm11 = vcmp.gt.f32.partialorder %v5943_v20, 0.0 }
 0x462   :  { %3073 = vmatmul.f32.gmra.mxu3 %v5948_v39  ;;  %v4173_v15 = vpop.eup %4172 }
 0x463   :  { %v4175_v11 = vpop.eup %4174  ;;  %4178 = vpow2.f32 %v2872_v60 }
 0x464   :  { %2902 = vadd.xlane.f32.xlu2 %v4173_v15  ;;  %v1555_v33 = vpop.xlane.xlu1 %1554  ;;  %v5965_v2 = vpop.xlane.xlu0 %2227 }
 0x465   :  { %v1724_v25 = vpop.f32.mrf.mxu3  ;;  %1773 = vrot.lane.b32.xlu1 %v5861_v47, %s4380_s2  ;;  %vm1571_vm6 = vcmp.gt.f32.partialorder %v1555_v33, 0.0 }
 0x466   :  { %v5954_v9 = vmul.f32 %v4175_v11, %v1724_v25  ;;  %2450 = vrot.lane.b32.xlu0 %v2413_v21, %s4376_s30  ;;  %v1587_v24 = vsel %vm1571_vm6, %v1555_v33, 1.0  ;;  %v2378_v33 = vpop.f32.mrf.mxu1  ;;  %v2254_v11 = vsel %vm2238_vm12, %v5879_v61, 1.0 }
 0x467   :  { %v4177_v57 = vpop.eup %4176  ;;  %4180 = vrcp.f32 %v1587_v24 }
 0x469   :  { %v5963_v47 = vpop.eup %4178 }
 0x46a   :  { %3076 = vmatmul.f32.gmra.mxu3 %v4173_v15 }
 0x46c   :  { %v5957_v40 = vpop.xlane.xlu1 %2229 }
 0x46d   :  { %v2875_v41 = vpop.xlane.xlu2 %2874  ;;  %v1727_v0 = vpop.f32.mrf.mxu3  ;;  %1775 = vrot.lane.b32.xlu1 %v5873_v26, %s4380_s2 }
 0x46e   :  { %v5961_v54 = vmul.f32 %v4177_v57, %v1727_v0  ;;  %vm2906_vm7 = vcmp.gt.f32.partialorder %v2875_v41, 0.0  ;;  %v4181_v5 = vpop.eup %4180  ;;  %v2381_v57 = vpop.f32.mrf.mxu1 }
 0x46f   :  { %v2922_v37 = vsel %vm2906_vm7, %v2875_v41, 1.0 }
 0x470   :  { %4182 = vrcp.f32 %v2922_v37 }
 0x472   :  { %3079 = vmatmul.f32.gmra.mxu3 %v5963_v47 }
 0x474   :  { %v2877_v22 = vpop.xlane.xlu1 %2876 }
 0x475   :  { %v1766_v62 = vpop.permute.xlu2 %1765  ;;  %v1730_v36 = vpop.f32.mrf.mxu3  ;;  %1777 = vrot.lane.b32.xlu1 %v5881_v4, %s4380_s2  ;;  %vm2907_vm10 = vcmp.gt.f32.partialorder %v2877_v22, 0.0 }
 0x476   :  { %1814 = vst.msk [vmem:[#allocation3] sm:$0xff] %vm1813_vm8, %v1766_v62  ;;  %v5971_v26 = vmul.f32 %v4181_v5, %v1730_v36  ;;  %v2923_v48 = vsel %vm2907_vm10, %v2877_v22, 1.0  ;;  %v4183_v3 = vpop.eup %4182  ;;  %v2384_v0 = vpop.f32.mrf.mxu1 }
 0x477   :  { %4184 = vrcp.f32 %v2923_v48 }
 0x478   :  { %4186 = vrcp.f32 %v2253_v44 }
 0x479   :  { %4188 = vrcp.f32 %v2254_v11 }
 0x47a   :  { %v2441_v1 = vpop.permute.xlu0 %2440 }
 0x47b   :  { %2489 = vst.msk [vmem:[#allocation3] sm:$0xff] %vm2488_vm9, %v2441_v1 }
 0x47d   :  { %v3035_v52 = vpop.f32.mrf.mxu3  ;;  %v4185_v4 = vpop.eup %4184 }
 0x47e   :  { %v5974_v34 = vmul.f32 %v4183_v3, %v3035_v52  ;;  %v2443_v51 = vpop.permute.xlu2 %2442  ;;  %v4187_v25 = vpop.eup %4186 }
 0x47f   :  { %v2414_v60 = vmul.f32 %v4187_v25, %v2378_v33  ;;  %v4189_v24 = vpop.eup %4188 }
 0x480   :  { %v2415_v28 = vmul.f32 %v4189_v24, %v2381_v57  ;;  %v2256_v57 = vsel %vm2240_vm3, %v5913_v19, 1.0  ;;  %v2258_v19 = vsel %vm2242_vm5, %v5925_v55, 1.0 }
 0x482   :  { %v1770_v17 = vpop.permute.xlu0 %1769 }
 0x483   :  { %1816 = vst.msk [vmem:[#allocation3 + $0x10] sm:$0xff] %vm1813_vm8, %v1770_v17 }
 0x485   :  { %v3038_v32 = vpop.f32.mrf.mxu3 }
 0x486   :  { %v3084_v27 = vmul.f32 %v4185_v4, %v3038_v32 }
 0x488   :  { %3117 = vrot.lane.b32.xlu2 %v3084_v27, %s4381_s3 }
 0x48a   :  { %v2445_v46 = vpop.permute.xlu0 %2444 }
 0x48b   :  { %2491 = vst.msk [vmem:[#allocation3 + $0x10] sm:$0xff] %vm2488_vm9, %v2445_v46 }
 0x48c   :  { %v1768_v15 = vpop.permute.xlu1 %1767 }
 0x48d   :  { %1815 = vst.msk [vmem:[#allocation3 + $0x8] sm:$0xff] %vm1813_vm8, %v1768_v15  ;;  %v3041_v62 = vpop.f32.mrf.mxu3 }
 0x48e   :  { %2490 = vst.msk [vmem:[#allocation3 + $0x8] sm:$0xff] %vm2488_vm9, %v2443_v51 }
 0x490   :  { %2886 = vadd.xlane.f32.xlu0 %v5884_v53  ;;  %v2255_v53 = vsel %vm2239_vm13, %v5894_v23, 1.0 }
 0x491   :  { %4190 = vrcp.f32 %v2255_v53 }
 0x494   :  { %v1772_v21 = vpop.permute.xlu1 %1771 }
 0x495   :  { %1817 = vst.msk [vmem:[#allocation3 + $0x18] sm:$0xff] %vm1813_vm8, %v1772_v21  ;;  %v3044_v3 = vpop.f32.mrf.mxu3 }
 0x497   :  { %v4191_v41 = vpop.eup %4190 }
 0x498   :  { %v2416_v61 = vmul.f32 %v4191_v41, %v2384_v0  ;;  %v2257_v41 = vsel %vm2241_vm4, %v5901_v50, 1.0 }
 0x49d   :  { %v3047_v46 = vpop.f32.mrf.mxu3 }
 0x49f   :  { %2888 = vadd.xlane.f32.xlu1 %v5890_v30 }
 0x4a4   :  { %2452 = vrot.lane.b32.xlu0 %v2414_v60, %s4376_s30 }
 0x4ac   :  { %2454 = vrot.lane.b32.xlu0 %v2415_v28, %s4376_s30 }
 0x4b4   :  { %2456 = vrot.lane.b32.xlu0 %v2416_v61, %s4376_s30 }
 0x4b5   :  { %v2881_v30 = vpop.xlane.xlu0 %2880 }
 0x4b6   :  { %vm2909_vm15 = vcmp.gt.f32.partialorder %v2881_v30, 0.0 }
 0x4b7   :  { %v2879_v37 = vpop.xlane.xlu2 %2878  ;;  %v2925_v23 = vsel %vm2909_vm15, %v2881_v30, 1.0  ;;  %vm2244_vm15 = vcmp.gt.f32.partialorder %v5933_v6, 0.0 }
 0x4b8   :  { %vm2908_vm14 = vcmp.gt.f32.partialorder %v2879_v37, 0.0  ;;  %1779 = vrot.lane.b32.xlu1 %v5896_v63, %s4380_s2 }
 0x4b9   :  { %v2924_v5 = vsel %vm2908_vm14, %v2879_v37, 1.0 }
 0x4ba   :  { %4192 = vrcp.f32 %v2924_v5 }
 0x4bb   :  { %4194 = vrcp.f32 %v2925_v23 }
 0x4bf   :  { %v2885_v36 = vpop.xlane.xlu2 %2884  ;;  %v2883_v22 = vpop.xlane.xlu1 %2882 }
 0x4c0   :  { %v4193_v1 = vpop.eup %4192  ;;  %1781 = vrot.lane.b32.xlu1 %v5903_v35, %s4380_s2  ;;  %vm2910_vm1 = vcmp.gt.f32.partialorder %v2883_v22, 0.0  ;;  %vm2911_vm0 = vcmp.gt.f32.partialorder %v2885_v36, 0.0 }
 0x4c1   :  { %v3085_v48 = vmul.f32 %v4193_v1, %v3041_v62  ;;  %v2926_v52 = vsel %vm2910_vm1, %v2883_v22, 1.0  ;;  %v4195_v17 = vpop.eup %4194  ;;  %v2927_v35 = vsel %vm2911_vm0, %v2885_v36, 1.0  ;;  %vm2245_vm1 = vcmp.gt.f32.partialorder %v5965_v2, 0.0 }
 0x4c2   :  { %4196 = vrcp.f32 %v2926_v52  ;;  %v3086_v32 = vmul.f32 %v4195_v17, %v3044_v3  ;;  %vm2246_vm0 = vcmp.gt.f32.partialorder %v5957_v40, 0.0 }
 0x4c3   :  { %3119 = vrot.lane.b32.xlu2 %v3085_v48, %s4381_s3  ;;  %4198 = vrcp.f32 %v2927_v35 }
 0x4c4   :  { %4200 = vrcp.f32 %v2256_v57 }
 0x4c5   :  { %4202 = vrcp.f32 %v2257_v41 }
 0x4c6   :  { %4204 = vrcp.f32 %v2258_v19 }
 0x4c7   :  { %v5998_v63 = vpop.xlane.xlu2 %2890 }
 0x4c8   :  { %1783 = vrot.lane.b32.xlu1 %v5915_v43, %s4380_s2  ;;  %v2447_v4 = vpop.permute.xlu0 %2446  ;;  %v4197_v27 = vpop.eup %4196  ;;  %vm2914_vm10 = vcmp.gt.f32.partialorder %v5998_v63, 0.0 }
 0x4c9   :  { %2492 = vst.msk [vmem:[#allocation3 + $0x18] sm:$0xff] %vm2488_vm9, %v2447_v4  ;;  %v3087_v51 = vmul.f32 %v4197_v27, %v3047_v46  ;;  %v4199_v21 = vpop.eup %4198  ;;  %v3050_v43 = vpop.f32.mrf.mxu3  ;;  %v2930_v17 = vsel %vm2914_vm10, %v5998_v63, 1.0 }
 0x4ca   :  { %v3088_v11 = vmul.f32 %v4199_v21, %v3050_v43  ;;  %v4201_v0 = vpop.eup %4200 }
 0x4cb   :  { %3121 = vrot.lane.b32.xlu2 %v3086_v32, %s4381_s3  ;;  %v4203_v30 = vpop.eup %4202 }
 0x4cc   :  { %v4205_v62 = vpop.eup %4204 }
 0x4cf   :  { %v6004_v15 = vpop.xlane.xlu2 %2896 }
 0x4d0   :  { %v2449_v44 = vpop.permute.xlu0 %2448  ;;  %vm2917_vm14 = vcmp.gt.f32.partialorder %v6004_v15, 0.0 }
 0x4d1   :  { %v3053_v55 = vpop.f32.mrf.mxu3 }
 0x4d3   :  { %3123 = vrot.lane.b32.xlu2 %v3087_v51, %s4381_s3 }
 0x4d7   :  { %v1774_v33 = vpop.permute.xlu1 %1773  ;;  %v6009_v25 = vpop.xlane.xlu2 %2902 }
 0x4d8   :  { %1818 = vst.msk [vmem:[#allocation3 + $0x20] sm:$0xff] %vm1813_vm8, %v1774_v33  ;;  %v2451_v53 = vpop.permute.xlu0 %2450  ;;  %vm2920_vm5 = vcmp.gt.f32.partialorder %v6009_v25, 0.0 }
 0x4d9   :  { %2493 = vst.msk [vmem:[#allocation3 + $0x20] sm:$0xff] %vm2488_vm9, %v2449_v44  ;;  %v2259_v44 = vsel %vm2243_vm11, %v5943_v20, 1.0 }
 0x4db   :  { %3125 = vrot.lane.b32.xlu2 %v3088_v11, %s4381_s3 }
 0x4de   :  { %2892 = vadd.xlane.f32.xlu0 %v5906_v58  ;;  %v2387_v58 = vpop.f32.mrf.mxu1 }
 0x4df   :  { %v1776_v60 = vpop.permute.xlu1 %1775  ;;  %v2417_v61 = vmul.f32 %v4201_v0, %v2387_v58 }
 0x4e0   :  { %1819 = vst.msk [vmem:[#allocation3 + $0x28] sm:$0xff] %vm1813_vm8, %v1776_v60 }
 0x4e1   :  { %2494 = vst.msk [vmem:[#allocation3 + $0x28] sm:$0xff] %vm2488_vm9, %v2451_v53 }
 0x4e2   :  { %v3118_v24 = vpop.permute.xlu2 %3117 }
 0x4e3   :  { %3165 = vst.msk [vmem:[#allocation3 + $0x8] sm:$0xff] %vm3163_vm2, %v3118_v24 }
 0x4e6   :  { %v2390_v37 = vpop.f32.mrf.mxu1 }
 0x4e7   :  { %v1778_v28 = vpop.permute.xlu1 %1777  ;;  %v2418_v5 = vmul.f32 %v4203_v30, %v2390_v37  ;;  %v2933_v30 = vsel %vm2917_vm14, %v6004_v15, 1.0 }
 0x4e8   :  { %1820 = vst.msk [vmem:[#allocation3 + $0x30] sm:$0xff] %vm1813_vm8, %v1778_v28 }
 0x4ee   :  { %v2393_v23 = vpop.f32.mrf.mxu1 }
 0x4ef   :  { %v2419_v50 = vmul.f32 %v4205_v62, %v2393_v23 }
 0x4f2   :  { %2894 = vadd.xlane.f32.xlu1 %v5918_v59  ;;  %2458 = vrot.lane.b32.xlu0 %v2417_v61, %s4376_s30 }
 0x4fa   :  { %2460 = vrot.lane.b32.xlu0 %v2418_v5, %s4376_s30  ;;  %v2260_v5 = vsel %vm2244_vm15, %v5933_v6, 1.0 }
 0x502   :  { %2462 = vrot.lane.b32.xlu0 %v2419_v50, %s4376_s30  ;;  %v2261_v50 = vsel %vm2245_vm1, %v5965_v2, 1.0  ;;  %v2262_v2 = vsel %vm2246_vm0, %v5957_v40, 1.0 }
 0x503   :  { %v2887_v36 = vpop.xlane.xlu0 %2886 }
 0x504   :  { %vm2912_vm6 = vcmp.gt.f32.partialorder %v2887_v36, 0.0 }
 0x505   :  { %v2928_v22 = vsel %vm2912_vm6, %v2887_v36, 1.0 }
 0x506   :  { %4206 = vrcp.f32 %v2928_v22 }
 0x50b   :  { %1785 = vrot.lane.b32.xlu1 %v5927_v42, %s4380_s2  ;;  %v3056_v42 = vpop.f32.mrf.mxu3 }
 0x50c   :  { %v4207_v59 = vpop.eup %4206 }
 0x50d   :  { %v3089_v1 = vmul.f32 %v4207_v59, %v3053_v55 }
 0x50f   :  { %3127 = vrot.lane.b32.xlu2 %v3089_v1, %s4381_s3 }
 0x512   :  { %v2889_v48 = vpop.xlane.xlu1 %2888 }
 0x513   :  { %vm2913_vm7 = vcmp.gt.f32.partialorder %v2889_v48, 0.0  ;;  %1787 = vrot.lane.b32.xlu1 %v5935_v45, %s4380_s2  ;;  %v3059_v27 = vpop.f32.mrf.mxu3 }
 0x514   :  { %v2929_v3 = vsel %vm2913_vm7, %v2889_v48, 1.0 }
 0x515   :  { %4208 = vrcp.f32 %v2929_v3 }
 0x516   :  { %v2453_v52 = vpop.permute.xlu0 %2452  ;;  %4210 = vrcp.f32 %v2930_v17 }
 0x517   :  { %2495 = vst.msk [vmem:[#allocation3 + $0x30] sm:$0xff] %vm2488_vm9, %v2453_v52  ;;  %4212 = vrcp.f32 %v2259_v44 }
 0x51b   :  { %v4209_v4 = vpop.eup %4208  ;;  %1789 = vrot.lane.b32.xlu1 %v5945_v29, %s4380_s2  ;;  %v3062_v58 = vpop.f32.mrf.mxu3 }
 0x51c   :  { %v3090_v32 = vmul.f32 %v4209_v4, %v3056_v42  ;;  %v4211_v45 = vpop.eup %4210 }
 0x51d   :  { %v3120_v35 = vpop.permute.xlu2 %3119  ;;  %v3091_v46 = vmul.f32 %v4211_v45, %v3059_v27  ;;  %v4213_v53 = vpop.eup %4212 }
 0x51e   :  { %3166 = vst.msk [vmem:[#allocation3 + $0x10] sm:$0xff] %vm3163_vm2, %v3120_v35  ;;  %3129 = vrot.lane.b32.xlu2 %v3090_v32, %s4381_s3  ;;  %v2455_v63 = vpop.permute.xlu0 %2454 }
 0x525   :  { %v3122_v51 = vpop.permute.xlu2 %3121 }
 0x526   :  { %3167 = vst.msk [vmem:[#allocation3 + $0x18] sm:$0xff] %vm3163_vm2, %v3122_v51  ;;  %3131 = vrot.lane.b32.xlu2 %v3091_v46, %s4381_s3  ;;  %v2457_v43 = vpop.permute.xlu0 %2456 }
 0x52a   :  { %v1780_v21 = vpop.permute.xlu1 %1779 }
 0x52b   :  { %1821 = vst.msk [vmem:[#allocation3 + $0x38] sm:$0xff] %vm1813_vm8, %v1780_v21 }
 0x52c   :  { %2496 = vst.msk [vmem:[#allocation3 + $0x38] sm:$0xff] %vm2488_vm9, %v2455_v63  ;;  %2898 = vadd.xlane.f32.xlu0 %v5940_v10  ;;  %v2396_v10 = vpop.f32.mrf.mxu1 }
 0x52d   :  { %v3124_v29 = vpop.permute.xlu2 %3123  ;;  %v2420_v24 = vmul.f32 %v4213_v53, %v2396_v10 }
 0x52e   :  { %3168 = vst.msk [vmem:[#allocation3 + $0x20] sm:$0xff] %vm3163_vm2, %v3124_v29 }
 0x532   :  { %v1782_v33 = vpop.permute.xlu1 %1781 }
 0x533   :  { %1822 = vst.msk [vmem:[#allocation3 + $0x40] sm:$0xff] %vm1813_vm8, %v1782_v33  ;;  %v2936_v33 = vsel %vm2920_vm5, %v6009_v25, 1.0 }
 0x534   :  { %2497 = vst.msk [vmem:[#allocation3 + $0x40] sm:$0xff] %vm2488_vm9, %v2457_v43  ;;  %v2399_v15 = vpop.f32.mrf.mxu1 }
 0x535   :  { %v3126_v11 = vpop.permute.xlu2 %3125 }
 0x536   :  { %3169 = vst.msk [vmem:[#allocation3 + $0x28] sm:$0xff] %vm3163_vm2, %v3126_v11 }
 0x53a   :  { %v1784_v60 = vpop.permute.xlu1 %1783 }
 0x53b   :  { %1823 = vst.msk [vmem:[#allocation3 + $0x48] sm:$0xff] %vm1813_vm8, %v1784_v60 }
 0x53c   :  { %v2402_v1 = vpop.f32.mrf.mxu1 }
 0x540   :  { %2464 = vrot.lane.b32.xlu0 %v2420_v24, %s4376_s30 }
 0x544   :  { %v2405_v42 = vpop.f32.mrf.mxu1 }
 0x545   :  { %2900 = vadd.xlane.f32.xlu1 %v5948_v39 }
 0x551   :  { %v2893_v20 = vpop.xlane.xlu0 %2892 }
 0x552   :  { %vm2915_vm12 = vcmp.gt.f32.partialorder %v2893_v20, 0.0 }
 0x553   :  { %v2931_v57 = vsel %vm2915_vm12, %v2893_v20, 1.0 }
 0x554   :  { %4214 = vrcp.f32 %v2931_v57 }
 0x55a   :  { %v4215_v28 = vpop.eup %4214 }
 0x55b   :  { %v3092_v41 = vmul.f32 %v4215_v28, %v3062_v58 }
 0x55d   :  { %3133 = vrot.lane.b32.xlu2 %v3092_v41, %s4381_s3 }
 0x55e   :  { %3115 = vrot.lane.b32.xlu1 %v5974_v34, %s4381_s3  ;;  %v3065_v34 = vpop.f32.mrf.mxu3 }
 0x564   :  { %v2459_v0 = vpop.permute.xlu0 %2458 }
 0x565   :  { %2498 = vst.msk [vmem:[#allocation3 + $0x48] sm:$0xff] %vm2488_vm9, %v2459_v0  ;;  %v2895_v61 = vpop.xlane.xlu1 %2894 }
 0x566   :  { %vm2916_vm13 = vcmp.gt.f32.partialorder %v2895_v61, 0.0  ;;  %1791 = vrot.lane.b32.xlu1 %v5954_v9, %s4380_s2 }
 0x567   :  { %v2932_v39 = vsel %vm2916_vm13, %v2895_v61, 1.0 }
 0x568   :  { %4216 = vrcp.f32 %v2932_v39 }
 0x569   :  { %v3128_v19 = vpop.permute.xlu2 %3127  ;;  %4218 = vrcp.f32 %v2933_v30 }
 0x56a   :  { %3170 = vst.msk [vmem:[#allocation3 + $0x30] sm:$0xff] %vm3163_vm2, %v3128_v19  ;;  %2904 = vadd.xlane.f32.xlu0 %v5963_v47  ;;  %4220 = vrcp.f32 %v2260_v5  ;;  %v3068_v47 = vpop.f32.mrf.mxu3 }
 0x56b   :  { %4222 = vrcp.f32 %v2261_v50  ;;  %v6386_v50 = vld [vmem:[#allocation53_spill] sm:$0xff] }
 0x56c   :  { %4224 = vrcp.f32 %v2262_v2 }
 0x56e   :  { %v4217_v37 = vpop.eup %4216  ;;  %1793 = vrot.lane.b32.xlu1 %v5961_v54, %s4380_s2  ;;  %v2461_v54 = vpop.permute.xlu0 %2460 }
 0x56f   :  { %v3093_v9 = vmul.f32 %v4217_v37, %v3065_v34  ;;  %v4219_v62 = vpop.eup %4218 }
 0x570   :  { %v3094_v23 = vmul.f32 %v4219_v62, %v3068_v47  ;;  %v4221_v22 = vpop.eup %4220  ;;  %v4243_v47 = vld [vmem:[#allocation9] sm:$0xf] }
 0x571   :  { %3135 = vrot.lane.b32.xlu2 %v3093_v9, %s4381_s3  ;;  %v2421_v6 = vmul.f32 %v4221_v22, %v2399_v15  ;;  %v4223_v55 = vpop.eup %4222  ;;  %v6105_v15 = vperm.slane %v4243_v47, 3  ;;  %v3181_v22 = vld [vmem:[#allocation3 + $0x8] sm:$0xff] }
 0x572   :  { %v2422_v48 = vmul.f32 %v4223_v55, %v2402_v1  ;;  %v4225_v17 = vpop.eup %4224  ;;  %v3071_v27 = vpop.f32.mrf.mxu3  ;;  %v6388_v55 = vld [vmem:[#allocation27_spill] sm:$0xff] }
 0x573   :  { %v2423_v4 = vmul.f32 %v4225_v17, %v2405_v42  ;;  %v510_v1 = vadd.f32 %v6388_v55, %v6105_v15  ;;  %v6389_v17 = vld [vmem:[#allocation21_spill] sm:$0xff] }
 0x574   :  { %v512_v42 = vadd.f32 %v6389_v17, %v6105_v15 }
 0x576   :  { %1795 = vrot.lane.b32.xlu1 %v5971_v26, %s4380_s2  ;;  %v2463_v52 = vpop.permute.xlu0 %2462 }
 0x578   :  { %v3130_v36 = vpop.permute.xlu2 %3129 }
 0x579   :  { %3171 = vst.msk [vmem:[#allocation3 + $0x38] sm:$0xff] %vm3163_vm2, %v3130_v36  ;;  %3137 = vrot.lane.b32.xlu2 %v3094_v23, %s4381_s3  ;;  %v505_v36 = vadd.f32 %v6386_v50, %v6105_v15 }
 0x57a   :  { %v3074_v44 = vpop.f32.mrf.mxu3 }
 0x57d   :  { %v1786_v59 = vpop.permute.xlu1 %1785 }
 0x57e   :  { %1824 = vst.msk [vmem:[#allocation3 + $0x50] sm:$0xff] %vm1813_vm8, %v1786_v59  ;;  %2466 = vrot.lane.b32.xlu0 %v2421_v6, %s4376_s30  ;;  %v6387_v6 = vld [vmem:[#allocation55_spill] sm:$0xff] }
 0x57f   :  { %2499 = vst.msk [vmem:[#allocation3 + $0x50] sm:$0xff] %vm2488_vm9, %v2461_v54  ;;  %v507_v54 = vadd.f32 %v6387_v6, %v6105_v15 }
 0x580   :  { %v3132_v26 = vpop.permute.xlu2 %3131 }
 0x581   :  { %3172 = vst.msk [vmem:[#allocation3 + $0x40] sm:$0xff] %vm3163_vm2, %v3132_v26  ;;  %v6113_v2 = vadd.f32 %v3181_v22, %v507_v54  ;;  %v3182_v26 = vld [vmem:[#allocation3 + $0x10] sm:$0xff] }
 0x582   :  { %v3077_v60 = vpop.f32.mrf.mxu3 }
 0x585   :  { %v1788_v3 = vpop.permute.xlu1 %1787 }
 0x586   :  { %1825 = vst.msk [vmem:[#allocation3 + $0x58] sm:$0xff] %vm1813_vm8, %v1788_v3  ;;  %2468 = vrot.lane.b32.xlu0 %v2422_v48, %s4376_s30  ;;  %v6119_v3 = vadd.f32 %v3182_v26, %v510_v1  ;;  %v542_v26 = vadd.f32 %v5825_v18, %v6105_v15 }
 0x587   :  { %2500 = vst.msk [vmem:[#allocation3 + $0x58] sm:$0xff] %vm2488_vm9, %v2463_v52  ;;  %v3183_v52 = vld [vmem:[#allocation3 + $0x18] sm:$0xff] }
 0x58a   :  { %v3080_v61 = vpop.f32.mrf.mxu3 }
 0x58d   :  { %v1790_v32 = vpop.permute.xlu1 %1789 }
 0x58e   :  { %1826 = vst.msk [vmem:[#allocation3 + $0x60] sm:$0xff] %vm1813_vm8, %v1790_v32  ;;  %2470 = vrot.lane.b32.xlu0 %v2423_v4, %s4376_s30  ;;  %v6124_v32 = vadd.f32 %v3183_v52, %v512_v42 }
 0x59f   :  { %v2899_v40 = vpop.xlane.xlu0 %2898 }
 0x5a0   :  { %vm2918_vm3 = vcmp.gt.f32.partialorder %v2899_v40, 0.0 }
 0x5a1   :  { %v2934_v35 = vsel %vm2918_vm3, %v2899_v40, 1.0  ;;  %v3184_v40 = vld [vmem:[#allocation3 + $0x20] sm:$0xff] }
 0x5a2   :  { %4226 = vrcp.f32 %v2934_v35  ;;  %v6390_v35 = vld [vmem:[#allocation47_spill] sm:$0xff] }
 0x5a8   :  { %v4227_v45 = vpop.eup %4226 }
 0x5a9   :  { %v3095_v46 = vmul.f32 %v4227_v45, %v3071_v27  ;;  %v515_v45 = vadd.f32 %v6390_v35, %v6105_v15 }
 0x5ab   :  { %3139 = vrot.lane.b32.xlu2 %v3095_v46, %s4381_s3  ;;  %v6129_v46 = vadd.f32 %v3184_v40, %v515_v45 }
 0x5b2   :  { %v2465_v51 = vpop.permute.xlu0 %2464 }
 0x5b3   :  { %2501 = vst.msk [vmem:[#allocation3 + $0x60] sm:$0xff] %vm2488_vm9, %v2465_v51  ;;  %v3185_v51 = vld [vmem:[#allocation3 + $0x28] sm:$0xff] }
 0x5b7   :  { %v3134_v63 = vpop.permute.xlu2 %3133 }
 0x5b8   :  { %3173 = vst.msk [vmem:[#allocation3 + $0x48] sm:$0xff] %vm3163_vm2, %v3134_v63  ;;  %v2901_v21 = vpop.xlane.xlu1 %2900  ;;  %v517_v63 = vadd.f32 %v5703_v56, %v6105_v15  ;;  %v3188_v56 = vld [vmem:[#allocation3 + $0x40] sm:$0xff] }
 0x5b9   :  { %vm2919_vm4 = vcmp.gt.f32.partialorder %v2901_v21, 0.0 }
 0x5ba   :  { %v2935_v29 = vsel %vm2919_vm4, %v2901_v21, 1.0 }
 0x5bb   :  { %4228 = vrcp.f32 %v2935_v29  ;;  %v6134_v29 = vadd.f32 %v3185_v51, %v517_v63 }
 0x5bc   :  { %4230 = vrcp.f32 %v2936_v33  ;;  %v520_v33 = vadd.f32 %v5718_v14, %v6105_v15 }
 0x5bf   :  { %v3189_v14 = vld [vmem:[#allocation3 + $0x48] sm:$0xff] }
 0x5c1   :  { %v4229_v43 = vpop.eup %4228 }
 0x5c2   :  { %v3096_v11 = vmul.f32 %v4229_v43, %v3074_v44  ;;  %v4231_v53 = vpop.eup %4230  ;;  %v3186_v44 = vld [vmem:[#allocation3 + $0x30] sm:$0xff] }
 0x5c3   :  { %v3097_v10 = vmul.f32 %v4231_v53, %v3077_v60  ;;  %v3187_v60 = vld [vmem:[#allocation3 + $0x38] sm:$0xff]  ;;  %v522_v53 = vadd.f32 %v5737_v38, %v6105_v15 }
 0x5c4   :  { %3141 = vrot.lane.b32.xlu2 %v3096_v11, %s4381_s3  ;;  %v6139_v11 = vadd.f32 %v3186_v44, %v520_v33 }
 0x5cb   :  { %v3136_v24 = vpop.permute.xlu2 %3135 }
 0x5cc   :  { %3174 = vst.msk [vmem:[#allocation3 + $0x50] sm:$0xff] %vm3163_vm2, %v3136_v24  ;;  %3143 = vrot.lane.b32.xlu2 %v3097_v10, %s4381_s3  ;;  %v6144_v24 = vadd.f32 %v3187_v60, %v522_v53 }
 0x5d0   :  { %v3116_v20 = vpop.permute.xlu1 %3115 }
 0x5d1   :  { %3164 = vst.msk [vmem:[#allocation3] sm:$0xff] %vm3163_vm2, %v3116_v20  ;;  %v525_v20 = vadd.f32 %v5748_v31, %v6105_v15  ;;  %v4382_v31 = vmov 128.0  }
 0x5d3   :  { %v3138_v57 = vpop.permute.xlu2 %3137  ;;  %v3190_v38 = vld [vmem:[#allocation3 + $0x50] sm:$0xff] }
 0x5d4   :  { %3175 = vst.msk [vmem:[#allocation3 + $0x58] sm:$0xff] %vm3163_vm2, %v3138_v57 }
 0x5d8   :  { %v1792_v25 = vpop.permute.xlu1 %1791  ;;  %v3180_v23 = vld [vmem:[#allocation3] sm:$0xff] }
 0x5d9   :  { %1827 = vst.msk [vmem:[#allocation3 + $0x68] sm:$0xff] %vm1813_vm8, %v1792_v25  ;;  %v6111_v59 = vadd.f32 %v3180_v23, %v505_v36  ;;  %v6149_v25 = vadd.f32 %v3188_v56, %v525_v20  ;;  %v540_v36 = vadd.f32 %v5814_v8, %v6105_v15 }
 0x5db   :  { %v3228_v48 = vadd.f32 %v6113_v2, %v6111_v59 }
 0x5dd   :  { %v2905_v28 = vpop.xlane.xlu0 %2904  ;;  %v3229_v4 = vadd.f32 %v3228_v48, %v6119_v3 }
 0x5de   :  { %vm2921_vm6 = vcmp.gt.f32.partialorder %v2905_v28, 0.0 }
 0x5df   :  { %v2937_v58 = vsel %vm2921_vm6, %v2905_v28, 1.0  ;;  %v3230_v27 = vadd.f32 %v3229_v4, %v6124_v32  ;;  %v527_v28 = vadd.f32 %v5757_v49, %v6105_v15  ;;  %v535_v49 = vadd.f32 %v5791_v16, %v6105_v15 }
 0x5e0   :  { %4232 = vrcp.f32 %v2937_v58  ;;  %v1794_v41 = vpop.permute.xlu1 %1793 }
 0x5e1   :  { %1828 = vst.msk [vmem:[#allocation3 + $0x70] sm:$0xff] %vm1813_vm8, %v1794_v41  ;;  %v3231_v21 = vadd.f32 %v3230_v27, %v6129_v46  ;;  %v6154_v41 = vadd.f32 %v3189_v14, %v527_v28  ;;  %4234 = vrcp.f32 %v4382_v31 }
 0x5e3   :  { %v3232_v43 = vadd.f32 %v3231_v21, %v6134_v29 }
 0x5e5   :  { %v3233_v10 = vadd.f32 %v3232_v43, %v6139_v11 }
 0x5e6   :  { %v4233_v0 = vpop.eup %4232 }
 0x5e7   :  { %v3098_v39 = vmul.f32 %v4233_v0, %v3080_v61  ;;  %v3234_v57 = vadd.f32 %v3233_v10, %v6144_v24  ;;  %v530_v0 = vadd.f32 %v5770_v7, %v6105_v15  ;;  %v537_v7 = vadd.f32 %v5801_v12, %v6105_v15  ;;  %v4235_v50 = vpop.eup %4234 }
 0x5e8   :  { %v1796_v19 = vpop.permute.xlu1 %1795  ;;  %v3250_v54 = vmul.f32 128.0, %v4235_v50 }
 0x5e9   :  { %1829 = vst.msk [vmem:[#allocation3 + $0x78] sm:$0xff] %vm1813_vm8, %v1796_v19  ;;  %3145 = vrot.lane.b32.xlu1 %v3098_v39, %s4381_s3  ;;  %v3235_v58 = vadd.f32 %v3234_v57, %v6149_v25  ;;  %v6159_v39 = vadd.f32 %v3190_v38, %v530_v0  ;;  %v3191_v19 = vld [vmem:[#allocation3 + $0x58] sm:$0xff]  ;;  %vm3254_vm8 = vweird.f32 %v4235_v50 }
 0x5ea   :  { %v3251_v52 = vsub.f32 1.0, %v3250_v54 }
 0x5eb   :  { %v3236_v61 = vadd.f32 %v3235_v58, %v6154_v41 }
 0x5ec   :  { %v3252_v4 = vmul.f32 %v4235_v50, %v3251_v52 }
 0x5ee   :  { %v3253_v45 = vadd.f32 %v4235_v50, %v3252_v4 }
 0x5f0   :  { %v2467_v30 = vpop.permute.xlu0 %2466  ;;  %v3255_v51 = vsel %vm3254_vm8, %v4235_v50, %v3253_v45 }
 0x5f1   :  { %2502 = vst.msk [vmem:[#allocation3 + $0x68] sm:$0xff] %vm2488_vm9, %v2467_v30 }
 0x5f8   :  { %v2469_v34 = vpop.permute.xlu0 %2468 }
 0x5f9   :  { %2503 = vst.msk [vmem:[#allocation3 + $0x70] sm:$0xff] %vm2488_vm9, %v2469_v34  ;;  %v532_v34 = vadd.f32 %v5779_v13, %v6105_v15 }
 0x600   :  { %v2471_v37 = vpop.permute.xlu0 %2470 }
 0x601   :  { %2504 = vst.msk [vmem:[#allocation3 + $0x78] sm:$0xff] %vm2488_vm9, %v2471_v37  ;;  %v3237_v37 = vadd.f32 %v3236_v61, %v6159_v39 }
 0x605   :  { %v3140_v9 = vpop.permute.xlu2 %3139 }
 0x606   :  { %3176 = vst.msk [vmem:[#allocation3 + $0x60] sm:$0xff] %vm3163_vm2, %v3140_v9 }
 0x60d   :  { %v3192_v30 = vld [vmem:[#allocation3 + $0x60] sm:$0xff] }
 0x60e   :  { %v3224_v47 = vadd.f32 %v3192_v30, %v535_v49 }
 0x61e   :  { %v3142_v5 = vpop.permute.xlu2 %3141 }
 0x61f   :  { %3177 = vst.msk [vmem:[#allocation3 + $0x68] sm:$0xff] %vm3163_vm2, %v3142_v5 }
 0x626   :  { %v3144_v62 = vpop.permute.xlu2 %3143  ;;  %v3193_v9 = vld [vmem:[#allocation3 + $0x68] sm:$0xff] }
 0x627   :  { %3178 = vst.msk [vmem:[#allocation3 + $0x70] sm:$0xff] %vm3163_vm2, %v3144_v62  ;;  %v3223_v62 = vadd.f32 %v3191_v19, %v532_v34  ;;  %v3225_v22 = vadd.f32 %v3193_v9, %v537_v7 }
 0x629   :  { %v3238_v13 = vadd.f32 %v3237_v37, %v3223_v62 }
 0x62b   :  { %v3239_v6 = vadd.f32 %v3238_v13, %v3224_v47 }
 0x62d   :  { %v3240_v55 = vadd.f32 %v3239_v6, %v3225_v22 }
 0x62e   :  { %v3194_v23 = vld [vmem:[#allocation3 + $0x70] sm:$0xff] }
 0x62f   :  { %v3226_v16 = vadd.f32 %v3194_v23, %v540_v36 }
 0x631   :  { %v3241_v12 = vadd.f32 %v3240_v55, %v3226_v16 }
 0x65b   :  { %v3146_v5 = vpop.permute.xlu1 %3145 }
 0x65c   :  { %3179 = vst.msk [vmem:[#allocation3 + $0x78] sm:$0xff] %vm3163_vm2, %v3146_v5 }
 0x663   :  { %v3195_v1 = vld [vmem:[#allocation3 + $0x78] sm:$0xff] }
 0x664   :  { %v3227_v48 = vadd.f32 %v3195_v1, %v542_v26 }
 0x666   :  { %v3242_v17 = vadd.f32 %v3241_v12, %v3227_v48 }
 0x668   :  { %v3243_v42 = vrot.slane %v3242_v17, 4 }
 0x66a   :  { %v3244_v40 = vadd.f32 %v3243_v42, %v3242_v17 }
 0x66c   :  { %v3245_v35 = vrot.slane %v3244_v40, 2 }
 0x66e   :  { %v3246_v8 = vadd.f32 %v3245_v35, %v3244_v40 }
 0x670   :  { %v3247_v27 = vrot.slane %v3246_v8, 1 }
 0x672   :  { %v3248_v63 = vadd.f32 %v3247_v27, %v3246_v8 }
 0x674   :  { %v3256_v21 = vmul.f32 %v3255_v51, %v3248_v63 }
 0x676   :  { %v6174_v44 = vsub.f32 %v6111_v59, %v3256_v21  ;;  %v6177_v18 = vsub.f32 %v6113_v2, %v3256_v21  ;;  %v6180_v15 = vsub.f32 %v6119_v3, %v3256_v21  ;;  %v6187_v60 = vsub.f32 %v6124_v32, %v3256_v21 }
 0x677   :  { %v6190_v53 = vsub.f32 %v6129_v46, %v3256_v21  ;;  %v6195_v10 = vsub.f32 %v6134_v29, %v3256_v21  ;;  %v6200_v20 = vsub.f32 %v6139_v11, %v3256_v21  ;;  %v3264_v46 = vsub.f32 %v6144_v24, %v3256_v21 }
 0x678   :  { %v3273_v33 = vmul.f32 %v6174_v44, %v6174_v44  ;;  %v3274_v43 = vmul.f32 %v6177_v18, %v6177_v18  ;;  %v3275_v59 = vmul.f32 %v6180_v15, %v6180_v15  ;;  %v3276_v3 = vmul.f32 %v6187_v60, %v6187_v60 }
 0x679   :  { %v3277_v32 = vmul.f32 %v6190_v53, %v6190_v53  ;;  %v3278_v14 = vmul.f32 %v6195_v10, %v6195_v10  ;;  %v3265_v29 = vsub.f32 %v6149_v25, %v3256_v21  ;;  %v3279_v58 = vmul.f32 %v6200_v20, %v6200_v20 }
 0x67a   :  { %v3289_v2 = vadd.f32 %v3274_v43, %v3273_v33  ;;  %v3266_v0 = vsub.f32 %v6154_v41, %v3256_v21  ;;  %v3280_v11 = vmul.f32 %v3264_v46, %v3264_v46  ;;  %v3267_v31 = vsub.f32 %v6159_v39, %v3256_v21 }
 0x67b   :  { %v3281_v19 = vmul.f32 %v3265_v29, %v3265_v29  ;;  %v3268_v34 = vsub.f32 %v3223_v62, %v3256_v21  ;;  %v3269_v37 = vsub.f32 %v3224_v47, %v3256_v21  ;;  %v3270_v7 = vsub.f32 %v3225_v22, %v3256_v21 }
 0x67c   :  { %v3290_v56 = vadd.f32 %v3289_v2, %v3275_v59  ;;  %v3282_v24 = vmul.f32 %v3266_v0, %v3266_v0  ;;  %v3283_v9 = vmul.f32 %v3267_v31, %v3267_v31  ;;  %v3271_v50 = vsub.f32 %v3226_v16, %v3256_v21 }
 0x67d   :  { %v3284_v25 = vmul.f32 %v3268_v34, %v3268_v34  ;;  %v3285_v36 = vmul.f32 %v3269_v37, %v3269_v37  ;;  %v3272_v6 = vsub.f32 %v3227_v48, %v3256_v21  ;;  %v3286_v41 = vmul.f32 %v3270_v7, %v3270_v7  ;;  %v3976_v21 = vld [vmem:[%s6255_s4] ss:$0 sm:$0xff] }
 0x67e   :  { %v3291_v57 = vadd.f32 %v3290_v56, %v3276_v3  ;;  %v3287_v26 = vmul.f32 %v3271_v50, %v3271_v50  ;;  %v6223_v3 = vld [vmem:[%s6255_s4 + $0x1] ss:$0 sm:$0xff]  ;;  %s4383_s4 = smov [#allocation12]  }
 0x67f   :  { %v3288_v39 = vmul.f32 %v3272_v6, %v3272_v6  ;;  %s3442_s19 = sshll.u32 %s4383_s4, 4  ;;  %s3443_s19 = int_to_ptr.vmem [resolvable:$true] %s3442_s19 }
 0x680   :  { %v3292_v28 = vadd.f32 %v3291_v57, %v3277_v32 }
 0x682   :  { %v3293_v38 = vadd.f32 %v3292_v28, %v3278_v14 }
 0x684   :  { %v3294_v61 = vadd.f32 %v3293_v38, %v3279_v58 }
 0x686   :  { %v3295_v30 = vadd.f32 %v3294_v61, %v3280_v11 }
 0x688   :  { %v3296_v49 = vadd.f32 %v3295_v30, %v3281_v19 }
 0x68a   :  { %v3297_v5 = vadd.f32 %v3296_v49, %v3282_v24 }
 0x68c   :  { %v3298_v23 = vadd.f32 %v3297_v5, %v3283_v9 }
 0x68e   :  { %v3299_v13 = vadd.f32 %v3298_v23, %v3284_v25 }
 0x690   :  { %v3300_v54 = vadd.f32 %v3299_v13, %v3285_v36 }
 0x692   :  { %v3301_v55 = vadd.f32 %v3300_v54, %v3286_v41 }
 0x694   :  { %v3302_v1 = vadd.f32 %v3301_v55, %v3287_v26 }
 0x696   :  { %v3303_v12 = vadd.f32 %v3302_v1, %v3288_v39 }
 0x698   :  { %v3304_v62 = vrot.slane %v3303_v12, 4 }
 0x69a   :  { %v3305_v52 = vadd.f32 %v3304_v62, %v3303_v12 }
 0x69c   :  { %v3306_v17 = vrot.slane %v3305_v52, 2 }
 0x69e   :  { %v3307_v47 = vadd.f32 %v3306_v17, %v3305_v52 }
 0x6a0   :  { %v3308_v42 = vrot.slane %v3307_v47, 1 }
 0x6a2   :  { %v3309_v4 = vadd.f32 %v3308_v42, %v3307_v47 }
 0x6a4   :  { %v3310_v22 = vmul.f32 %v3309_v4, %v3255_v51 }
 0x6a6   :  { %v3311_v40 = vadd.f32 1e-05, %v3310_v22 }
 0x6a8   :  { %4236 = vrsqrt.f32 %v3311_v40  ;;  %vm3318_vm2 = vweird.f32 %v3311_v40 }
 0x6ae   :  { %v4237_v16 = vpop.eup %4236 }
 0x6af   :  { %v3313_v35 = vmul.f32 %v4237_v16, %v3311_v40  ;;  %vm3319_vm9 = vweird.f32 %v4237_v16 }
 0x6b0   :  { %vm3320_vm7 = vmor %vm3318_vm2, %vm3319_vm9 }
 0x6b1   :  { %v3314_v45 = vmul.f32 %v4237_v16, %v3313_v35 }
 0x6b3   :  { %v3315_v48 = vmul.f32 0.5, %v3314_v45 }
 0x6b5   :  { %v3316_v8 = vsub.f32 1.5, %v3315_v48 }
 0x6b7   :  { %v3317_v27 = vmul.f32 %v4237_v16, %v3316_v8 }
 0x6b9   :  { %v3321_v63 = vsel %vm3320_vm7, %v4237_v16, %v3317_v27 }
 0x6ba   :  { %v3322_v33 = vmul.f32 %v3321_v63, %v6174_v44  ;;  %v3323_v51 = vmul.f32 %v3321_v63, %v6177_v18  ;;  %v3324_v43 = vmul.f32 %v3321_v63, %v6180_v15  ;;  %v3325_v59 = vmul.f32 %v3321_v63, %v6187_v60 }
 0x6bb   :  { %v3326_v2 = vmul.f32 %v3321_v63, %v6190_v53  ;;  %v3327_v56 = vmul.f32 %v3321_v63, %v6195_v10  ;;  %v3328_v14 = vmul.f32 %v3321_v63, %v6200_v20  ;;  %v3329_v44 = vmul.f32 %v3321_v63, %v3264_v46 }
 0x6bc   :  { %v3340_v32 = vmul.f32 %v3976_v21, %v3322_v33  ;;  %v3341_v57 = vmul.f32 %v3976_v21, %v3323_v51  ;;  %v3342_v28 = vmul.f32 %v3976_v21, %v3324_v43  ;;  %v3330_v18 = vmul.f32 %v3321_v63, %v3265_v29 }
 0x6bd   :  { %v3331_v58 = vmul.f32 %v3321_v63, %v3266_v0  ;;  %v3332_v15 = vmul.f32 %v3321_v63, %v3267_v31  ;;  %v3343_v38 = vmul.f32 %v3976_v21, %v3325_v59  ;;  %v3333_v60 = vmul.f32 %v3321_v63, %v3268_v34 }
 0x6be   :  { %v3334_v11 = vmul.f32 %v3321_v63, %v3269_v37  ;;  %v3335_v53 = vmul.f32 %v3321_v63, %v3270_v7  ;;  %v3344_v61 = vmul.f32 %v3976_v21, %v3326_v2  ;;  %v3336_v19 = vmul.f32 %v3321_v63, %v3271_v50 }
 0x6bf   :  { %v3345_v30 = vmul.f32 %v3976_v21, %v3327_v56  ;;  %v3358_v24 = vadd.f32 %v6223_v3, %v3340_v32  ;;  %v3359_v10 = vadd.f32 %v6223_v3, %v3341_v57  ;;  %v3337_v49 = vmul.f32 %v3321_v63, %v3272_v6 }
 0x6c0   :  { %v3346_v9 = vmul.f32 %v3976_v21, %v3328_v14  ;;  %v3347_v5 = vmul.f32 %v3976_v21, %v3329_v44  ;;  %v3360_v20 = vadd.f32 %v6223_v3, %v3342_v28  ;;  %v3348_v46 = vmul.f32 %v3976_v21, %v3330_v18 }
 0x6c1   :  { %v3349_v29 = vmul.f32 %v3976_v21, %v3331_v58  ;;  %v3350_v0 = vmul.f32 %v3976_v21, %v3332_v15  ;;  %v3361_v31 = vadd.f32 %v6223_v3, %v3343_v38  ;;  %v3351_v34 = vmul.f32 %v3976_v21, %v3333_v60 }
 0x6c2   :  { %v3352_v37 = vmul.f32 %v3976_v21, %v3334_v11  ;;  %v3353_v7 = vmul.f32 %v3976_v21, %v3335_v53  ;;  %v3362_v25 = vadd.f32 %v6223_v3, %v3344_v61  ;;  %v3354_v23 = vmul.f32 %v3976_v21, %v3336_v19 }
 0x6c3   :  { %v3363_v50 = vadd.f32 %v6223_v3, %v3345_v30  ;;  %vm3374_vm10 = vcmp.gt.f32.partialorder %v3358_v24, 0.0  ;;  %vm3375_vm11 = vcmp.gt.f32.partialorder %v3359_v10, 0.0  ;;  %v3364_v36 = vadd.f32 %v6223_v3, %v3346_v9 }
 0x6c4   :  { %v3390_v13 = vmul.f32 0.01, %v3358_v24  ;;  %v3391_v6 = vmul.f32 0.01, %v3359_v10  ;;  %v3392_v41 = vmul.f32 0.01, %v3360_v20  ;;  %v3355_v54 = vmul.f32 %v3976_v21, %v3337_v49 }
 0x6c5   :  { %v3365_v26 = vadd.f32 %v6223_v3, %v3347_v5  ;;  %vm3376_vm12 = vcmp.gt.f32.partialorder %v3360_v20, 0.0  ;;  %v3393_v55 = vmul.f32 0.01, %v3361_v31  ;;  %v3366_v39 = vadd.f32 %v6223_v3, %v3348_v46 }
 0x6c6   :  { %vm3377_vm13 = vcmp.gt.f32.partialorder %v3361_v31, 0.0  ;;  %v3394_v1 = vmul.f32 0.01, %v3362_v25  ;;  %v3406_v12 = vsel %vm3374_vm10, %v3358_v24, %v3390_v13  ;;  %v3367_v62 = vadd.f32 %v6223_v3, %v3349_v29 }
 0x6c7   :  { %vm3378_vm14 = vcmp.gt.f32.partialorder %v3362_v25, 0.0  ;;  %v3395_v52 = vmul.f32 0.01, %v3363_v50  ;;  %v3407_v17 = vsel %vm3375_vm11, %v3359_v10, %v3391_v6  ;;  %v3368_v47 = vadd.f32 %v6223_v3, %v3350_v0  ;;  %3422 = vst [vmem:[#allocation12] sm:$0xff] %v3406_v12 }
 0x6c8   :  { %vm3379_vm15 = vcmp.gt.f32.partialorder %v3363_v50, 0.0  ;;  %v3396_v42 = vmul.f32 0.01, %v3364_v36  ;;  %v3408_v4 = vsel %vm3376_vm12, %v3360_v20, %v3392_v41  ;;  %v3369_v22 = vadd.f32 %v6223_v3, %v3351_v34  ;;  %3423 = vst [vmem:[#allocation12 + $0x8] sm:$0xff] %v3407_v17 }
 0x6c9   :  { %vm3380_vm1 = vcmp.gt.f32.partialorder %v3364_v36, 0.0  ;;  %v3397_v40 = vmul.f32 0.01, %v3365_v26  ;;  %v3409_v16 = vsel %vm3377_vm13, %v3361_v31, %v3393_v55  ;;  %v3370_v35 = vadd.f32 %v6223_v3, %v3352_v37  ;;  %3424 = vst [vmem:[#allocation12 + $0x10] sm:$0xff] %v3408_v4 }
 0x6ca   :  { %vm3381_vm0 = vcmp.gt.f32.partialorder %v3365_v26, 0.0  ;;  %v3398_v45 = vmul.f32 0.01, %v3366_v39  ;;  %v3410_v48 = vsel %vm3378_vm14, %v3362_v25, %v3394_v1  ;;  %v3371_v8 = vadd.f32 %v6223_v3, %v3353_v7  ;;  %3425 = vst [vmem:[#allocation12 + $0x18] sm:$0xff] %v3409_v16 }
 0x6cb   :  { %vm3382_vm3 = vcmp.gt.f32.partialorder %v3366_v39, 0.0  ;;  %v3399_v27 = vmul.f32 0.01, %v3367_v62  ;;  %v3411_v63 = vsel %vm3379_vm15, %v3363_v50, %v3395_v52  ;;  %v3372_v21 = vadd.f32 %v6223_v3, %v3354_v23  ;;  %3426 = vst [vmem:[#allocation12 + $0x20] sm:$0xff] %v3410_v48 }
 0x6cc   :  { %vm3383_vm4 = vcmp.gt.f32.partialorder %v3367_v62, 0.0  ;;  %v3400_v33 = vmul.f32 0.01, %v3368_v47  ;;  %v3412_v51 = vsel %vm3380_vm1, %v3364_v36, %v3396_v42  ;;  %v3373_v43 = vadd.f32 %v6223_v3, %v3355_v54  ;;  %3427 = vst [vmem:[#allocation12 + $0x28] sm:$0xff] %v3411_v63 }
 0x6cd   :  { %vm3384_vm5 = vcmp.gt.f32.partialorder %v3368_v47, 0.0  ;;  %v3401_v59 = vmul.f32 0.01, %v3369_v22  ;;  %v3413_v2 = vsel %vm3381_vm0, %v3365_v26, %v3397_v40  ;;  %vm3385_vm6 = vcmp.gt.f32.partialorder %v3369_v22, 0.0  ;;  %3428 = vst [vmem:[#allocation12 + $0x30] sm:$0xff] %v3412_v51 }
 0x6ce   :  { %v3402_v56 = vmul.f32 0.01, %v3370_v35  ;;  %v3414_v32 = vsel %vm3382_vm3, %v3366_v39, %v3398_v45  ;;  %vm3386_vm8 = vcmp.gt.f32.partialorder %v3370_v35, 0.0  ;;  %v3403_v57 = vmul.f32 0.01, %v3371_v8  ;;  %3429 = vst [vmem:[#allocation12 + $0x38] sm:$0xff] %v3413_v2 }
 0x6cf   :  { %v3415_v14 = vsel %vm3383_vm4, %v3367_v62, %v3399_v27  ;;  %vm3387_vm9 = vcmp.gt.f32.partialorder %v3371_v8, 0.0  ;;  %v3404_v44 = vmul.f32 0.01, %v3372_v21  ;;  %v3416_v28 = vsel %vm3384_vm5, %v3368_v47, %v3400_v33  ;;  %3430 = vst [vmem:[#allocation12 + $0x40] sm:$0xff] %v3414_v32 }
 0x6d0   :  { %vm3388_vm2 = vcmp.gt.f32.partialorder %v3372_v21, 0.0  ;;  %v3405_v3 = vmul.f32 0.01, %v3373_v43  ;;  %v3417_v18 = vsel %vm3385_vm6, %v3369_v22, %v3401_v59  ;;  %vm3389_vm7 = vcmp.gt.f32.partialorder %v3373_v43, 0.0  ;;  %3431 = vst [vmem:[#allocation12 + $0x48] sm:$0xff] %v3415_v14 }
 0x6d1   :  { %v3418_v58 = vsel %vm3386_vm8, %v3370_v35, %v3402_v56  ;;  %v3419_v15 = vsel %vm3387_vm9, %v3371_v8, %v3403_v57  ;;  %3432 = vst [vmem:[#allocation12 + $0x50] sm:$0xff] %v3416_v28  ;;  %v3420_v38 = vsel %vm3388_vm2, %v3372_v21, %v3404_v44 }
 0x6d2   :  { %3433 = vst [vmem:[#allocation12 + $0x58] sm:$0xff] %v3417_v18  ;;  %v3421_v60 = vsel %vm3389_vm7, %v3373_v43, %v3405_v3 }
 0x6d3   :  { %3434 = vst [vmem:[#allocation12 + $0x60] sm:$0xff] %v3418_v58 }
 0x6d4   :  { %3435 = vst [vmem:[#allocation12 + $0x68] sm:$0xff] %v3419_v15 }
 0x6d5   :  { %3436 = vst [vmem:[#allocation12 + $0x70] sm:$0xff] %v3420_v38 }
 0x6d6   :  { %3437 = vst [vmem:[#allocation12 + $0x78] sm:$0xff] %v3421_v60 }
 0x6d7   :  { %3450 = dma.vmem_to_hbm [thread:$0]  %s3443_s19, 2048, %s3445_s22, [#allocation6], %s4384_s23, %s4384_s23, %s4385_s24  }
 0x6d8   :  { %4370 = dma.done.wait [#allocation6], 2048  }
 0x6d9   :  { %4371 = vsyncadd [#allocation6], 4294965248 }
 0x6da   :  { %3455 = vsyncpa [#allocation5], 1 }
 0x6db   :  { %3456 = vsyncpa [#allocation8], 1 }
 0x6dc   :  { %3457 = vsyncpa [#allocation11], 1 }
 0x6dd   :  { %3458 = vsyncpa [#allocation6], 1 }

</bundles_post_ra>
